<compile_context>
chip_gen: v5e
topology: v5e:2x2
jax: 0.10.0
libtpu: 0.0.40
codegen_flags: <defaults>
</compile_context>

<pallas_src>
import math
import random

import jax
import jax.numpy as jnp
from jax.experimental import pallas as pl
from jax.experimental.pallas import tpu as pltpu


# ----------------------------- helpers -------------------------------------

def _round_up(n, m):
    return ((n + m - 1) // m) * m


# ----------------------------- Pallas kernel -------------------------------

def _make_seq2seq_kernel(n_layers, src_len, max_len, hid, trg_vocab,
                         trg_vocab_pad, batch_pad):
    """Whole encoder + decoder forward in one kernel (no grid, fully unrolled)."""
    n_steps = max_len - 1
    f32, bf16 = jnp.float32, jnp.bfloat16

    def combine(gates, c_prev):
        # Packed gate layout [i | f | g | o], each `hid` lanes wide.
        # One sigmoid + one tanh over the whole packed block (2 EUP passes),
        # then sub-vreg lane slices pick the gates.
        sig = jax.nn.sigmoid(gates)
        th = jnp.tanh(gates)
        i_g = sig[:, 0 * hid:1 * hid]
        f_g = sig[:, 1 * hid:2 * hid]
        g_g = th[:, 2 * hid:3 * hid]
        o_g = sig[:, 3 * hid:4 * hid]
        c_new = f_g * c_prev + i_g * g_g
        h_new = o_g * jnp.tanh(c_new)
        return h_new, c_new

    def kernel(tf_ref, enc_g0_ref, trg_emb_ref, *rest):
        it = iter(rest)
        # Encoder weights (layer 0 input projection is pre-computed outside).
        enc_whh0 = next(it)[...]                                  # [H, 4H] bf16
        enc_rest = []
        for _ in range(1, n_layers):
            wih = next(it)[...]
            whh = next(it)[...]
            b = jnp.broadcast_to(next(it)[...], (batch_pad, 4 * hid))
            enc_rest.append((wih, whh, b))
        # Decoder weights.
        dec_w = []
        for _ in range(n_layers):
            wih = next(it)[...]
            whh = next(it)[...]
            b = jnp.broadcast_to(next(it)[...], (batch_pad, 4 * hid))
            dec_w.append((wih, whh, b))
        dec_embed = next(it)[...]                                 # [TVp, E] bf16
        fc_w = next(it)[...]                                      # [H, TVp] bf16
        fc_b = jnp.broadcast_to(next(it)[...], (batch_pad, trg_vocab_pad))
        out_ref = next(it)                                        # [max_len, Bp, TVp] f32

        # ---------------- encoder (unrolled over time) ----------------------
        h = [jnp.zeros((batch_pad, hid), f32) for _ in range(n_layers)]
        c = [jnp.zeros((batch_pad, hid), f32) for _ in range(n_layers)]
        for t in range(src_len):
            # Layer 0: input projection + bias already folded into enc_g0.
            gates = enc_g0_ref[t] + jnp.dot(h[0].astype(bf16), enc_whh0,
                                            preferred_element_type=f32)
            h[0], c[0] = combine(gates, c[0])
            x = h[0].astype(bf16)
            for l in range(1, n_layers):
                wih, whh, b = enc_rest[l - 1]
                gates = (jnp.dot(x, wih, preferred_element_type=f32)
                         + jnp.dot(h[l].astype(bf16), whh, preferred_element_type=f32)
                         + b)
                h[l], c[l] = combine(gates, c[l])
                x = h[l].astype(bf16)

        # ---------------- decoder (greedy / teacher-forced, unrolled) -------
        out_ref[0] = jnp.zeros((batch_pad, trg_vocab_pad), f32)
        col = jax.lax.broadcasted_iota(jnp.int32, (batch_pad, trg_vocab_pad), 1)
        prev_emb = trg_emb_ref[0]                                 # step 0 always forced
        for s in range(n_steps):                                  # produces output s+1
            forced = trg_emb_ref[s]                               # embedding of trg[s]
            if s == 0:
                x = forced
            else:
                x = jnp.where(tf_ref[s] != 0, forced, prev_emb)   # scalar pred select
            for l in range(n_layers):
                wih, whh, b = dec_w[l]
                gates = (jnp.dot(x, wih, preferred_element_type=f32)
                         + jnp.dot(h[l].astype(bf16), whh, preferred_element_type=f32)
                         + b)
                h[l], c[l] = combine(gates, c[l])
                x = h[l].astype(bf16)
            logits = jnp.dot(x, fc_w, preferred_element_type=f32) + fc_b
            out_ref[s + 1] = logits
            if s + 1 < n_steps:
                # Greedy argmax over real vocab (ignore padded lanes), first-index
                # tie-break (matches torch). One-hot feedback in bf16.
                masked = jnp.where(col < trg_vocab, logits, f32(-1e30))
                row_max = jnp.max(masked, axis=1, keepdims=True)
                first_idx = jnp.min(jnp.where(masked == row_max, col, trg_vocab_pad),
                                    axis=1, keepdims=True)
                prev_oh = (col == first_idx).astype(bf16)
                prev_emb = jnp.dot(prev_oh, dec_embed,
                                   preferred_element_type=f32).astype(bf16)

    return kernel


# ----------------------------- parameters ----------------------------------

def init_params(key, src_vocab, trg_vocab, emb_dim, hid_dim, n_layers,
                trg_vocab_pad):
    keys = iter(jax.random.split(key, 64))
    kb = 1.0 / math.sqrt(hid_dim)

    def unif(shape):
        return jax.random.uniform(next(keys), shape, jnp.float32, -kb, kb)

    def lstm_stack():
        layers = []
        for l in range(n_layers):
            d_in = emb_dim if l == 0 else hid_dim
            layers.append(dict(
                w_ih_t=unif((d_in, 4 * hid_dim)).astype(jnp.bfloat16),   # packed gates
                w_hh_t=unif((hid_dim, 4 * hid_dim)).astype(jnp.bfloat16),
                b=unif((1, 4 * hid_dim)),                                # b_ih + b_hh folded, f32
            ))
        return layers

    enc_embed = jax.random.normal(next(keys), (src_vocab, emb_dim), jnp.float32)
    dec_embed = jax.random.normal(next(keys), (trg_vocab, emb_dim), jnp.float32)
    fc_w = unif((hid_dim, trg_vocab))
    fc_b = unif((1, trg_vocab))

    return dict(
        enc_embed=enc_embed,                                             # [SV, E] f32
        dec_embed=jnp.pad(dec_embed, ((0, trg_vocab_pad - trg_vocab), (0, 0))
                          ).astype(jnp.bfloat16),                        # [TVp, E] bf16
        enc=lstm_stack(),
        dec=lstm_stack(),
        fc_w_t=jnp.pad(fc_w, ((0, 0), (0, trg_vocab_pad - trg_vocab))
                       ).astype(jnp.bfloat16),                           # [H, TVp] bf16
        fc_b=jnp.pad(fc_b, ((0, 0), (0, trg_vocab_pad - trg_vocab))),    # [1, TVp] f32
    )


# ----------------------------- model glue ----------------------------------

def seq2seq_forward(params, src, trg, *, n_layers, hid_dim, trg_vocab,
                    batch_pad, trg_vocab_pad, teacher_forcing_ratio=0.75, seed=0):
    src_len, B = src.shape
    max_len, _ = trg.shape

    # Same RNG consumption order as the reference: one draw per step i=1..max_len-1.
    rng = random.Random(seed)
    tf_list = [0] + [1 if rng.random() < teacher_forcing_ratio else 0
                     for _ in range(1, max_len)]
    tf_mask = jnp.asarray(tf_list, jnp.int32)

    # Host/XLA-side prep: embedding gathers + hoisted encoder layer-0 projection.
    x_emb = jnp.take(params["enc_embed"], src, axis=0)                   # [T, B, E] f32
    x_emb = jnp.pad(x_emb, ((0, 0), (0, batch_pad - B), (0, 0))).astype(jnp.bfloat16)
    enc0 = params["enc"][0]
    enc_g0 = (jnp.einsum("tbe,eg->tbg", x_emb, enc0["w_ih_t"],
                         preferred_element_type=jnp.float32)
              + enc0["b"])                                               # [T, Bp, 4H] f32

    trg_p = jnp.pad(trg, ((0, 0), (0, batch_pad - B)))
    trg_emb = jnp.take(params["dec_embed"], trg_p, axis=0)               # [ML, Bp, E] bf16

    inputs = [tf_mask, enc_g0, trg_emb, params["enc"][0]["w_hh_t"]]
    for l in range(1, n_layers):
        p = params["enc"][l]
        inputs += [p["w_ih_t"], p["w_hh_t"], p["b"]]
    for l in range(n_layers):
        p = params["dec"][l]
        inputs += [p["w_ih_t"], p["w_hh_t"], p["b"]]
    inputs += [params["dec_embed"], params["fc_w_t"], params["fc_b"]]

    in_specs = ([pl.BlockSpec(memory_space=pltpu.MemorySpace.SMEM)]
                + [pl.BlockSpec(memory_space=pltpu.MemorySpace.VMEM)]
                * (len(inputs) - 1))

    out = pl.pallas_call(
        _make_seq2seq_kernel(n_layers, src_len, max_len, hid_dim, trg_vocab,
                             trg_vocab_pad, batch_pad),
        out_shape=jax.ShapeDtypeStruct((max_len, batch_pad, trg_vocab_pad),
                                       jnp.float32),
        in_specs=in_specs,
        out_specs=pl.BlockSpec(memory_space=pltpu.MemorySpace.VMEM),
    )(*inputs)

    return out[:, :B, :trg_vocab]                                        # strip padding


# ------------------------------- Main ---------------------------------------

if __name__ == "__main__":
    SRC_VOCAB = 20
    TRG_VOCAB = 24
    EMB_DIM = 16
    HID_DIM = 32        # 4*HID_DIM == 128 -> packed gates fill one lane block
    N_LAYERS = 2
    SRC_LEN = 8
    TRG_LEN = 8
    BATCH = 2

    BATCH_PAD = max(8, _round_up(BATCH, 8))          # sublane alignment
    TRG_VOCAB_PAD = _round_up(TRG_VOCAB, 128)        # lane-dense fc / argmax / one-hot

    key = jax.random.PRNGKey(0)
    k_params, k_src, k_trg = jax.random.split(key, 3)

    params = init_params(k_params, SRC_VOCAB, TRG_VOCAB, EMB_DIM, HID_DIM,
                         N_LAYERS, TRG_VOCAB_PAD)
    src = jax.random.randint(k_src, (SRC_LEN, BATCH), 0, SRC_VOCAB, jnp.int32)
    trg = jax.random.randint(k_trg, (TRG_LEN, BATCH), 0, TRG_VOCAB, jnp.int32)

    outputs = seq2seq_forward(params, src, trg, n_layers=N_LAYERS,
                              hid_dim=HID_DIM, trg_vocab=TRG_VOCAB,
                              batch_pad=BATCH_PAD, trg_vocab_pad=TRG_VOCAB_PAD,
                              teacher_forcing_ratio=0.75, seed=0)
    outputs = jax.block_until_ready(outputs)

    assert outputs.shape == (TRG_LEN, BATCH, TRG_VOCAB)
    assert bool(jnp.all(outputs[0] == 0.0))
    assert bool(jnp.all(jnp.isfinite(outputs)))
    print("KERNEL_OK")
</pallas_src>

<mosaic_0001>
module attributes {stable_mosaic.version = 11 : i64} {
  func.func @kernel(%arg0: memref<8xi32, #tpu.memory_space<smem>>, %arg1: memref<8x8x128xf32, #tpu.memory_space<vmem>>, %arg2: memref<8x8x16xbf16, #tpu.memory_space<vmem>>, %arg3: memref<32x128xbf16, #tpu.memory_space<vmem>>, %arg4: memref<32x128xbf16, #tpu.memory_space<vmem>>, %arg5: memref<32x128xbf16, #tpu.memory_space<vmem>>, %arg6: memref<1x128xf32, #tpu.memory_space<vmem>>, %arg7: memref<16x128xbf16, #tpu.memory_space<vmem>>, %arg8: memref<32x128xbf16, #tpu.memory_space<vmem>>, %arg9: memref<1x128xf32, #tpu.memory_space<vmem>>, %arg10: memref<32x128xbf16, #tpu.memory_space<vmem>>, %arg11: memref<32x128xbf16, #tpu.memory_space<vmem>>, %arg12: memref<1x128xf32, #tpu.memory_space<vmem>>, %arg13: memref<128x16xbf16, #tpu.memory_space<vmem>>, %arg14: memref<32x128xbf16, #tpu.memory_space<vmem>>, %arg15: memref<1x128xf32, #tpu.memory_space<vmem>>, %arg16: memref<8x8x128xf32, #tpu.memory_space<vmem>>) attributes {dimension_semantics = [], scalar_prefetch = 0 : i64, scratch_operands = 0 : i64, tpu.core_type = #tpu.core_type<tc>} {
    %c0 = arith.constant 0 : index
    %c0_0 = arith.constant 0 : index
    %0 = vector.load %arg3[%c0, %c0_0] : memref<32x128xbf16, #tpu.memory_space<vmem>>, vector<32x128xbf16>
    %c0_1 = arith.constant 0 : index
    %c0_2 = arith.constant 0 : index
    %1 = vector.load %arg4[%c0_1, %c0_2] : memref<32x128xbf16, #tpu.memory_space<vmem>>, vector<32x128xbf16>
    %c0_3 = arith.constant 0 : index
    %c0_4 = arith.constant 0 : index
    %2 = vector.load %arg5[%c0_3, %c0_4] : memref<32x128xbf16, #tpu.memory_space<vmem>>, vector<32x128xbf16>
    %c0_5 = arith.constant 0 : index
    %c0_6 = arith.constant 0 : index
    %3 = vector.load %arg6[%c0_5, %c0_6] : memref<1x128xf32, #tpu.memory_space<vmem>>, vector<1x128xf32>
    %4 = vector.shape_cast %3 : vector<1x128xf32> to vector<1x128xf32>
    %5 = vector.broadcast %4 : vector<1x128xf32> to vector<8x128xf32>
    %c0_7 = arith.constant 0 : index
    %c0_8 = arith.constant 0 : index
    %6 = vector.load %arg7[%c0_7, %c0_8] : memref<16x128xbf16, #tpu.memory_space<vmem>>, vector<16x128xbf16>
    %c0_9 = arith.constant 0 : index
    %c0_10 = arith.constant 0 : index
    %7 = vector.load %arg8[%c0_9, %c0_10] : memref<32x128xbf16, #tpu.memory_space<vmem>>, vector<32x128xbf16>
    %c0_11 = arith.constant 0 : index
    %c0_12 = arith.constant 0 : index
    %8 = vector.load %arg9[%c0_11, %c0_12] : memref<1x128xf32, #tpu.memory_space<vmem>>, vector<1x128xf32>
    %9 = vector.shape_cast %8 : vector<1x128xf32> to vector<1x128xf32>
    %10 = vector.broadcast %9 : vector<1x128xf32> to vector<8x128xf32>
    %c0_13 = arith.constant 0 : index
    %c0_14 = arith.constant 0 : index
    %11 = vector.load %arg10[%c0_13, %c0_14] : memref<32x128xbf16, #tpu.memory_space<vmem>>, vector<32x128xbf16>
    %c0_15 = arith.constant 0 : index
    %c0_16 = arith.constant 0 : index
    %12 = vector.load %arg11[%c0_15, %c0_16] : memref<32x128xbf16, #tpu.memory_space<vmem>>, vector<32x128xbf16>
    %c0_17 = arith.constant 0 : index
    %c0_18 = arith.constant 0 : index
    %13 = vector.load %arg12[%c0_17, %c0_18] : memref<1x128xf32, #tpu.memory_space<vmem>>, vector<1x128xf32>
    %14 = vector.shape_cast %13 : vector<1x128xf32> to vector<1x128xf32>
    %15 = vector.broadcast %14 : vector<1x128xf32> to vector<8x128xf32>
    %c0_19 = arith.constant 0 : index
    %c0_20 = arith.constant 0 : index
    %16 = vector.load %arg13[%c0_19, %c0_20] : memref<128x16xbf16, #tpu.memory_space<vmem>>, vector<128x16xbf16>
    %c0_21 = arith.constant 0 : index
    %c0_22 = arith.constant 0 : index
    %17 = vector.load %arg14[%c0_21, %c0_22] : memref<32x128xbf16, #tpu.memory_space<vmem>>, vector<32x128xbf16>
    %c0_23 = arith.constant 0 : index
    %c0_24 = arith.constant 0 : index
    %18 = vector.load %arg15[%c0_23, %c0_24] : memref<1x128xf32, #tpu.memory_space<vmem>>, vector<1x128xf32>
    %19 = vector.shape_cast %18 : vector<1x128xf32> to vector<1x128xf32>
    %20 = vector.broadcast %19 : vector<1x128xf32> to vector<8x128xf32>
    %cst = arith.constant 0.000000e+00 : f32
    %21 = vector.broadcast %cst : f32 to vector<8x32xf32>
    %cst_25 = arith.constant 0.000000e+00 : f32
    %22 = vector.broadcast %cst_25 : f32 to vector<8x32xf32>
    %cst_26 = arith.constant 0.000000e+00 : f32
    %23 = vector.broadcast %cst_26 : f32 to vector<8x32xf32>
    %cst_27 = arith.constant 0.000000e+00 : f32
    %24 = vector.broadcast %cst_27 : f32 to vector<8x32xf32>
    %c0_28 = arith.constant 0 : index
    %c0_29 = arith.constant 0 : index
    %c0_30 = arith.constant 0 : index
    %25 = vector.load %arg1[%c0_28, %c0_29, %c0_30] : memref<8x8x128xf32, #tpu.memory_space<vmem>>, vector<1x8x128xf32>
    %26 = vector.shape_cast %25 : vector<1x8x128xf32> to vector<8x128xf32>
    %27 = arith.truncf %21 : vector<8x32xf32> to vector<8x32xbf16>
    %cst_31 = arith.constant dense<0.000000e+00> : vector<8x128xf32>
    %28 = tpu.matmul %27, %0, %cst_31 {dimension_numbers = #tpu.dot_dimension_numbers<[1], [0], [0], [1], [0, 0, 1, 1], [], []>} : vector<8x32xbf16>, vector<32x128xbf16>, vector<8x128xf32> -> vector<8x128xf32>
    %29 = arith.addf %26, %28 : vector<8x128xf32>
    %30 = arith.negf %29 : vector<8x128xf32>
    %31 = math.exp %30 : vector<8x128xf32>
    %cst_32 = arith.constant 1.000000e+00 : f32
    %32 = vector.broadcast %cst_32 : f32 to vector<8x128xf32>
    %33 = arith.addf %32, %31 : vector<8x128xf32>
    %34 = arith.divf %32, %33 : vector<8x128xf32>
    %35 = math.tanh %29 : vector<8x128xf32>
    %36 = vector.extract_strided_slice %34 {offsets = [0, 0], sizes = [8, 32], strides = [1, 1]} : vector<8x128xf32> to vector<8x32xf32>
    %37 = vector.extract_strided_slice %34 {offsets = [0, 32], sizes = [8, 32], strides = [1, 1]} : vector<8x128xf32> to vector<8x32xf32>
    %38 = vector.extract_strided_slice %35 {offsets = [0, 64], sizes = [8, 32], strides = [1, 1]} : vector<8x128xf32> to vector<8x32xf32>
    %39 = vector.extract_strided_slice %34 {offsets = [0, 96], sizes = [8, 32], strides = [1, 1]} : vector<8x128xf32> to vector<8x32xf32>
    %40 = arith.mulf %37, %23 : vector<8x32xf32>
    %41 = arith.mulf %36, %38 : vector<8x32xf32>
    %42 = arith.addf %40, %41 : vector<8x32xf32>
    %43 = math.tanh %42 : vector<8x32xf32>
    %44 = arith.mulf %39, %43 : vector<8x32xf32>
    %45 = arith.truncf %44 : vector<8x32xf32> to vector<8x32xbf16>
    %cst_33 = arith.constant dense<0.000000e+00> : vector<8x128xf32>
    %46 = tpu.matmul %45, %1, %cst_33 {dimension_numbers = #tpu.dot_dimension_numbers<[1], [0], [0], [1], [0, 0, 1, 1], [], []>} : vector<8x32xbf16>, vector<32x128xbf16>, vector<8x128xf32> -> vector<8x128xf32>
    %47 = arith.truncf %22 : vector<8x32xf32> to vector<8x32xbf16>
    %cst_34 = arith.constant dense<0.000000e+00> : vector<8x128xf32>
    %48 = tpu.matmul %47, %2, %cst_34 {dimension_numbers = #tpu.dot_dimension_numbers<[1], [0], [0], [1], [0, 0, 1, 1], [], []>} : vector<8x32xbf16>, vector<32x128xbf16>, vector<8x128xf32> -> vector<8x128xf32>
    %49 = arith.addf %46, %48 : vector<8x128xf32>
    %50 = arith.addf %49, %5 : vector<8x128xf32>
    %51 = arith.negf %50 : vector<8x128xf32>
    %52 = math.exp %51 : vector<8x128xf32>
    %cst_35 = arith.constant 1.000000e+00 : f32
    %53 = vector.broadcast %cst_35 : f32 to vector<8x128xf32>
    %54 = arith.addf %53, %52 : vector<8x128xf32>
    %55 = arith.divf %53, %54 : vector<8x128xf32>
    %56 = math.tanh %50 : vector<8x128xf32>
    %57 = vector.extract_strided_slice %55 {offsets = [0, 0], sizes = [8, 32], strides = [1, 1]} : vector<8x128xf32> to vector<8x32xf32>
    %58 = vector.extract_strided_slice %55 {offsets = [0, 32], sizes = [8, 32], strides = [1, 1]} : vector<8x128xf32> to vector<8x32xf32>
    %59 = vector.extract_strided_slice %56 {offsets = [0, 64], sizes = [8, 32], strides = [1, 1]} : vector<8x128xf32> to vector<8x32xf32>
    %60 = vector.extract_strided_slice %55 {offsets = [0, 96], sizes = [8, 32], strides = [1, 1]} : vector<8x128xf32> to vector<8x32xf32>
    %61 = arith.mulf %58, %24 : vector<8x32xf32>
    %62 = arith.mulf %57, %59 : vector<8x32xf32>
    %63 = arith.addf %61, %62 : vector<8x32xf32>
    %64 = math.tanh %63 : vector<8x32xf32>
    %65 = arith.mulf %60, %64 : vector<8x32xf32>
    %c1 = arith.constant 1 : index
    %c0_36 = arith.constant 0 : index
    %c0_37 = arith.constant 0 : index
    %66 = vector.load %arg1[%c1, %c0_36, %c0_37] : memref<8x8x128xf32, #tpu.memory_space<vmem>>, vector<1x8x128xf32>
    %67 = vector.shape_cast %66 : vector<1x8x128xf32> to vector<8x128xf32>
    %68 = arith.truncf %44 : vector<8x32xf32> to vector<8x32xbf16>
    %cst_38 = arith.constant dense<0.000000e+00> : vector<8x128xf32>
    %69 = tpu.matmul %68, %0, %cst_38 {dimension_numbers = #tpu.dot_dimension_numbers<[1], [0], [0], [1], [0, 0, 1, 1], [], []>} : vector<8x32xbf16>, vector<32x128xbf16>, vector<8x128xf32> -> vector<8x128xf32>
    %70 = arith.addf %67, %69 : vector<8x128xf32>
    %71 = arith.negf %70 : vector<8x128xf32>
    %72 = math.exp %71 : vector<8x128xf32>
    %cst_39 = arith.constant 1.000000e+00 : f32
    %73 = vector.broadcast %cst_39 : f32 to vector<8x128xf32>
    %74 = arith.addf %73, %72 : vector<8x128xf32>
    %75 = arith.divf %73, %74 : vector<8x128xf32>
    %76 = math.tanh %70 : vector<8x128xf32>
    %77 = vector.extract_strided_slice %75 {offsets = [0, 0], sizes = [8, 32], strides = [1, 1]} : vector<8x128xf32> to vector<8x32xf32>
    %78 = vector.extract_strided_slice %75 {offsets = [0, 32], sizes = [8, 32], strides = [1, 1]} : vector<8x128xf32> to vector<8x32xf32>
    %79 = vector.extract_strided_slice %76 {offsets = [0, 64], sizes = [8, 32], strides = [1, 1]} : vector<8x128xf32> to vector<8x32xf32>
    %80 = vector.extract_strided_slice %75 {offsets = [0, 96], sizes = [8, 32], strides = [1, 1]} : vector<8x128xf32> to vector<8x32xf32>
    %81 = arith.mulf %78, %42 : vector<8x32xf32>
    %82 = arith.mulf %77, %79 : vector<8x32xf32>
    %83 = arith.addf %81, %82 : vector<8x32xf32>
    %84 = math.tanh %83 : vector<8x32xf32>
    %85 = arith.mulf %80, %84 : vector<8x32xf32>
    %86 = arith.truncf %85 : vector<8x32xf32> to vector<8x32xbf16>
    %cst_40 = arith.constant dense<0.000000e+00> : vector<8x128xf32>
    %87 = tpu.matmul %86, %1, %cst_40 {dimension_numbers = #tpu.dot_dimension_numbers<[1], [0], [0], [1], [0, 0, 1, 1], [], []>} : vector<8x32xbf16>, vector<32x128xbf16>, vector<8x128xf32> -> vector<8x128xf32>
    %88 = arith.truncf %65 : vector<8x32xf32> to vector<8x32xbf16>
    %cst_41 = arith.constant dense<0.000000e+00> : vector<8x128xf32>
    %89 = tpu.matmul %88, %2, %cst_41 {dimension_numbers = #tpu.dot_dimension_numbers<[1], [0], [0], [1], [0, 0, 1, 1], [], []>} : vector<8x32xbf16>, vector<32x128xbf16>, vector<8x128xf32> -> vector<8x128xf32>
    %90 = arith.addf %87, %89 : vector<8x128xf32>
    %91 = arith.addf %90, %5 : vector<8x128xf32>
    %92 = arith.negf %91 : vector<8x128xf32>
    %93 = math.exp %92 : vector<8x128xf32>
    %cst_42 = arith.constant 1.000000e+00 : f32
    %94 = vector.broadcast %cst_42 : f32 to vector<8x128xf32>
    %95 = arith.addf %94, %93 : vector<8x128xf32>
    %96 = arith.divf %94, %95 : vector<8x128xf32>
    %97 = math.tanh %91 : vector<8x128xf32>
    %98 = vector.extract_strided_slice %96 {offsets = [0, 0], sizes = [8, 32], strides = [1, 1]} : vector<8x128xf32> to vector<8x32xf32>
    %99 = vector.extract_strided_slice %96 {offsets = [0, 32], sizes = [8, 32], strides = [1, 1]} : vector<8x128xf32> to vector<8x32xf32>
    %100 = vector.extract_strided_slice %97 {offsets = [0, 64], sizes = [8, 32], strides = [1, 1]} : vector<8x128xf32> to vector<8x32xf32>
    %101 = vector.extract_strided_slice %96 {offsets = [0, 96], sizes = [8, 32], strides = [1, 1]} : vector<8x128xf32> to vector<8x32xf32>
    %102 = arith.mulf %99, %63 : vector<8x32xf32>
    %103 = arith.mulf %98, %100 : vector<8x32xf32>
    %104 = arith.addf %102, %103 : vector<8x32xf32>
    %105 = math.tanh %104 : vector<8x32xf32>
    %106 = arith.mulf %101, %105 : vector<8x32xf32>
    %c2 = arith.constant 2 : index
    %c0_43 = arith.constant 0 : index
    %c0_44 = arith.constant 0 : index
    %107 = vector.load %arg1[%c2, %c0_43, %c0_44] : memref<8x8x128xf32, #tpu.memory_space<vmem>>, vector<1x8x128xf32>
    %108 = vector.shape_cast %107 : vector<1x8x128xf32> to vector<8x128xf32>
    %109 = arith.truncf %85 : vector<8x32xf32> to vector<8x32xbf16>
    %cst_45 = arith.constant dense<0.000000e+00> : vector<8x128xf32>
    %110 = tpu.matmul %109, %0, %cst_45 {dimension_numbers = #tpu.dot_dimension_numbers<[1], [0], [0], [1], [0, 0, 1, 1], [], []>} : vector<8x32xbf16>, vector<32x128xbf16>, vector<8x128xf32> -> vector<8x128xf32>
    %111 = arith.addf %108, %110 : vector<8x128xf32>
    %112 = arith.negf %111 : vector<8x128xf32>
    %113 = math.exp %112 : vector<8x128xf32>
    %cst_46 = arith.constant 1.000000e+00 : f32
    %114 = vector.broadcast %cst_46 : f32 to vector<8x128xf32>
    %115 = arith.addf %114, %113 : vector<8x128xf32>
    %116 = arith.divf %114, %115 : vector<8x128xf32>
    %117 = math.tanh %111 : vector<8x128xf32>
    %118 = vector.extract_strided_slice %116 {offsets = [0, 0], sizes = [8, 32], strides = [1, 1]} : vector<8x128xf32> to vector<8x32xf32>
    %119 = vector.extract_strided_slice %116 {offsets = [0, 32], sizes = [8, 32], strides = [1, 1]} : vector<8x128xf32> to vector<8x32xf32>
    %120 = vector.extract_strided_slice %117 {offsets = [0, 64], sizes = [8, 32], strides = [1, 1]} : vector<8x128xf32> to vector<8x32xf32>
    %121 = vector.extract_strided_slice %116 {offsets = [0, 96], sizes = [8, 32], strides = [1, 1]} : vector<8x128xf32> to vector<8x32xf32>
    %122 = arith.mulf %119, %83 : vector<8x32xf32>
    %123 = arith.mulf %118, %120 : vector<8x32xf32>
    %124 = arith.addf %122, %123 : vector<8x32xf32>
    %125 = math.tanh %124 : vector<8x32xf32>
    %126 = arith.mulf %121, %125 : vector<8x32xf32>
    %127 = arith.truncf %126 : vector<8x32xf32> to vector<8x32xbf16>
    %cst_47 = arith.constant dense<0.000000e+00> : vector<8x128xf32>
    %128 = tpu.matmul %127, %1, %cst_47 {dimension_numbers = #tpu.dot_dimension_numbers<[1], [0], [0], [1], [0, 0, 1, 1], [], []>} : vector<8x32xbf16>, vector<32x128xbf16>, vector<8x128xf32> -> vector<8x128xf32>
    %129 = arith.truncf %106 : vector<8x32xf32> to vector<8x32xbf16>
    %cst_48 = arith.constant dense<0.000000e+00> : vector<8x128xf32>
    %130 = tpu.matmul %129, %2, %cst_48 {dimension_numbers = #tpu.dot_dimension_numbers<[1], [0], [0], [1], [0, 0, 1, 1], [], []>} : vector<8x32xbf16>, vector<32x128xbf16>, vector<8x128xf32> -> vector<8x128xf32>
    %131 = arith.addf %128, %130 : vector<8x128xf32>
    %132 = arith.addf %131, %5 : vector<8x128xf32>
    %133 = arith.negf %132 : vector<8x128xf32>
    %134 = math.exp %133 : vector<8x128xf32>
    %cst_49 = arith.constant 1.000000e+00 : f32
    %135 = vector.broadcast %cst_49 : f32 to vector<8x128xf32>
    %136 = arith.addf %135, %134 : vector<8x128xf32>
    %137 = arith.divf %135, %136 : vector<8x128xf32>
    %138 = math.tanh %132 : vector<8x128xf32>
    %139 = vector.extract_strided_slice %137 {offsets = [0, 0], sizes = [8, 32], strides = [1, 1]} : vector<8x128xf32> to vector<8x32xf32>
    %140 = vector.extract_strided_slice %137 {offsets = [0, 32], sizes = [8, 32], strides = [1, 1]} : vector<8x128xf32> to vector<8x32xf32>
    %141 = vector.extract_strided_slice %138 {offsets = [0, 64], sizes = [8, 32], strides = [1, 1]} : vector<8x128xf32> to vector<8x32xf32>
    %142 = vector.extract_strided_slice %137 {offsets = [0, 96], sizes = [8, 32], strides = [1, 1]} : vector<8x128xf32> to vector<8x32xf32>
    %143 = arith.mulf %140, %104 : vector<8x32xf32>
    %144 = arith.mulf %139, %141 : vector<8x32xf32>
    %145 = arith.addf %143, %144 : vector<8x32xf32>
    %146 = math.tanh %145 : vector<8x32xf32>
    %147 = arith.mulf %142, %146 : vector<8x32xf32>
    %c3 = arith.constant 3 : index
    %c0_50 = arith.constant 0 : index
    %c0_51 = arith.constant 0 : index
    %148 = vector.load %arg1[%c3, %c0_50, %c0_51] : memref<8x8x128xf32, #tpu.memory_space<vmem>>, vector<1x8x128xf32>
    %149 = vector.shape_cast %148 : vector<1x8x128xf32> to vector<8x128xf32>
    %150 = arith.truncf %126 : vector<8x32xf32> to vector<8x32xbf16>
    %cst_52 = arith.constant dense<0.000000e+00> : vector<8x128xf32>
    %151 = tpu.matmul %150, %0, %cst_52 {dimension_numbers = #tpu.dot_dimension_numbers<[1], [0], [0], [1], [0, 0, 1, 1], [], []>} : vector<8x32xbf16>, vector<32x128xbf16>, vector<8x128xf32> -> vector<8x128xf32>
    %152 = arith.addf %149, %151 : vector<8x128xf32>
    %153 = arith.negf %152 : vector<8x128xf32>
    %154 = math.exp %153 : vector<8x128xf32>
    %cst_53 = arith.constant 1.000000e+00 : f32
    %155 = vector.broadcast %cst_53 : f32 to vector<8x128xf32>
    %156 = arith.addf %155, %154 : vector<8x128xf32>
    %157 = arith.divf %155, %156 : vector<8x128xf32>
    %158 = math.tanh %152 : vector<8x128xf32>
    %159 = vector.extract_strided_slice %157 {offsets = [0, 0], sizes = [8, 32], strides = [1, 1]} : vector<8x128xf32> to vector<8x32xf32>
    %160 = vector.extract_strided_slice %157 {offsets = [0, 32], sizes = [8, 32], strides = [1, 1]} : vector<8x128xf32> to vector<8x32xf32>
    %161 = vector.extract_strided_slice %158 {offsets = [0, 64], sizes = [8, 32], strides = [1, 1]} : vector<8x128xf32> to vector<8x32xf32>
    %162 = vector.extract_strided_slice %157 {offsets = [0, 96], sizes = [8, 32], strides = [1, 1]} : vector<8x128xf32> to vector<8x32xf32>
    %163 = arith.mulf %160, %124 : vector<8x32xf32>
    %164 = arith.mulf %159, %161 : vector<8x32xf32>
    %165 = arith.addf %163, %164 : vector<8x32xf32>
    %166 = math.tanh %165 : vector<8x32xf32>
    %167 = arith.mulf %162, %166 : vector<8x32xf32>
    %168 = arith.truncf %167 : vector<8x32xf32> to vector<8x32xbf16>
    %cst_54 = arith.constant dense<0.000000e+00> : vector<8x128xf32>
    %169 = tpu.matmul %168, %1, %cst_54 {dimension_numbers = #tpu.dot_dimension_numbers<[1], [0], [0], [1], [0, 0, 1, 1], [], []>} : vector<8x32xbf16>, vector<32x128xbf16>, vector<8x128xf32> -> vector<8x128xf32>
    %170 = arith.truncf %147 : vector<8x32xf32> to vector<8x32xbf16>
    %cst_55 = arith.constant dense<0.000000e+00> : vector<8x128xf32>
    %171 = tpu.matmul %170, %2, %cst_55 {dimension_numbers = #tpu.dot_dimension_numbers<[1], [0], [0], [1], [0, 0, 1, 1], [], []>} : vector<8x32xbf16>, vector<32x128xbf16>, vector<8x128xf32> -> vector<8x128xf32>
    %172 = arith.addf %169, %171 : vector<8x128xf32>
    %173 = arith.addf %172, %5 : vector<8x128xf32>
    %174 = arith.negf %173 : vector<8x128xf32>
    %175 = math.exp %174 : vector<8x128xf32>
    %cst_56 = arith.constant 1.000000e+00 : f32
    %176 = vector.broadcast %cst_56 : f32 to vector<8x128xf32>
    %177 = arith.addf %176, %175 : vector<8x128xf32>
    %178 = arith.divf %176, %177 : vector<8x128xf32>
    %179 = math.tanh %173 : vector<8x128xf32>
    %180 = vector.extract_strided_slice %178 {offsets = [0, 0], sizes = [8, 32], strides = [1, 1]} : vector<8x128xf32> to vector<8x32xf32>
    %181 = vector.extract_strided_slice %178 {offsets = [0, 32], sizes = [8, 32], strides = [1, 1]} : vector<8x128xf32> to vector<8x32xf32>
    %182 = vector.extract_strided_slice %179 {offsets = [0, 64], sizes = [8, 32], strides = [1, 1]} : vector<8x128xf32> to vector<8x32xf32>
    %183 = vector.extract_strided_slice %178 {offsets = [0, 96], sizes = [8, 32], strides = [1, 1]} : vector<8x128xf32> to vector<8x32xf32>
    %184 = arith.mulf %181, %145 : vector<8x32xf32>
    %185 = arith.mulf %180, %182 : vector<8x32xf32>
    %186 = arith.addf %184, %185 : vector<8x32xf32>
    %187 = math.tanh %186 : vector<8x32xf32>
    %188 = arith.mulf %183, %187 : vector<8x32xf32>
    %c4 = arith.constant 4 : index
    %c0_57 = arith.constant 0 : index
    %c0_58 = arith.constant 0 : index
    %189 = vector.load %arg1[%c4, %c0_57, %c0_58] : memref<8x8x128xf32, #tpu.memory_space<vmem>>, vector<1x8x128xf32>
    %190 = vector.shape_cast %189 : vector<1x8x128xf32> to vector<8x128xf32>
    %191 = arith.truncf %167 : vector<8x32xf32> to vector<8x32xbf16>
    %cst_59 = arith.constant dense<0.000000e+00> : vector<8x128xf32>
    %192 = tpu.matmul %191, %0, %cst_59 {dimension_numbers = #tpu.dot_dimension_numbers<[1], [0], [0], [1], [0, 0, 1, 1], [], []>} : vector<8x32xbf16>, vector<32x128xbf16>, vector<8x128xf32> -> vector<8x128xf32>
    %193 = arith.addf %190, %192 : vector<8x128xf32>
    %194 = arith.negf %193 : vector<8x128xf32>
    %195 = math.exp %194 : vector<8x128xf32>
    %cst_60 = arith.constant 1.000000e+00 : f32
    %196 = vector.broadcast %cst_60 : f32 to vector<8x128xf32>
    %197 = arith.addf %196, %195 : vector<8x128xf32>
    %198 = arith.divf %196, %197 : vector<8x128xf32>
    %199 = math.tanh %193 : vector<8x128xf32>
    %200 = vector.extract_strided_slice %198 {offsets = [0, 0], sizes = [8, 32], strides = [1, 1]} : vector<8x128xf32> to vector<8x32xf32>
    %201 = vector.extract_strided_slice %198 {offsets = [0, 32], sizes = [8, 32], strides = [1, 1]} : vector<8x128xf32> to vector<8x32xf32>
    %202 = vector.extract_strided_slice %199 {offsets = [0, 64], sizes = [8, 32], strides = [1, 1]} : vector<8x128xf32> to vector<8x32xf32>
    %203 = vector.extract_strided_slice %198 {offsets = [0, 96], sizes = [8, 32], strides = [1, 1]} : vector<8x128xf32> to vector<8x32xf32>
    %204 = arith.mulf %201, %165 : vector<8x32xf32>
    %205 = arith.mulf %200, %202 : vector<8x32xf32>
    %206 = arith.addf %204, %205 : vector<8x32xf32>
    %207 = math.tanh %206 : vector<8x32xf32>
    %208 = arith.mulf %203, %207 : vector<8x32xf32>
    %209 = arith.truncf %208 : vector<8x32xf32> to vector<8x32xbf16>
    %cst_61 = arith.constant dense<0.000000e+00> : vector<8x128xf32>
    %210 = tpu.matmul %209, %1, %cst_61 {dimension_numbers = #tpu.dot_dimension_numbers<[1], [0], [0], [1], [0, 0, 1, 1], [], []>} : vector<8x32xbf16>, vector<32x128xbf16>, vector<8x128xf32> -> vector<8x128xf32>
    %211 = arith.truncf %188 : vector<8x32xf32> to vector<8x32xbf16>
    %cst_62 = arith.constant dense<0.000000e+00> : vector<8x128xf32>
    %212 = tpu.matmul %211, %2, %cst_62 {dimension_numbers = #tpu.dot_dimension_numbers<[1], [0], [0], [1], [0, 0, 1, 1], [], []>} : vector<8x32xbf16>, vector<32x128xbf16>, vector<8x128xf32> -> vector<8x128xf32>
    %213 = arith.addf %210, %212 : vector<8x128xf32>
    %214 = arith.addf %213, %5 : vector<8x128xf32>
    %215 = arith.negf %214 : vector<8x128xf32>
    %216 = math.exp %215 : vector<8x128xf32>
    %cst_63 = arith.constant 1.000000e+00 : f32
    %217 = vector.broadcast %cst_63 : f32 to vector<8x128xf32>
    %218 = arith.addf %217, %216 : vector<8x128xf32>
    %219 = arith.divf %217, %218 : vector<8x128xf32>
    %220 = math.tanh %214 : vector<8x128xf32>
    %221 = vector.extract_strided_slice %219 {offsets = [0, 0], sizes = [8, 32], strides = [1, 1]} : vector<8x128xf32> to vector<8x32xf32>
    %222 = vector.extract_strided_slice %219 {offsets = [0, 32], sizes = [8, 32], strides = [1, 1]} : vector<8x128xf32> to vector<8x32xf32>
    %223 = vector.extract_strided_slice %220 {offsets = [0, 64], sizes = [8, 32], strides = [1, 1]} : vector<8x128xf32> to vector<8x32xf32>
    %224 = vector.extract_strided_slice %219 {offsets = [0, 96], sizes = [8, 32], strides = [1, 1]} : vector<8x128xf32> to vector<8x32xf32>
    %225 = arith.mulf %222, %186 : vector<8x32xf32>
    %226 = arith.mulf %221, %223 : vector<8x32xf32>
    %227 = arith.addf %225, %226 : vector<8x32xf32>
    %228 = math.tanh %227 : vector<8x32xf32>
    %229 = arith.mulf %224, %228 : vector<8x32xf32>
    %c5 = arith.constant 5 : index
    %c0_64 = arith.constant 0 : index
    %c0_65 = arith.constant 0 : index
    %230 = vector.load %arg1[%c5, %c0_64, %c0_65] : memref<8x8x128xf32, #tpu.memory_space<vmem>>, vector<1x8x128xf32>
    %231 = vector.shape_cast %230 : vector<1x8x128xf32> to vector<8x128xf32>
    %232 = arith.truncf %208 : vector<8x32xf32> to vector<8x32xbf16>
    %cst_66 = arith.constant dense<0.000000e+00> : vector<8x128xf32>
    %233 = tpu.matmul %232, %0, %cst_66 {dimension_numbers = #tpu.dot_dimension_numbers<[1], [0], [0], [1], [0, 0, 1, 1], [], []>} : vector<8x32xbf16>, vector<32x128xbf16>, vector<8x128xf32> -> vector<8x128xf32>
    %234 = arith.addf %231, %233 : vector<8x128xf32>
    %235 = arith.negf %234 : vector<8x128xf32>
    %236 = math.exp %235 : vector<8x128xf32>
    %cst_67 = arith.constant 1.000000e+00 : f32
    %237 = vector.broadcast %cst_67 : f32 to vector<8x128xf32>
    %238 = arith.addf %237, %236 : vector<8x128xf32>
    %239 = arith.divf %237, %238 : vector<8x128xf32>
    %240 = math.tanh %234 : vector<8x128xf32>
    %241 = vector.extract_strided_slice %239 {offsets = [0, 0], sizes = [8, 32], strides = [1, 1]} : vector<8x128xf32> to vector<8x32xf32>
    %242 = vector.extract_strided_slice %239 {offsets = [0, 32], sizes = [8, 32], strides = [1, 1]} : vector<8x128xf32> to vector<8x32xf32>
    %243 = vector.extract_strided_slice %240 {offsets = [0, 64], sizes = [8, 32], strides = [1, 1]} : vector<8x128xf32> to vector<8x32xf32>
    %244 = vector.extract_strided_slice %239 {offsets = [0, 96], sizes = [8, 32], strides = [1, 1]} : vector<8x128xf32> to vector<8x32xf32>
    %245 = arith.mulf %242, %206 : vector<8x32xf32>
    %246 = arith.mulf %241, %243 : vector<8x32xf32>
    %247 = arith.addf %245, %246 : vector<8x32xf32>
    %248 = math.tanh %247 : vector<8x32xf32>
    %249 = arith.mulf %244, %248 : vector<8x32xf32>
    %250 = arith.truncf %249 : vector<8x32xf32> to vector<8x32xbf16>
    %cst_68 = arith.constant dense<0.000000e+00> : vector<8x128xf32>
    %251 = tpu.matmul %250, %1, %cst_68 {dimension_numbers = #tpu.dot_dimension_numbers<[1], [0], [0], [1], [0, 0, 1, 1], [], []>} : vector<8x32xbf16>, vector<32x128xbf16>, vector<8x128xf32> -> vector<8x128xf32>
    %252 = arith.truncf %229 : vector<8x32xf32> to vector<8x32xbf16>
    %cst_69 = arith.constant dense<0.000000e+00> : vector<8x128xf32>
    %253 = tpu.matmul %252, %2, %cst_69 {dimension_numbers = #tpu.dot_dimension_numbers<[1], [0], [0], [1], [0, 0, 1, 1], [], []>} : vector<8x32xbf16>, vector<32x128xbf16>, vector<8x128xf32> -> vector<8x128xf32>
    %254 = arith.addf %251, %253 : vector<8x128xf32>
    %255 = arith.addf %254, %5 : vector<8x128xf32>
    %256 = arith.negf %255 : vector<8x128xf32>
    %257 = math.exp %256 : vector<8x128xf32>
    %cst_70 = arith.constant 1.000000e+00 : f32
    %258 = vector.broadcast %cst_70 : f32 to vector<8x128xf32>
    %259 = arith.addf %258, %257 : vector<8x128xf32>
    %260 = arith.divf %258, %259 : vector<8x128xf32>
    %261 = math.tanh %255 : vector<8x128xf32>
    %262 = vector.extract_strided_slice %260 {offsets = [0, 0], sizes = [8, 32], strides = [1, 1]} : vector<8x128xf32> to vector<8x32xf32>
    %263 = vector.extract_strided_slice %260 {offsets = [0, 32], sizes = [8, 32], strides = [1, 1]} : vector<8x128xf32> to vector<8x32xf32>
    %264 = vector.extract_strided_slice %261 {offsets = [0, 64], sizes = [8, 32], strides = [1, 1]} : vector<8x128xf32> to vector<8x32xf32>
    %265 = vector.extract_strided_slice %260 {offsets = [0, 96], sizes = [8, 32], strides = [1, 1]} : vector<8x128xf32> to vector<8x32xf32>
    %266 = arith.mulf %263, %227 : vector<8x32xf32>
    %267 = arith.mulf %262, %264 : vector<8x32xf32>
    %268 = arith.addf %266, %267 : vector<8x32xf32>
    %269 = math.tanh %268 : vector<8x32xf32>
    %270 = arith.mulf %265, %269 : vector<8x32xf32>
    %c6 = arith.constant 6 : index
    %c0_71 = arith.constant 0 : index
    %c0_72 = arith.constant 0 : index
    %271 = vector.load %arg1[%c6, %c0_71, %c0_72] : memref<8x8x128xf32, #tpu.memory_space<vmem>>, vector<1x8x128xf32>
    %272 = vector.shape_cast %271 : vector<1x8x128xf32> to vector<8x128xf32>
    %273 = arith.truncf %249 : vector<8x32xf32> to vector<8x32xbf16>
    %cst_73 = arith.constant dense<0.000000e+00> : vector<8x128xf32>
    %274 = tpu.matmul %273, %0, %cst_73 {dimension_numbers = #tpu.dot_dimension_numbers<[1], [0], [0], [1], [0, 0, 1, 1], [], []>} : vector<8x32xbf16>, vector<32x128xbf16>, vector<8x128xf32> -> vector<8x128xf32>
    %275 = arith.addf %272, %274 : vector<8x128xf32>
    %276 = arith.negf %275 : vector<8x128xf32>
    %277 = math.exp %276 : vector<8x128xf32>
    %cst_74 = arith.constant 1.000000e+00 : f32
    %278 = vector.broadcast %cst_74 : f32 to vector<8x128xf32>
    %279 = arith.addf %278, %277 : vector<8x128xf32>
    %280 = arith.divf %278, %279 : vector<8x128xf32>
    %281 = math.tanh %275 : vector<8x128xf32>
    %282 = vector.extract_strided_slice %280 {offsets = [0, 0], sizes = [8, 32], strides = [1, 1]} : vector<8x128xf32> to vector<8x32xf32>
    %283 = vector.extract_strided_slice %280 {offsets = [0, 32], sizes = [8, 32], strides = [1, 1]} : vector<8x128xf32> to vector<8x32xf32>
    %284 = vector.extract_strided_slice %281 {offsets = [0, 64], sizes = [8, 32], strides = [1, 1]} : vector<8x128xf32> to vector<8x32xf32>
    %285 = vector.extract_strided_slice %280 {offsets = [0, 96], sizes = [8, 32], strides = [1, 1]} : vector<8x128xf32> to vector<8x32xf32>
    %286 = arith.mulf %283, %247 : vector<8x32xf32>
    %287 = arith.mulf %282, %284 : vector<8x32xf32>
    %288 = arith.addf %286, %287 : vector<8x32xf32>
    %289 = math.tanh %288 : vector<8x32xf32>
    %290 = arith.mulf %285, %289 : vector<8x32xf32>
    %291 = arith.truncf %290 : vector<8x32xf32> to vector<8x32xbf16>
    %cst_75 = arith.constant dense<0.000000e+00> : vector<8x128xf32>
    %292 = tpu.matmul %291, %1, %cst_75 {dimension_numbers = #tpu.dot_dimension_numbers<[1], [0], [0], [1], [0, 0, 1, 1], [], []>} : vector<8x32xbf16>, vector<32x128xbf16>, vector<8x128xf32> -> vector<8x128xf32>
    %293 = arith.truncf %270 : vector<8x32xf32> to vector<8x32xbf16>
    %cst_76 = arith.constant dense<0.000000e+00> : vector<8x128xf32>
    %294 = tpu.matmul %293, %2, %cst_76 {dimension_numbers = #tpu.dot_dimension_numbers<[1], [0], [0], [1], [0, 0, 1, 1], [], []>} : vector<8x32xbf16>, vector<32x128xbf16>, vector<8x128xf32> -> vector<8x128xf32>
    %295 = arith.addf %292, %294 : vector<8x128xf32>
    %296 = arith.addf %295, %5 : vector<8x128xf32>
    %297 = arith.negf %296 : vector<8x128xf32>
    %298 = math.exp %297 : vector<8x128xf32>
    %cst_77 = arith.constant 1.000000e+00 : f32
    %299 = vector.broadcast %cst_77 : f32 to vector<8x128xf32>
    %300 = arith.addf %299, %298 : vector<8x128xf32>
    %301 = arith.divf %299, %300 : vector<8x128xf32>
    %302 = math.tanh %296 : vector<8x128xf32>
    %303 = vector.extract_strided_slice %301 {offsets = [0, 0], sizes = [8, 32], strides = [1, 1]} : vector<8x128xf32> to vector<8x32xf32>
    %304 = vector.extract_strided_slice %301 {offsets = [0, 32], sizes = [8, 32], strides = [1, 1]} : vector<8x128xf32> to vector<8x32xf32>
    %305 = vector.extract_strided_slice %302 {offsets = [0, 64], sizes = [8, 32], strides = [1, 1]} : vector<8x128xf32> to vector<8x32xf32>
    %306 = vector.extract_strided_slice %301 {offsets = [0, 96], sizes = [8, 32], strides = [1, 1]} : vector<8x128xf32> to vector<8x32xf32>
    %307 = arith.mulf %304, %268 : vector<8x32xf32>
    %308 = arith.mulf %303, %305 : vector<8x32xf32>
    %309 = arith.addf %307, %308 : vector<8x32xf32>
    %310 = math.tanh %309 : vector<8x32xf32>
    %311 = arith.mulf %306, %310 : vector<8x32xf32>
    %c7 = arith.constant 7 : index
    %c0_78 = arith.constant 0 : index
    %c0_79 = arith.constant 0 : index
    %312 = vector.load %arg1[%c7, %c0_78, %c0_79] : memref<8x8x128xf32, #tpu.memory_space<vmem>>, vector<1x8x128xf32>
    %313 = vector.shape_cast %312 : vector<1x8x128xf32> to vector<8x128xf32>
    %314 = arith.truncf %290 : vector<8x32xf32> to vector<8x32xbf16>
    %cst_80 = arith.constant dense<0.000000e+00> : vector<8x128xf32>
    %315 = tpu.matmul %314, %0, %cst_80 {dimension_numbers = #tpu.dot_dimension_numbers<[1], [0], [0], [1], [0, 0, 1, 1], [], []>} : vector<8x32xbf16>, vector<32x128xbf16>, vector<8x128xf32> -> vector<8x128xf32>
    %316 = arith.addf %313, %315 : vector<8x128xf32>
    %317 = arith.negf %316 : vector<8x128xf32>
    %318 = math.exp %317 : vector<8x128xf32>
    %cst_81 = arith.constant 1.000000e+00 : f32
    %319 = vector.broadcast %cst_81 : f32 to vector<8x128xf32>
    %320 = arith.addf %319, %318 : vector<8x128xf32>
    %321 = arith.divf %319, %320 : vector<8x128xf32>
    %322 = math.tanh %316 : vector<8x128xf32>
    %323 = vector.extract_strided_slice %321 {offsets = [0, 0], sizes = [8, 32], strides = [1, 1]} : vector<8x128xf32> to vector<8x32xf32>
    %324 = vector.extract_strided_slice %321 {offsets = [0, 32], sizes = [8, 32], strides = [1, 1]} : vector<8x128xf32> to vector<8x32xf32>
    %325 = vector.extract_strided_slice %322 {offsets = [0, 64], sizes = [8, 32], strides = [1, 1]} : vector<8x128xf32> to vector<8x32xf32>
    %326 = vector.extract_strided_slice %321 {offsets = [0, 96], sizes = [8, 32], strides = [1, 1]} : vector<8x128xf32> to vector<8x32xf32>
    %327 = arith.mulf %324, %288 : vector<8x32xf32>
    %328 = arith.mulf %323, %325 : vector<8x32xf32>
    %329 = arith.addf %327, %328 : vector<8x32xf32>
    %330 = math.tanh %329 : vector<8x32xf32>
    %331 = arith.mulf %326, %330 : vector<8x32xf32>
    %332 = arith.truncf %331 : vector<8x32xf32> to vector<8x32xbf16>
    %cst_82 = arith.constant dense<0.000000e+00> : vector<8x128xf32>
    %333 = tpu.matmul %332, %1, %cst_82 {dimension_numbers = #tpu.dot_dimension_numbers<[1], [0], [0], [1], [0, 0, 1, 1], [], []>} : vector<8x32xbf16>, vector<32x128xbf16>, vector<8x128xf32> -> vector<8x128xf32>
    %334 = arith.truncf %311 : vector<8x32xf32> to vector<8x32xbf16>
    %cst_83 = arith.constant dense<0.000000e+00> : vector<8x128xf32>
    %335 = tpu.matmul %334, %2, %cst_83 {dimension_numbers = #tpu.dot_dimension_numbers<[1], [0], [0], [1], [0, 0, 1, 1], [], []>} : vector<8x32xbf16>, vector<32x128xbf16>, vector<8x128xf32> -> vector<8x128xf32>
    %336 = arith.addf %333, %335 : vector<8x128xf32>
    %337 = arith.addf %336, %5 : vector<8x128xf32>
    %338 = arith.negf %337 : vector<8x128xf32>
    %339 = math.exp %338 : vector<8x128xf32>
    %cst_84 = arith.constant 1.000000e+00 : f32
    %340 = vector.broadcast %cst_84 : f32 to vector<8x128xf32>
    %341 = arith.addf %340, %339 : vector<8x128xf32>
    %342 = arith.divf %340, %341 : vector<8x128xf32>
    %343 = math.tanh %337 : vector<8x128xf32>
    %344 = vector.extract_strided_slice %342 {offsets = [0, 0], sizes = [8, 32], strides = [1, 1]} : vector<8x128xf32> to vector<8x32xf32>
    %345 = vector.extract_strided_slice %342 {offsets = [0, 32], sizes = [8, 32], strides = [1, 1]} : vector<8x128xf32> to vector<8x32xf32>
    %346 = vector.extract_strided_slice %343 {offsets = [0, 64], sizes = [8, 32], strides = [1, 1]} : vector<8x128xf32> to vector<8x32xf32>
    %347 = vector.extract_strided_slice %342 {offsets = [0, 96], sizes = [8, 32], strides = [1, 1]} : vector<8x128xf32> to vector<8x32xf32>
    %348 = arith.mulf %345, %309 : vector<8x32xf32>
    %349 = arith.mulf %344, %346 : vector<8x32xf32>
    %350 = arith.addf %348, %349 : vector<8x32xf32>
    %351 = math.tanh %350 : vector<8x32xf32>
    %352 = arith.mulf %347, %351 : vector<8x32xf32>
    %cst_85 = arith.constant 0.000000e+00 : f32
    %353 = vector.broadcast %cst_85 : f32 to vector<8x128xf32>
    %c0_86 = arith.constant 0 : index
    %c0_87 = arith.constant 0 : index
    %c0_88 = arith.constant 0 : index
    %354 = vector.load %arg16[%c0_86, %c0_87, %c0_88] : memref<8x8x128xf32, #tpu.memory_space<vmem>>, vector<1x8x128xf32>
    %355 = vector.shape_cast %354 : vector<1x8x128xf32> to vector<8x128xf32>
    %356 = vector.shape_cast %353 : vector<8x128xf32> to vector<1x8x128xf32>
    tpu.vector_store %arg16[%c0_86, %c0_87, %c0_88], %356 {strides = array<i32>} : memref<8x8x128xf32, #tpu.memory_space<vmem>>, vector<1x8x128xf32>,
    %357 = tpu.iota {dimensions = array<i32: 1>} : vector<8x128xi32>
    %c0_89 = arith.constant 0 : index
    %c0_90 = arith.constant 0 : index
    %c0_91 = arith.constant 0 : index
    %358 = vector.load %arg2[%c0_89, %c0_90, %c0_91] : memref<8x8x16xbf16, #tpu.memory_space<vmem>>, vector<1x8x16xbf16>
    %359 = vector.shape_cast %358 : vector<1x8x16xbf16> to vector<8x16xbf16>
    %cst_92 = arith.constant dense<0.000000e+00> : vector<8x128xf32>
    %360 = tpu.matmul %359, %6, %cst_92 {dimension_numbers = #tpu.dot_dimension_numbers<[1], [0], [0], [1], [0, 0, 1, 1], [], []>} : vector<8x16xbf16>, vector<16x128xbf16>, vector<8x128xf32> -> vector<8x128xf32>
    %361 = arith.truncf %331 : vector<8x32xf32> to vector<8x32xbf16>
    %cst_93 = arith.constant dense<0.000000e+00> : vector<8x128xf32>
    %362 = tpu.matmul %361, %7, %cst_93 {dimension_numbers = #tpu.dot_dimension_numbers<[1], [0], [0], [1], [0, 0, 1, 1], [], []>} : vector<8x32xbf16>, vector<32x128xbf16>, vector<8x128xf32> -> vector<8x128xf32>
    %363 = arith.addf %360, %362 : vector<8x128xf32>
    %364 = arith.addf %363, %10 : vector<8x128xf32>
    %365 = arith.negf %364 : vector<8x128xf32>
    %366 = math.exp %365 : vector<8x128xf32>
    %cst_94 = arith.constant 1.000000e+00 : f32
    %367 = vector.broadcast %cst_94 : f32 to vector<8x128xf32>
    %368 = arith.addf %367, %366 : vector<8x128xf32>
    %369 = arith.divf %367, %368 : vector<8x128xf32>
    %370 = math.tanh %364 : vector<8x128xf32>
    %371 = vector.extract_strided_slice %369 {offsets = [0, 0], sizes = [8, 32], strides = [1, 1]} : vector<8x128xf32> to vector<8x32xf32>
    %372 = vector.extract_strided_slice %369 {offsets = [0, 32], sizes = [8, 32], strides = [1, 1]} : vector<8x128xf32> to vector<8x32xf32>
    %373 = vector.extract_strided_slice %370 {offsets = [0, 64], sizes = [8, 32], strides = [1, 1]} : vector<8x128xf32> to vector<8x32xf32>
    %374 = vector.extract_strided_slice %369 {offsets = [0, 96], sizes = [8, 32], strides = [1, 1]} : vector<8x128xf32> to vector<8x32xf32>
    %375 = arith.mulf %372, %329 : vector<8x32xf32>
    %376 = arith.mulf %371, %373 : vector<8x32xf32>
    %377 = arith.addf %375, %376 : vector<8x32xf32>
    %378 = math.tanh %377 : vector<8x32xf32>
    %379 = arith.mulf %374, %378 : vector<8x32xf32>
    %380 = arith.truncf %379 : vector<8x32xf32> to vector<8x32xbf16>
    %cst_95 = arith.constant dense<0.000000e+00> : vector<8x128xf32>
    %381 = tpu.matmul %380, %11, %cst_95 {dimension_numbers = #tpu.dot_dimension_numbers<[1], [0], [0], [1], [0, 0, 1, 1], [], []>} : vector<8x32xbf16>, vector<32x128xbf16>, vector<8x128xf32> -> vector<8x128xf32>
    %382 = arith.truncf %352 : vector<8x32xf32> to vector<8x32xbf16>
    %cst_96 = arith.constant dense<0.000000e+00> : vector<8x128xf32>
    %383 = tpu.matmul %382, %12, %cst_96 {dimension_numbers = #tpu.dot_dimension_numbers<[1], [0], [0], [1], [0, 0, 1, 1], [], []>} : vector<8x32xbf16>, vector<32x128xbf16>, vector<8x128xf32> -> vector<8x128xf32>
    %384 = arith.addf %381, %383 : vector<8x128xf32>
    %385 = arith.addf %384, %15 : vector<8x128xf32>
    %386 = arith.negf %385 : vector<8x128xf32>
    %387 = math.exp %386 : vector<8x128xf32>
    %cst_97 = arith.constant 1.000000e+00 : f32
    %388 = vector.broadcast %cst_97 : f32 to vector<8x128xf32>
    %389 = arith.addf %388, %387 : vector<8x128xf32>
    %390 = arith.divf %388, %389 : vector<8x128xf32>
    %391 = math.tanh %385 : vector<8x128xf32>
    %392 = vector.extract_strided_slice %390 {offsets = [0, 0], sizes = [8, 32], strides = [1, 1]} : vector<8x128xf32> to vector<8x32xf32>
    %393 = vector.extract_strided_slice %390 {offsets = [0, 32], sizes = [8, 32], strides = [1, 1]} : vector<8x128xf32> to vector<8x32xf32>
    %394 = vector.extract_strided_slice %391 {offsets = [0, 64], sizes = [8, 32], strides = [1, 1]} : vector<8x128xf32> to vector<8x32xf32>
    %395 = vector.extract_strided_slice %390 {offsets = [0, 96], sizes = [8, 32], strides = [1, 1]} : vector<8x128xf32> to vector<8x32xf32>
    %396 = arith.mulf %393, %350 : vector<8x32xf32>
    %397 = arith.mulf %392, %394 : vector<8x32xf32>
    %398 = arith.addf %396, %397 : vector<8x32xf32>
    %399 = math.tanh %398 : vector<8x32xf32>
    %400 = arith.mulf %395, %399 : vector<8x32xf32>
    %401 = arith.truncf %400 : vector<8x32xf32> to vector<8x32xbf16>
    %cst_98 = arith.constant dense<0.000000e+00> : vector<8x128xf32>
    %402 = tpu.matmul %401, %17, %cst_98 {dimension_numbers = #tpu.dot_dimension_numbers<[1], [0], [0], [1], [0, 0, 1, 1], [], []>} : vector<8x32xbf16>, vector<32x128xbf16>, vector<8x128xf32> -> vector<8x128xf32>
    %403 = arith.addf %402, %20 : vector<8x128xf32>
    %c1_99 = arith.constant 1 : index
    %c0_100 = arith.constant 0 : index
    %c0_101 = arith.constant 0 : index
    %404 = vector.load %arg16[%c1_99, %c0_100, %c0_101] : memref<8x8x128xf32, #tpu.memory_space<vmem>>, vector<1x8x128xf32>
    %405 = vector.shape_cast %404 : vector<1x8x128xf32> to vector<8x128xf32>
    %406 = vector.shape_cast %403 : vector<8x128xf32> to vector<1x8x128xf32>
    tpu.vector_store %arg16[%c1_99, %c0_100, %c0_101], %406 {strides = array<i32>} : memref<8x8x128xf32, #tpu.memory_space<vmem>>, vector<1x8x128xf32>,
    %c24_i32 = arith.constant 24 : i32
    %407 = vector.broadcast %c24_i32 : i32 to vector<8x128xi32>
    %408 = arith.cmpi slt, %357, %407 : vector<8x128xi32>
    %cst_102 = arith.constant -1.000000e+30 : f32
    %409 = vector.broadcast %cst_102 : f32 to vector<8x128xf32>
    %410 = arith.select %408, %403, %409 : vector<8x128xi1>, vector<8x128xf32>
    %cst_103 = arith.constant dense<0xFF800000> : vector<8xf32>
    %411 = vector.multi_reduction <maximumf>, %410, %cst_103 [1] : vector<8x128xf32> to vector<8xf32>
    %412 = vector.shape_cast %411 : vector<8xf32> to vector<8x1xf32>
    %413 = vector.broadcast %412 : vector<8x1xf32> to vector<8x128xf32>
    %414 = arith.cmpf oeq, %410, %413 : vector<8x128xf32>
    %c128_i32 = arith.constant 128 : i32
    %415 = vector.broadcast %c128_i32 : i32 to vector<8x128xi32>
    %416 = arith.select %414, %357, %415 : vector<8x128xi1>, vector<8x128xi32>
    %cst_104 = arith.constant dense<2147483647> : vector<8xi32>
    %417 = vector.multi_reduction <minsi>, %416, %cst_104 [1] : vector<8x128xi32> to vector<8xi32>
    %418 = vector.shape_cast %417 : vector<8xi32> to vector<8x1xi32>
    %419 = vector.broadcast %418 : vector<8x1xi32> to vector<8x128xi32>
    %420 = arith.cmpi eq, %357, %419 : vector<8x128xi32>
    %421 = arith.extui %420 : vector<8x128xi1> to vector<8x128xi32>
    %422 = arith.sitofp %421 : vector<8x128xi32> to vector<8x128xf32>
    %423 = arith.truncf %422 : vector<8x128xf32> to vector<8x128xbf16>
    %cst_105 = arith.constant dense<0.000000e+00> : vector<8x16xf32>
    %424 = tpu.matmul %423, %16, %cst_105 {dimension_numbers = #tpu.dot_dimension_numbers<[1], [0], [0], [1], [0, 0, 1, 1], [], []>} : vector<8x128xbf16>, vector<128x16xbf16>, vector<8x16xf32> -> vector<8x16xf32>
    %425 = arith.truncf %424 : vector<8x16xf32> to vector<8x16xbf16>
    %c1_106 = arith.constant 1 : index
    %c0_107 = arith.constant 0 : index
    %c0_108 = arith.constant 0 : index
    %426 = vector.load %arg2[%c1_106, %c0_107, %c0_108] : memref<8x8x16xbf16, #tpu.memory_space<vmem>>, vector<1x8x16xbf16>
    %427 = vector.shape_cast %426 : vector<1x8x16xbf16> to vector<8x16xbf16>
    %c1_109 = arith.constant 1 : index
    %428 = memref.load %arg0[%c1_109] : memref<8xi32, #tpu.memory_space<smem>>
    %c0_i32 = arith.constant 0 : i32
    %429 = arith.cmpi ne, %428, %c0_i32 : i32
    %430 = arith.select %429, %427, %425 : vector<8x16xbf16>
    %cst_110 = arith.constant dense<0.000000e+00> : vector<8x128xf32>
    %431 = tpu.matmul %430, %6, %cst_110 {dimension_numbers = #tpu.dot_dimension_numbers<[1], [0], [0], [1], [0, 0, 1, 1], [], []>} : vector<8x16xbf16>, vector<16x128xbf16>, vector<8x128xf32> -> vector<8x128xf32>
    %432 = arith.truncf %379 : vector<8x32xf32> to vector<8x32xbf16>
    %cst_111 = arith.constant dense<0.000000e+00> : vector<8x128xf32>
    %433 = tpu.matmul %432, %7, %cst_111 {dimension_numbers = #tpu.dot_dimension_numbers<[1], [0], [0], [1], [0, 0, 1, 1], [], []>} : vector<8x32xbf16>, vector<32x128xbf16>, vector<8x128xf32> -> vector<8x128xf32>
    %434 = arith.addf %431, %433 : vector<8x128xf32>
    %435 = arith.addf %434, %10 : vector<8x128xf32>
    %436 = arith.negf %435 : vector<8x128xf32>
    %437 = math.exp %436 : vector<8x128xf32>
    %cst_112 = arith.constant 1.000000e+00 : f32
    %438 = vector.broadcast %cst_112 : f32 to vector<8x128xf32>
    %439 = arith.addf %438, %437 : vector<8x128xf32>
    %440 = arith.divf %438, %439 : vector<8x128xf32>
    %441 = math.tanh %435 : vector<8x128xf32>
    %442 = vector.extract_strided_slice %440 {offsets = [0, 0], sizes = [8, 32], strides = [1, 1]} : vector<8x128xf32> to vector<8x32xf32>
    %443 = vector.extract_strided_slice %440 {offsets = [0, 32], sizes = [8, 32], strides = [1, 1]} : vector<8x128xf32> to vector<8x32xf32>
    %444 = vector.extract_strided_slice %441 {offsets = [0, 64], sizes = [8, 32], strides = [1, 1]} : vector<8x128xf32> to vector<8x32xf32>
    %445 = vector.extract_strided_slice %440 {offsets = [0, 96], sizes = [8, 32], strides = [1, 1]} : vector<8x128xf32> to vector<8x32xf32>
    %446 = arith.mulf %443, %377 : vector<8x32xf32>
    %447 = arith.mulf %442, %444 : vector<8x32xf32>
    %448 = arith.addf %446, %447 : vector<8x32xf32>
    %449 = math.tanh %448 : vector<8x32xf32>
    %450 = arith.mulf %445, %449 : vector<8x32xf32>
    %451 = arith.truncf %450 : vector<8x32xf32> to vector<8x32xbf16>
    %cst_113 = arith.constant dense<0.000000e+00> : vector<8x128xf32>
    %452 = tpu.matmul %451, %11, %cst_113 {dimension_numbers = #tpu.dot_dimension_numbers<[1], [0], [0], [1], [0, 0, 1, 1], [], []>} : vector<8x32xbf16>, vector<32x128xbf16>, vector<8x128xf32> -> vector<8x128xf32>
    %453 = arith.truncf %400 : vector<8x32xf32> to vector<8x32xbf16>
    %cst_114 = arith.constant dense<0.000000e+00> : vector<8x128xf32>
    %454 = tpu.matmul %453, %12, %cst_114 {dimension_numbers = #tpu.dot_dimension_numbers<[1], [0], [0], [1], [0, 0, 1, 1], [], []>} : vector<8x32xbf16>, vector<32x128xbf16>, vector<8x128xf32> -> vector<8x128xf32>
    %455 = arith.addf %452, %454 : vector<8x128xf32>
    %456 = arith.addf %455, %15 : vector<8x128xf32>
    %457 = arith.negf %456 : vector<8x128xf32>
    %458 = math.exp %457 : vector<8x128xf32>
    %cst_115 = arith.constant 1.000000e+00 : f32
    %459 = vector.broadcast %cst_115 : f32 to vector<8x128xf32>
    %460 = arith.addf %459, %458 : vector<8x128xf32>
    %461 = arith.divf %459, %460 : vector<8x128xf32>
    %462 = math.tanh %456 : vector<8x128xf32>
    %463 = vector.extract_strided_slice %461 {offsets = [0, 0], sizes = [8, 32], strides = [1, 1]} : vector<8x128xf32> to vector<8x32xf32>
    %464 = vector.extract_strided_slice %461 {offsets = [0, 32], sizes = [8, 32], strides = [1, 1]} : vector<8x128xf32> to vector<8x32xf32>
    %465 = vector.extract_strided_slice %462 {offsets = [0, 64], sizes = [8, 32], strides = [1, 1]} : vector<8x128xf32> to vector<8x32xf32>
    %466 = vector.extract_strided_slice %461 {offsets = [0, 96], sizes = [8, 32], strides = [1, 1]} : vector<8x128xf32> to vector<8x32xf32>
    %467 = arith.mulf %464, %398 : vector<8x32xf32>
    %468 = arith.mulf %463, %465 : vector<8x32xf32>
    %469 = arith.addf %467, %468 : vector<8x32xf32>
    %470 = math.tanh %469 : vector<8x32xf32>
    %471 = arith.mulf %466, %470 : vector<8x32xf32>
    %472 = arith.truncf %471 : vector<8x32xf32> to vector<8x32xbf16>
    %cst_116 = arith.constant dense<0.000000e+00> : vector<8x128xf32>
    %473 = tpu.matmul %472, %17, %cst_116 {dimension_numbers = #tpu.dot_dimension_numbers<[1], [0], [0], [1], [0, 0, 1, 1], [], []>} : vector<8x32xbf16>, vector<32x128xbf16>, vector<8x128xf32> -> vector<8x128xf32>
    %474 = arith.addf %473, %20 : vector<8x128xf32>
    %c2_117 = arith.constant 2 : index
    %c0_118 = arith.constant 0 : index
    %c0_119 = arith.constant 0 : index
    %475 = vector.load %arg16[%c2_117, %c0_118, %c0_119] : memref<8x8x128xf32, #tpu.memory_space<vmem>>, vector<1x8x128xf32>
    %476 = vector.shape_cast %475 : vector<1x8x128xf32> to vector<8x128xf32>
    %477 = vector.shape_cast %474 : vector<8x128xf32> to vector<1x8x128xf32>
    tpu.vector_store %arg16[%c2_117, %c0_118, %c0_119], %477 {strides = array<i32>} : memref<8x8x128xf32, #tpu.memory_space<vmem>>, vector<1x8x128xf32>,
    %c24_i32_120 = arith.constant 24 : i32
    %478 = vector.broadcast %c24_i32_120 : i32 to vector<8x128xi32>
    %479 = arith.cmpi slt, %357, %478 : vector<8x128xi32>
    %cst_121 = arith.constant -1.000000e+30 : f32
    %480 = vector.broadcast %cst_121 : f32 to vector<8x128xf32>
    %481 = arith.select %479, %474, %480 : vector<8x128xi1>, vector<8x128xf32>
    %cst_122 = arith.constant dense<0xFF800000> : vector<8xf32>
    %482 = vector.multi_reduction <maximumf>, %481, %cst_122 [1] : vector<8x128xf32> to vector<8xf32>
    %483 = vector.shape_cast %482 : vector<8xf32> to vector<8x1xf32>
    %484 = vector.broadcast %483 : vector<8x1xf32> to vector<8x128xf32>
    %485 = arith.cmpf oeq, %481, %484 : vector<8x128xf32>
    %c128_i32_123 = arith.constant 128 : i32
    %486 = vector.broadcast %c128_i32_123 : i32 to vector<8x128xi32>
    %487 = arith.select %485, %357, %486 : vector<8x128xi1>, vector<8x128xi32>
    %cst_124 = arith.constant dense<2147483647> : vector<8xi32>
    %488 = vector.multi_reduction <minsi>, %487, %cst_124 [1] : vector<8x128xi32> to vector<8xi32>
    %489 = vector.shape_cast %488 : vector<8xi32> to vector<8x1xi32>
    %490 = vector.broadcast %489 : vector<8x1xi32> to vector<8x128xi32>
    %491 = arith.cmpi eq, %357, %490 : vector<8x128xi32>
    %492 = arith.extui %491 : vector<8x128xi1> to vector<8x128xi32>
    %493 = arith.sitofp %492 : vector<8x128xi32> to vector<8x128xf32>
    %494 = arith.truncf %493 : vector<8x128xf32> to vector<8x128xbf16>
    %cst_125 = arith.constant dense<0.000000e+00> : vector<8x16xf32>
    %495 = tpu.matmul %494, %16, %cst_125 {dimension_numbers = #tpu.dot_dimension_numbers<[1], [0], [0], [1], [0, 0, 1, 1], [], []>} : vector<8x128xbf16>, vector<128x16xbf16>, vector<8x16xf32> -> vector<8x16xf32>
    %496 = arith.truncf %495 : vector<8x16xf32> to vector<8x16xbf16>
    %c2_126 = arith.constant 2 : index
    %c0_127 = arith.constant 0 : index
    %c0_128 = arith.constant 0 : index
    %497 = vector.load %arg2[%c2_126, %c0_127, %c0_128] : memref<8x8x16xbf16, #tpu.memory_space<vmem>>, vector<1x8x16xbf16>
    %498 = vector.shape_cast %497 : vector<1x8x16xbf16> to vector<8x16xbf16>
    %c2_129 = arith.constant 2 : index
    %499 = memref.load %arg0[%c2_129] : memref<8xi32, #tpu.memory_space<smem>>
    %c0_i32_130 = arith.constant 0 : i32
    %500 = arith.cmpi ne, %499, %c0_i32_130 : i32
    %501 = arith.select %500, %498, %496 : vector<8x16xbf16>
    %cst_131 = arith.constant dense<0.000000e+00> : vector<8x128xf32>
    %502 = tpu.matmul %501, %6, %cst_131 {dimension_numbers = #tpu.dot_dimension_numbers<[1], [0], [0], [1], [0, 0, 1, 1], [], []>} : vector<8x16xbf16>, vector<16x128xbf16>, vector<8x128xf32> -> vector<8x128xf32>
    %503 = arith.truncf %450 : vector<8x32xf32> to vector<8x32xbf16>
    %cst_132 = arith.constant dense<0.000000e+00> : vector<8x128xf32>
    %504 = tpu.matmul %503, %7, %cst_132 {dimension_numbers = #tpu.dot_dimension_numbers<[1], [0], [0], [1], [0, 0, 1, 1], [], []>} : vector<8x32xbf16>, vector<32x128xbf16>, vector<8x128xf32> -> vector<8x128xf32>
    %505 = arith.addf %502, %504 : vector<8x128xf32>
    %506 = arith.addf %505, %10 : vector<8x128xf32>
    %507 = arith.negf %506 : vector<8x128xf32>
    %508 = math.exp %507 : vector<8x128xf32>
    %cst_133 = arith.constant 1.000000e+00 : f32
    %509 = vector.broadcast %cst_133 : f32 to vector<8x128xf32>
    %510 = arith.addf %509, %508 : vector<8x128xf32>
    %511 = arith.divf %509, %510 : vector<8x128xf32>
    %512 = math.tanh %506 : vector<8x128xf32>
    %513 = vector.extract_strided_slice %511 {offsets = [0, 0], sizes = [8, 32], strides = [1, 1]} : vector<8x128xf32> to vector<8x32xf32>
    %514 = vector.extract_strided_slice %511 {offsets = [0, 32], sizes = [8, 32], strides = [1, 1]} : vector<8x128xf32> to vector<8x32xf32>
    %515 = vector.extract_strided_slice %512 {offsets = [0, 64], sizes = [8, 32], strides = [1, 1]} : vector<8x128xf32> to vector<8x32xf32>
    %516 = vector.extract_strided_slice %511 {offsets = [0, 96], sizes = [8, 32], strides = [1, 1]} : vector<8x128xf32> to vector<8x32xf32>
    %517 = arith.mulf %514, %448 : vector<8x32xf32>
    %518 = arith.mulf %513, %515 : vector<8x32xf32>
    %519 = arith.addf %517, %518 : vector<8x32xf32>
    %520 = math.tanh %519 : vector<8x32xf32>
    %521 = arith.mulf %516, %520 : vector<8x32xf32>
    %522 = arith.truncf %521 : vector<8x32xf32> to vector<8x32xbf16>
    %cst_134 = arith.constant dense<0.000000e+00> : vector<8x128xf32>
    %523 = tpu.matmul %522, %11, %cst_134 {dimension_numbers = #tpu.dot_dimension_numbers<[1], [0], [0], [1], [0, 0, 1, 1], [], []>} : vector<8x32xbf16>, vector<32x128xbf16>, vector<8x128xf32> -> vector<8x128xf32>
    %524 = arith.truncf %471 : vector<8x32xf32> to vector<8x32xbf16>
    %cst_135 = arith.constant dense<0.000000e+00> : vector<8x128xf32>
    %525 = tpu.matmul %524, %12, %cst_135 {dimension_numbers = #tpu.dot_dimension_numbers<[1], [0], [0], [1], [0, 0, 1, 1], [], []>} : vector<8x32xbf16>, vector<32x128xbf16>, vector<8x128xf32> -> vector<8x128xf32>
    %526 = arith.addf %523, %525 : vector<8x128xf32>
    %527 = arith.addf %526, %15 : vector<8x128xf32>
    %528 = arith.negf %527 : vector<8x128xf32>
    %529 = math.exp %528 : vector<8x128xf32>
    %cst_136 = arith.constant 1.000000e+00 : f32
    %530 = vector.broadcast %cst_136 : f32 to vector<8x128xf32>
    %531 = arith.addf %530, %529 : vector<8x128xf32>
    %532 = arith.divf %530, %531 : vector<8x128xf32>
    %533 = math.tanh %527 : vector<8x128xf32>
    %534 = vector.extract_strided_slice %532 {offsets = [0, 0], sizes = [8, 32], strides = [1, 1]} : vector<8x128xf32> to vector<8x32xf32>
    %535 = vector.extract_strided_slice %532 {offsets = [0, 32], sizes = [8, 32], strides = [1, 1]} : vector<8x128xf32> to vector<8x32xf32>
    %536 = vector.extract_strided_slice %533 {offsets = [0, 64], sizes = [8, 32], strides = [1, 1]} : vector<8x128xf32> to vector<8x32xf32>
    %537 = vector.extract_strided_slice %532 {offsets = [0, 96], sizes = [8, 32], strides = [1, 1]} : vector<8x128xf32> to vector<8x32xf32>
    %538 = arith.mulf %535, %469 : vector<8x32xf32>
    %539 = arith.mulf %534, %536 : vector<8x32xf32>
    %540 = arith.addf %538, %539 : vector<8x32xf32>
    %541 = math.tanh %540 : vector<8x32xf32>
    %542 = arith.mulf %537, %541 : vector<8x32xf32>
    %543 = arith.truncf %542 : vector<8x32xf32> to vector<8x32xbf16>
    %cst_137 = arith.constant dense<0.000000e+00> : vector<8x128xf32>
    %544 = tpu.matmul %543, %17, %cst_137 {dimension_numbers = #tpu.dot_dimension_numbers<[1], [0], [0], [1], [0, 0, 1, 1], [], []>} : vector<8x32xbf16>, vector<32x128xbf16>, vector<8x128xf32> -> vector<8x128xf32>
    %545 = arith.addf %544, %20 : vector<8x128xf32>
    %c3_138 = arith.constant 3 : index
    %c0_139 = arith.constant 0 : index
    %c0_140 = arith.constant 0 : index
    %546 = vector.load %arg16[%c3_138, %c0_139, %c0_140] : memref<8x8x128xf32, #tpu.memory_space<vmem>>, vector<1x8x128xf32>
    %547 = vector.shape_cast %546 : vector<1x8x128xf32> to vector<8x128xf32>
    %548 = vector.shape_cast %545 : vector<8x128xf32> to vector<1x8x128xf32>
    tpu.vector_store %arg16[%c3_138, %c0_139, %c0_140], %548 {strides = array<i32>} : memref<8x8x128xf32, #tpu.memory_space<vmem>>, vector<1x8x128xf32>,
    %c24_i32_141 = arith.constant 24 : i32
    %549 = vector.broadcast %c24_i32_141 : i32 to vector<8x128xi32>
    %550 = arith.cmpi slt, %357, %549 : vector<8x128xi32>
    %cst_142 = arith.constant -1.000000e+30 : f32
    %551 = vector.broadcast %cst_142 : f32 to vector<8x128xf32>
    %552 = arith.select %550, %545, %551 : vector<8x128xi1>, vector<8x128xf32>
    %cst_143 = arith.constant dense<0xFF800000> : vector<8xf32>
    %553 = vector.multi_reduction <maximumf>, %552, %cst_143 [1] : vector<8x128xf32> to vector<8xf32>
    %554 = vector.shape_cast %553 : vector<8xf32> to vector<8x1xf32>
    %555 = vector.broadcast %554 : vector<8x1xf32> to vector<8x128xf32>
    %556 = arith.cmpf oeq, %552, %555 : vector<8x128xf32>
    %c128_i32_144 = arith.constant 128 : i32
    %557 = vector.broadcast %c128_i32_144 : i32 to vector<8x128xi32>
    %558 = arith.select %556, %357, %557 : vector<8x128xi1>, vector<8x128xi32>
    %cst_145 = arith.constant dense<2147483647> : vector<8xi32>
    %559 = vector.multi_reduction <minsi>, %558, %cst_145 [1] : vector<8x128xi32> to vector<8xi32>
    %560 = vector.shape_cast %559 : vector<8xi32> to vector<8x1xi32>
    %561 = vector.broadcast %560 : vector<8x1xi32> to vector<8x128xi32>
    %562 = arith.cmpi eq, %357, %561 : vector<8x128xi32>
    %563 = arith.extui %562 : vector<8x128xi1> to vector<8x128xi32>
    %564 = arith.sitofp %563 : vector<8x128xi32> to vector<8x128xf32>
    %565 = arith.truncf %564 : vector<8x128xf32> to vector<8x128xbf16>
    %cst_146 = arith.constant dense<0.000000e+00> : vector<8x16xf32>
    %566 = tpu.matmul %565, %16, %cst_146 {dimension_numbers = #tpu.dot_dimension_numbers<[1], [0], [0], [1], [0, 0, 1, 1], [], []>} : vector<8x128xbf16>, vector<128x16xbf16>, vector<8x16xf32> -> vector<8x16xf32>
    %567 = arith.truncf %566 : vector<8x16xf32> to vector<8x16xbf16>
    %c3_147 = arith.constant 3 : index
    %c0_148 = arith.constant 0 : index
    %c0_149 = arith.constant 0 : index
    %568 = vector.load %arg2[%c3_147, %c0_148, %c0_149] : memref<8x8x16xbf16, #tpu.memory_space<vmem>>, vector<1x8x16xbf16>
    %569 = vector.shape_cast %568 : vector<1x8x16xbf16> to vector<8x16xbf16>
    %c3_150 = arith.constant 3 : index
    %570 = memref.load %arg0[%c3_150] : memref<8xi32, #tpu.memory_space<smem>>
    %c0_i32_151 = arith.constant 0 : i32
    %571 = arith.cmpi ne, %570, %c0_i32_151 : i32
    %572 = arith.select %571, %569, %567 : vector<8x16xbf16>
    %cst_152 = arith.constant dense<0.000000e+00> : vector<8x128xf32>
    %573 = tpu.matmul %572, %6, %cst_152 {dimension_numbers = #tpu.dot_dimension_numbers<[1], [0], [0], [1], [0, 0, 1, 1], [], []>} : vector<8x16xbf16>, vector<16x128xbf16>, vector<8x128xf32> -> vector<8x128xf32>
    %574 = arith.truncf %521 : vector<8x32xf32> to vector<8x32xbf16>
    %cst_153 = arith.constant dense<0.000000e+00> : vector<8x128xf32>
    %575 = tpu.matmul %574, %7, %cst_153 {dimension_numbers = #tpu.dot_dimension_numbers<[1], [0], [0], [1], [0, 0, 1, 1], [], []>} : vector<8x32xbf16>, vector<32x128xbf16>, vector<8x128xf32> -> vector<8x128xf32>
    %576 = arith.addf %573, %575 : vector<8x128xf32>
    %577 = arith.addf %576, %10 : vector<8x128xf32>
    %578 = arith.negf %577 : vector<8x128xf32>
    %579 = math.exp %578 : vector<8x128xf32>
    %cst_154 = arith.constant 1.000000e+00 : f32
    %580 = vector.broadcast %cst_154 : f32 to vector<8x128xf32>
    %581 = arith.addf %580, %579 : vector<8x128xf32>
    %582 = arith.divf %580, %581 : vector<8x128xf32>
    %583 = math.tanh %577 : vector<8x128xf32>
    %584 = vector.extract_strided_slice %582 {offsets = [0, 0], sizes = [8, 32], strides = [1, 1]} : vector<8x128xf32> to vector<8x32xf32>
    %585 = vector.extract_strided_slice %582 {offsets = [0, 32], sizes = [8, 32], strides = [1, 1]} : vector<8x128xf32> to vector<8x32xf32>
    %586 = vector.extract_strided_slice %583 {offsets = [0, 64], sizes = [8, 32], strides = [1, 1]} : vector<8x128xf32> to vector<8x32xf32>
    %587 = vector.extract_strided_slice %582 {offsets = [0, 96], sizes = [8, 32], strides = [1, 1]} : vector<8x128xf32> to vector<8x32xf32>
    %588 = arith.mulf %585, %519 : vector<8x32xf32>
    %589 = arith.mulf %584, %586 : vector<8x32xf32>
    %590 = arith.addf %588, %589 : vector<8x32xf32>
    %591 = math.tanh %590 : vector<8x32xf32>
    %592 = arith.mulf %587, %591 : vector<8x32xf32>
    %593 = arith.truncf %592 : vector<8x32xf32> to vector<8x32xbf16>
    %cst_155 = arith.constant dense<0.000000e+00> : vector<8x128xf32>
    %594 = tpu.matmul %593, %11, %cst_155 {dimension_numbers = #tpu.dot_dimension_numbers<[1], [0], [0], [1], [0, 0, 1, 1], [], []>} : vector<8x32xbf16>, vector<32x128xbf16>, vector<8x128xf32> -> vector<8x128xf32>
    %595 = arith.truncf %542 : vector<8x32xf32> to vector<8x32xbf16>
    %cst_156 = arith.constant dense<0.000000e+00> : vector<8x128xf32>
    %596 = tpu.matmul %595, %12, %cst_156 {dimension_numbers = #tpu.dot_dimension_numbers<[1], [0], [0], [1], [0, 0, 1, 1], [], []>} : vector<8x32xbf16>, vector<32x128xbf16>, vector<8x128xf32> -> vector<8x128xf32>
    %597 = arith.addf %594, %596 : vector<8x128xf32>
    %598 = arith.addf %597, %15 : vector<8x128xf32>
    %599 = arith.negf %598 : vector<8x128xf32>
    %600 = math.exp %599 : vector<8x128xf32>
    %cst_157 = arith.constant 1.000000e+00 : f32
    %601 = vector.broadcast %cst_157 : f32 to vector<8x128xf32>
    %602 = arith.addf %601, %600 : vector<8x128xf32>
    %603 = arith.divf %601, %602 : vector<8x128xf32>
    %604 = math.tanh %598 : vector<8x128xf32>
    %605 = vector.extract_strided_slice %603 {offsets = [0, 0], sizes = [8, 32], strides = [1, 1]} : vector<8x128xf32> to vector<8x32xf32>
    %606 = vector.extract_strided_slice %603 {offsets = [0, 32], sizes = [8, 32], strides = [1, 1]} : vector<8x128xf32> to vector<8x32xf32>
    %607 = vector.extract_strided_slice %604 {offsets = [0, 64], sizes = [8, 32], strides = [1, 1]} : vector<8x128xf32> to vector<8x32xf32>
    %608 = vector.extract_strided_slice %603 {offsets = [0, 96], sizes = [8, 32], strides = [1, 1]} : vector<8x128xf32> to vector<8x32xf32>
    %609 = arith.mulf %606, %540 : vector<8x32xf32>
    %610 = arith.mulf %605, %607 : vector<8x32xf32>
    %611 = arith.addf %609, %610 : vector<8x32xf32>
    %612 = math.tanh %611 : vector<8x32xf32>
    %613 = arith.mulf %608, %612 : vector<8x32xf32>
    %614 = arith.truncf %613 : vector<8x32xf32> to vector<8x32xbf16>
    %cst_158 = arith.constant dense<0.000000e+00> : vector<8x128xf32>
    %615 = tpu.matmul %614, %17, %cst_158 {dimension_numbers = #tpu.dot_dimension_numbers<[1], [0], [0], [1], [0, 0, 1, 1], [], []>} : vector<8x32xbf16>, vector<32x128xbf16>, vector<8x128xf32> -> vector<8x128xf32>
    %616 = arith.addf %615, %20 : vector<8x128xf32>
    %c4_159 = arith.constant 4 : index
    %c0_160 = arith.constant 0 : index
    %c0_161 = arith.constant 0 : index
    %617 = vector.load %arg16[%c4_159, %c0_160, %c0_161] : memref<8x8x128xf32, #tpu.memory_space<vmem>>, vector<1x8x128xf32>
    %618 = vector.shape_cast %617 : vector<1x8x128xf32> to vector<8x128xf32>
    %619 = vector.shape_cast %616 : vector<8x128xf32> to vector<1x8x128xf32>
    tpu.vector_store %arg16[%c4_159, %c0_160, %c0_161], %619 {strides = array<i32>} : memref<8x8x128xf32, #tpu.memory_space<vmem>>, vector<1x8x128xf32>,
    %c24_i32_162 = arith.constant 24 : i32
    %620 = vector.broadcast %c24_i32_162 : i32 to vector<8x128xi32>
    %621 = arith.cmpi slt, %357, %620 : vector<8x128xi32>
    %cst_163 = arith.constant -1.000000e+30 : f32
    %622 = vector.broadcast %cst_163 : f32 to vector<8x128xf32>
    %623 = arith.select %621, %616, %622 : vector<8x128xi1>, vector<8x128xf32>
    %cst_164 = arith.constant dense<0xFF800000> : vector<8xf32>
    %624 = vector.multi_reduction <maximumf>, %623, %cst_164 [1] : vector<8x128xf32> to vector<8xf32>
    %625 = vector.shape_cast %624 : vector<8xf32> to vector<8x1xf32>
    %626 = vector.broadcast %625 : vector<8x1xf32> to vector<8x128xf32>
    %627 = arith.cmpf oeq, %623, %626 : vector<8x128xf32>
    %c128_i32_165 = arith.constant 128 : i32
    %628 = vector.broadcast %c128_i32_165 : i32 to vector<8x128xi32>
    %629 = arith.select %627, %357, %628 : vector<8x128xi1>, vector<8x128xi32>
    %cst_166 = arith.constant dense<2147483647> : vector<8xi32>
    %630 = vector.multi_reduction <minsi>, %629, %cst_166 [1] : vector<8x128xi32> to vector<8xi32>
    %631 = vector.shape_cast %630 : vector<8xi32> to vector<8x1xi32>
    %632 = vector.broadcast %631 : vector<8x1xi32> to vector<8x128xi32>
    %633 = arith.cmpi eq, %357, %632 : vector<8x128xi32>
    %634 = arith.extui %633 : vector<8x128xi1> to vector<8x128xi32>
    %635 = arith.sitofp %634 : vector<8x128xi32> to vector<8x128xf32>
    %636 = arith.truncf %635 : vector<8x128xf32> to vector<8x128xbf16>
    %cst_167 = arith.constant dense<0.000000e+00> : vector<8x16xf32>
    %637 = tpu.matmul %636, %16, %cst_167 {dimension_numbers = #tpu.dot_dimension_numbers<[1], [0], [0], [1], [0, 0, 1, 1], [], []>} : vector<8x128xbf16>, vector<128x16xbf16>, vector<8x16xf32> -> vector<8x16xf32>
    %638 = arith.truncf %637 : vector<8x16xf32> to vector<8x16xbf16>
    %c4_168 = arith.constant 4 : index
    %c0_169 = arith.constant 0 : index
    %c0_170 = arith.constant 0 : index
    %639 = vector.load %arg2[%c4_168, %c0_169, %c0_170] : memref<8x8x16xbf16, #tpu.memory_space<vmem>>, vector<1x8x16xbf16>
    %640 = vector.shape_cast %639 : vector<1x8x16xbf16> to vector<8x16xbf16>
    %c4_171 = arith.constant 4 : index
    %641 = memref.load %arg0[%c4_171] : memref<8xi32, #tpu.memory_space<smem>>
    %c0_i32_172 = arith.constant 0 : i32
    %642 = arith.cmpi ne, %641, %c0_i32_172 : i32
    %643 = arith.select %642, %640, %638 : vector<8x16xbf16>
    %cst_173 = arith.constant dense<0.000000e+00> : vector<8x128xf32>
    %644 = tpu.matmul %643, %6, %cst_173 {dimension_numbers = #tpu.dot_dimension_numbers<[1], [0], [0], [1], [0, 0, 1, 1], [], []>} : vector<8x16xbf16>, vector<16x128xbf16>, vector<8x128xf32> -> vector<8x128xf32>
    %645 = arith.truncf %592 : vector<8x32xf32> to vector<8x32xbf16>
    %cst_174 = arith.constant dense<0.000000e+00> : vector<8x128xf32>
    %646 = tpu.matmul %645, %7, %cst_174 {dimension_numbers = #tpu.dot_dimension_numbers<[1], [0], [0], [1], [0, 0, 1, 1], [], []>} : vector<8x32xbf16>, vector<32x128xbf16>, vector<8x128xf32> -> vector<8x128xf32>
    %647 = arith.addf %644, %646 : vector<8x128xf32>
    %648 = arith.addf %647, %10 : vector<8x128xf32>
    %649 = arith.negf %648 : vector<8x128xf32>
    %650 = math.exp %649 : vector<8x128xf32>
    %cst_175 = arith.constant 1.000000e+00 : f32
    %651 = vector.broadcast %cst_175 : f32 to vector<8x128xf32>
    %652 = arith.addf %651, %650 : vector<8x128xf32>
    %653 = arith.divf %651, %652 : vector<8x128xf32>
    %654 = math.tanh %648 : vector<8x128xf32>
    %655 = vector.extract_strided_slice %653 {offsets = [0, 0], sizes = [8, 32], strides = [1, 1]} : vector<8x128xf32> to vector<8x32xf32>
    %656 = vector.extract_strided_slice %653 {offsets = [0, 32], sizes = [8, 32], strides = [1, 1]} : vector<8x128xf32> to vector<8x32xf32>
    %657 = vector.extract_strided_slice %654 {offsets = [0, 64], sizes = [8, 32], strides = [1, 1]} : vector<8x128xf32> to vector<8x32xf32>
    %658 = vector.extract_strided_slice %653 {offsets = [0, 96], sizes = [8, 32], strides = [1, 1]} : vector<8x128xf32> to vector<8x32xf32>
    %659 = arith.mulf %656, %590 : vector<8x32xf32>
    %660 = arith.mulf %655, %657 : vector<8x32xf32>
    %661 = arith.addf %659, %660 : vector<8x32xf32>
    %662 = math.tanh %661 : vector<8x32xf32>
    %663 = arith.mulf %658, %662 : vector<8x32xf32>
    %664 = arith.truncf %663 : vector<8x32xf32> to vector<8x32xbf16>
    %cst_176 = arith.constant dense<0.000000e+00> : vector<8x128xf32>
    %665 = tpu.matmul %664, %11, %cst_176 {dimension_numbers = #tpu.dot_dimension_numbers<[1], [0], [0], [1], [0, 0, 1, 1], [], []>} : vector<8x32xbf16>, vector<32x128xbf16>, vector<8x128xf32> -> vector<8x128xf32>
    %666 = arith.truncf %613 : vector<8x32xf32> to vector<8x32xbf16>
    %cst_177 = arith.constant dense<0.000000e+00> : vector<8x128xf32>
    %667 = tpu.matmul %666, %12, %cst_177 {dimension_numbers = #tpu.dot_dimension_numbers<[1], [0], [0], [1], [0, 0, 1, 1], [], []>} : vector<8x32xbf16>, vector<32x128xbf16>, vector<8x128xf32> -> vector<8x128xf32>
    %668 = arith.addf %665, %667 : vector<8x128xf32>
    %669 = arith.addf %668, %15 : vector<8x128xf32>
    %670 = arith.negf %669 : vector<8x128xf32>
    %671 = math.exp %670 : vector<8x128xf32>
    %cst_178 = arith.constant 1.000000e+00 : f32
    %672 = vector.broadcast %cst_178 : f32 to vector<8x128xf32>
    %673 = arith.addf %672, %671 : vector<8x128xf32>
    %674 = arith.divf %672, %673 : vector<8x128xf32>
    %675 = math.tanh %669 : vector<8x128xf32>
    %676 = vector.extract_strided_slice %674 {offsets = [0, 0], sizes = [8, 32], strides = [1, 1]} : vector<8x128xf32> to vector<8x32xf32>
    %677 = vector.extract_strided_slice %674 {offsets = [0, 32], sizes = [8, 32], strides = [1, 1]} : vector<8x128xf32> to vector<8x32xf32>
    %678 = vector.extract_strided_slice %675 {offsets = [0, 64], sizes = [8, 32], strides = [1, 1]} : vector<8x128xf32> to vector<8x32xf32>
    %679 = vector.extract_strided_slice %674 {offsets = [0, 96], sizes = [8, 32], strides = [1, 1]} : vector<8x128xf32> to vector<8x32xf32>
    %680 = arith.mulf %677, %611 : vector<8x32xf32>
    %681 = arith.mulf %676, %678 : vector<8x32xf32>
    %682 = arith.addf %680, %681 : vector<8x32xf32>
    %683 = math.tanh %682 : vector<8x32xf32>
    %684 = arith.mulf %679, %683 : vector<8x32xf32>
    %685 = arith.truncf %684 : vector<8x32xf32> to vector<8x32xbf16>
    %cst_179 = arith.constant dense<0.000000e+00> : vector<8x128xf32>
    %686 = tpu.matmul %685, %17, %cst_179 {dimension_numbers = #tpu.dot_dimension_numbers<[1], [0], [0], [1], [0, 0, 1, 1], [], []>} : vector<8x32xbf16>, vector<32x128xbf16>, vector<8x128xf32> -> vector<8x128xf32>
    %687 = arith.addf %686, %20 : vector<8x128xf32>
    %c5_180 = arith.constant 5 : index
    %c0_181 = arith.constant 0 : index
    %c0_182 = arith.constant 0 : index
    %688 = vector.load %arg16[%c5_180, %c0_181, %c0_182] : memref<8x8x128xf32, #tpu.memory_space<vmem>>, vector<1x8x128xf32>
    %689 = vector.shape_cast %688 : vector<1x8x128xf32> to vector<8x128xf32>
    %690 = vector.shape_cast %687 : vector<8x128xf32> to vector<1x8x128xf32>
    tpu.vector_store %arg16[%c5_180, %c0_181, %c0_182], %690 {strides = array<i32>} : memref<8x8x128xf32, #tpu.memory_space<vmem>>, vector<1x8x128xf32>,
    %c24_i32_183 = arith.constant 24 : i32
    %691 = vector.broadcast %c24_i32_183 : i32 to vector<8x128xi32>
    %692 = arith.cmpi slt, %357, %691 : vector<8x128xi32>
    %cst_184 = arith.constant -1.000000e+30 : f32
    %693 = vector.broadcast %cst_184 : f32 to vector<8x128xf32>
    %694 = arith.select %692, %687, %693 : vector<8x128xi1>, vector<8x128xf32>
    %cst_185 = arith.constant dense<0xFF800000> : vector<8xf32>
    %695 = vector.multi_reduction <maximumf>, %694, %cst_185 [1] : vector<8x128xf32> to vector<8xf32>
    %696 = vector.shape_cast %695 : vector<8xf32> to vector<8x1xf32>
    %697 = vector.broadcast %696 : vector<8x1xf32> to vector<8x128xf32>
    %698 = arith.cmpf oeq, %694, %697 : vector<8x128xf32>
    %c128_i32_186 = arith.constant 128 : i32
    %699 = vector.broadcast %c128_i32_186 : i32 to vector<8x128xi32>
    %700 = arith.select %698, %357, %699 : vector<8x128xi1>, vector<8x128xi32>
    %cst_187 = arith.constant dense<2147483647> : vector<8xi32>
    %701 = vector.multi_reduction <minsi>, %700, %cst_187 [1] : vector<8x128xi32> to vector<8xi32>
    %702 = vector.shape_cast %701 : vector<8xi32> to vector<8x1xi32>
    %703 = vector.broadcast %702 : vector<8x1xi32> to vector<8x128xi32>
    %704 = arith.cmpi eq, %357, %703 : vector<8x128xi32>
    %705 = arith.extui %704 : vector<8x128xi1> to vector<8x128xi32>
    %706 = arith.sitofp %705 : vector<8x128xi32> to vector<8x128xf32>
    %707 = arith.truncf %706 : vector<8x128xf32> to vector<8x128xbf16>
    %cst_188 = arith.constant dense<0.000000e+00> : vector<8x16xf32>
    %708 = tpu.matmul %707, %16, %cst_188 {dimension_numbers = #tpu.dot_dimension_numbers<[1], [0], [0], [1], [0, 0, 1, 1], [], []>} : vector<8x128xbf16>, vector<128x16xbf16>, vector<8x16xf32> -> vector<8x16xf32>
    %709 = arith.truncf %708 : vector<8x16xf32> to vector<8x16xbf16>
    %c5_189 = arith.constant 5 : index
    %c0_190 = arith.constant 0 : index
    %c0_191 = arith.constant 0 : index
    %710 = vector.load %arg2[%c5_189, %c0_190, %c0_191] : memref<8x8x16xbf16, #tpu.memory_space<vmem>>, vector<1x8x16xbf16>
    %711 = vector.shape_cast %710 : vector<1x8x16xbf16> to vector<8x16xbf16>
    %c5_192 = arith.constant 5 : index
    %712 = memref.load %arg0[%c5_192] : memref<8xi32, #tpu.memory_space<smem>>
    %c0_i32_193 = arith.constant 0 : i32
    %713 = arith.cmpi ne, %712, %c0_i32_193 : i32
    %714 = arith.select %713, %711, %709 : vector<8x16xbf16>
    %cst_194 = arith.constant dense<0.000000e+00> : vector<8x128xf32>
    %715 = tpu.matmul %714, %6, %cst_194 {dimension_numbers = #tpu.dot_dimension_numbers<[1], [0], [0], [1], [0, 0, 1, 1], [], []>} : vector<8x16xbf16>, vector<16x128xbf16>, vector<8x128xf32> -> vector<8x128xf32>
    %716 = arith.truncf %663 : vector<8x32xf32> to vector<8x32xbf16>
    %cst_195 = arith.constant dense<0.000000e+00> : vector<8x128xf32>
    %717 = tpu.matmul %716, %7, %cst_195 {dimension_numbers = #tpu.dot_dimension_numbers<[1], [0], [0], [1], [0, 0, 1, 1], [], []>} : vector<8x32xbf16>, vector<32x128xbf16>, vector<8x128xf32> -> vector<8x128xf32>
    %718 = arith.addf %715, %717 : vector<8x128xf32>
    %719 = arith.addf %718, %10 : vector<8x128xf32>
    %720 = arith.negf %719 : vector<8x128xf32>
    %721 = math.exp %720 : vector<8x128xf32>
    %cst_196 = arith.constant 1.000000e+00 : f32
    %722 = vector.broadcast %cst_196 : f32 to vector<8x128xf32>
    %723 = arith.addf %722, %721 : vector<8x128xf32>
    %724 = arith.divf %722, %723 : vector<8x128xf32>
    %725 = math.tanh %719 : vector<8x128xf32>
    %726 = vector.extract_strided_slice %724 {offsets = [0, 0], sizes = [8, 32], strides = [1, 1]} : vector<8x128xf32> to vector<8x32xf32>
    %727 = vector.extract_strided_slice %724 {offsets = [0, 32], sizes = [8, 32], strides = [1, 1]} : vector<8x128xf32> to vector<8x32xf32>
    %728 = vector.extract_strided_slice %725 {offsets = [0, 64], sizes = [8, 32], strides = [1, 1]} : vector<8x128xf32> to vector<8x32xf32>
    %729 = vector.extract_strided_slice %724 {offsets = [0, 96], sizes = [8, 32], strides = [1, 1]} : vector<8x128xf32> to vector<8x32xf32>
    %730 = arith.mulf %727, %661 : vector<8x32xf32>
    %731 = arith.mulf %726, %728 : vector<8x32xf32>
    %732 = arith.addf %730, %731 : vector<8x32xf32>
    %733 = math.tanh %732 : vector<8x32xf32>
    %734 = arith.mulf %729, %733 : vector<8x32xf32>
    %735 = arith.truncf %734 : vector<8x32xf32> to vector<8x32xbf16>
    %cst_197 = arith.constant dense<0.000000e+00> : vector<8x128xf32>
    %736 = tpu.matmul %735, %11, %cst_197 {dimension_numbers = #tpu.dot_dimension_numbers<[1], [0], [0], [1], [0, 0, 1, 1], [], []>} : vector<8x32xbf16>, vector<32x128xbf16>, vector<8x128xf32> -> vector<8x128xf32>
    %737 = arith.truncf %684 : vector<8x32xf32> to vector<8x32xbf16>
    %cst_198 = arith.constant dense<0.000000e+00> : vector<8x128xf32>
    %738 = tpu.matmul %737, %12, %cst_198 {dimension_numbers = #tpu.dot_dimension_numbers<[1], [0], [0], [1], [0, 0, 1, 1], [], []>} : vector<8x32xbf16>, vector<32x128xbf16>, vector<8x128xf32> -> vector<8x128xf32>
    %739 = arith.addf %736, %738 : vector<8x128xf32>
    %740 = arith.addf %739, %15 : vector<8x128xf32>
    %741 = arith.negf %740 : vector<8x128xf32>
    %742 = math.exp %741 : vector<8x128xf32>
    %cst_199 = arith.constant 1.000000e+00 : f32
    %743 = vector.broadcast %cst_199 : f32 to vector<8x128xf32>
    %744 = arith.addf %743, %742 : vector<8x128xf32>
    %745 = arith.divf %743, %744 : vector<8x128xf32>
    %746 = math.tanh %740 : vector<8x128xf32>
    %747 = vector.extract_strided_slice %745 {offsets = [0, 0], sizes = [8, 32], strides = [1, 1]} : vector<8x128xf32> to vector<8x32xf32>
    %748 = vector.extract_strided_slice %745 {offsets = [0, 32], sizes = [8, 32], strides = [1, 1]} : vector<8x128xf32> to vector<8x32xf32>
    %749 = vector.extract_strided_slice %746 {offsets = [0, 64], sizes = [8, 32], strides = [1, 1]} : vector<8x128xf32> to vector<8x32xf32>
    %750 = vector.extract_strided_slice %745 {offsets = [0, 96], sizes = [8, 32], strides = [1, 1]} : vector<8x128xf32> to vector<8x32xf32>
    %751 = arith.mulf %748, %682 : vector<8x32xf32>
    %752 = arith.mulf %747, %749 : vector<8x32xf32>
    %753 = arith.addf %751, %752 : vector<8x32xf32>
    %754 = math.tanh %753 : vector<8x32xf32>
    %755 = arith.mulf %750, %754 : vector<8x32xf32>
    %756 = arith.truncf %755 : vector<8x32xf32> to vector<8x32xbf16>
    %cst_200 = arith.constant dense<0.000000e+00> : vector<8x128xf32>
    %757 = tpu.matmul %756, %17, %cst_200 {dimension_numbers = #tpu.dot_dimension_numbers<[1], [0], [0], [1], [0, 0, 1, 1], [], []>} : vector<8x32xbf16>, vector<32x128xbf16>, vector<8x128xf32> -> vector<8x128xf32>
    %758 = arith.addf %757, %20 : vector<8x128xf32>
    %c6_201 = arith.constant 6 : index
    %c0_202 = arith.constant 0 : index
    %c0_203 = arith.constant 0 : index
    %759 = vector.load %arg16[%c6_201, %c0_202, %c0_203] : memref<8x8x128xf32, #tpu.memory_space<vmem>>, vector<1x8x128xf32>
    %760 = vector.shape_cast %759 : vector<1x8x128xf32> to vector<8x128xf32>
    %761 = vector.shape_cast %758 : vector<8x128xf32> to vector<1x8x128xf32>
    tpu.vector_store %arg16[%c6_201, %c0_202, %c0_203], %761 {strides = array<i32>} : memref<8x8x128xf32, #tpu.memory_space<vmem>>, vector<1x8x128xf32>,
    %c24_i32_204 = arith.constant 24 : i32
    %762 = vector.broadcast %c24_i32_204 : i32 to vector<8x128xi32>
    %763 = arith.cmpi slt, %357, %762 : vector<8x128xi32>
    %cst_205 = arith.constant -1.000000e+30 : f32
    %764 = vector.broadcast %cst_205 : f32 to vector<8x128xf32>
    %765 = arith.select %763, %758, %764 : vector<8x128xi1>, vector<8x128xf32>
    %cst_206 = arith.constant dense<0xFF800000> : vector<8xf32>
    %766 = vector.multi_reduction <maximumf>, %765, %cst_206 [1] : vector<8x128xf32> to vector<8xf32>
    %767 = vector.shape_cast %766 : vector<8xf32> to vector<8x1xf32>
    %768 = vector.broadcast %767 : vector<8x1xf32> to vector<8x128xf32>
    %769 = arith.cmpf oeq, %765, %768 : vector<8x128xf32>
    %c128_i32_207 = arith.constant 128 : i32
    %770 = vector.broadcast %c128_i32_207 : i32 to vector<8x128xi32>
    %771 = arith.select %769, %357, %770 : vector<8x128xi1>, vector<8x128xi32>
    %cst_208 = arith.constant dense<2147483647> : vector<8xi32>
    %772 = vector.multi_reduction <minsi>, %771, %cst_208 [1] : vector<8x128xi32> to vector<8xi32>
    %773 = vector.shape_cast %772 : vector<8xi32> to vector<8x1xi32>
    %774 = vector.broadcast %773 : vector<8x1xi32> to vector<8x128xi32>
    %775 = arith.cmpi eq, %357, %774 : vector<8x128xi32>
    %776 = arith.extui %775 : vector<8x128xi1> to vector<8x128xi32>
    %777 = arith.sitofp %776 : vector<8x128xi32> to vector<8x128xf32>
    %778 = arith.truncf %777 : vector<8x128xf32> to vector<8x128xbf16>
    %cst_209 = arith.constant dense<0.000000e+00> : vector<8x16xf32>
    %779 = tpu.matmul %778, %16, %cst_209 {dimension_numbers = #tpu.dot_dimension_numbers<[1], [0], [0], [1], [0, 0, 1, 1], [], []>} : vector<8x128xbf16>, vector<128x16xbf16>, vector<8x16xf32> -> vector<8x16xf32>
    %780 = arith.truncf %779 : vector<8x16xf32> to vector<8x16xbf16>
    %c6_210 = arith.constant 6 : index
    %c0_211 = arith.constant 0 : index
    %c0_212 = arith.constant 0 : index
    %781 = vector.load %arg2[%c6_210, %c0_211, %c0_212] : memref<8x8x16xbf16, #tpu.memory_space<vmem>>, vector<1x8x16xbf16>
    %782 = vector.shape_cast %781 : vector<1x8x16xbf16> to vector<8x16xbf16>
    %c6_213 = arith.constant 6 : index
    %783 = memref.load %arg0[%c6_213] : memref<8xi32, #tpu.memory_space<smem>>
    %c0_i32_214 = arith.constant 0 : i32
    %784 = arith.cmpi ne, %783, %c0_i32_214 : i32
    %785 = arith.select %784, %782, %780 : vector<8x16xbf16>
    %cst_215 = arith.constant dense<0.000000e+00> : vector<8x128xf32>
    %786 = tpu.matmul %785, %6, %cst_215 {dimension_numbers = #tpu.dot_dimension_numbers<[1], [0], [0], [1], [0, 0, 1, 1], [], []>} : vector<8x16xbf16>, vector<16x128xbf16>, vector<8x128xf32> -> vector<8x128xf32>
    %787 = arith.truncf %734 : vector<8x32xf32> to vector<8x32xbf16>
    %cst_216 = arith.constant dense<0.000000e+00> : vector<8x128xf32>
    %788 = tpu.matmul %787, %7, %cst_216 {dimension_numbers = #tpu.dot_dimension_numbers<[1], [0], [0], [1], [0, 0, 1, 1], [], []>} : vector<8x32xbf16>, vector<32x128xbf16>, vector<8x128xf32> -> vector<8x128xf32>
    %789 = arith.addf %786, %788 : vector<8x128xf32>
    %790 = arith.addf %789, %10 : vector<8x128xf32>
    %791 = arith.negf %790 : vector<8x128xf32>
    %792 = math.exp %791 : vector<8x128xf32>
    %cst_217 = arith.constant 1.000000e+00 : f32
    %793 = vector.broadcast %cst_217 : f32 to vector<8x128xf32>
    %794 = arith.addf %793, %792 : vector<8x128xf32>
    %795 = arith.divf %793, %794 : vector<8x128xf32>
    %796 = math.tanh %790 : vector<8x128xf32>
    %797 = vector.extract_strided_slice %795 {offsets = [0, 0], sizes = [8, 32], strides = [1, 1]} : vector<8x128xf32> to vector<8x32xf32>
    %798 = vector.extract_strided_slice %795 {offsets = [0, 32], sizes = [8, 32], strides = [1, 1]} : vector<8x128xf32> to vector<8x32xf32>
    %799 = vector.extract_strided_slice %796 {offsets = [0, 64], sizes = [8, 32], strides = [1, 1]} : vector<8x128xf32> to vector<8x32xf32>
    %800 = vector.extract_strided_slice %795 {offsets = [0, 96], sizes = [8, 32], strides = [1, 1]} : vector<8x128xf32> to vector<8x32xf32>
    %801 = arith.mulf %798, %732 : vector<8x32xf32>
    %802 = arith.mulf %797, %799 : vector<8x32xf32>
    %803 = arith.addf %801, %802 : vector<8x32xf32>
    %804 = math.tanh %803 : vector<8x32xf32>
    %805 = arith.mulf %800, %804 : vector<8x32xf32>
    %806 = arith.truncf %805 : vector<8x32xf32> to vector<8x32xbf16>
    %cst_218 = arith.constant dense<0.000000e+00> : vector<8x128xf32>
    %807 = tpu.matmul %806, %11, %cst_218 {dimension_numbers = #tpu.dot_dimension_numbers<[1], [0], [0], [1], [0, 0, 1, 1], [], []>} : vector<8x32xbf16>, vector<32x128xbf16>, vector<8x128xf32> -> vector<8x128xf32>
    %808 = arith.truncf %755 : vector<8x32xf32> to vector<8x32xbf16>
    %cst_219 = arith.constant dense<0.000000e+00> : vector<8x128xf32>
    %809 = tpu.matmul %808, %12, %cst_219 {dimension_numbers = #tpu.dot_dimension_numbers<[1], [0], [0], [1], [0, 0, 1, 1], [], []>} : vector<8x32xbf16>, vector<32x128xbf16>, vector<8x128xf32> -> vector<8x128xf32>
    %810 = arith.addf %807, %809 : vector<8x128xf32>
    %811 = arith.addf %810, %15 : vector<8x128xf32>
    %812 = arith.negf %811 : vector<8x128xf32>
    %813 = math.exp %812 : vector<8x128xf32>
    %cst_220 = arith.constant 1.000000e+00 : f32
    %814 = vector.broadcast %cst_220 : f32 to vector<8x128xf32>
    %815 = arith.addf %814, %813 : vector<8x128xf32>
    %816 = arith.divf %814, %815 : vector<8x128xf32>
    %817 = math.tanh %811 : vector<8x128xf32>
    %818 = vector.extract_strided_slice %816 {offsets = [0, 0], sizes = [8, 32], strides = [1, 1]} : vector<8x128xf32> to vector<8x32xf32>
    %819 = vector.extract_strided_slice %816 {offsets = [0, 32], sizes = [8, 32], strides = [1, 1]} : vector<8x128xf32> to vector<8x32xf32>
    %820 = vector.extract_strided_slice %817 {offsets = [0, 64], sizes = [8, 32], strides = [1, 1]} : vector<8x128xf32> to vector<8x32xf32>
    %821 = vector.extract_strided_slice %816 {offsets = [0, 96], sizes = [8, 32], strides = [1, 1]} : vector<8x128xf32> to vector<8x32xf32>
    %822 = arith.mulf %819, %753 : vector<8x32xf32>
    %823 = arith.mulf %818, %820 : vector<8x32xf32>
    %824 = arith.addf %822, %823 : vector<8x32xf32>
    %825 = math.tanh %824 : vector<8x32xf32>
    %826 = arith.mulf %821, %825 : vector<8x32xf32>
    %827 = arith.truncf %826 : vector<8x32xf32> to vector<8x32xbf16>
    %cst_221 = arith.constant dense<0.000000e+00> : vector<8x128xf32>
    %828 = tpu.matmul %827, %17, %cst_221 {dimension_numbers = #tpu.dot_dimension_numbers<[1], [0], [0], [1], [0, 0, 1, 1], [], []>} : vector<8x32xbf16>, vector<32x128xbf16>, vector<8x128xf32> -> vector<8x128xf32>
    %829 = arith.addf %828, %20 : vector<8x128xf32>
    %c7_222 = arith.constant 7 : index
    %c0_223 = arith.constant 0 : index
    %c0_224 = arith.constant 0 : index
    %830 = vector.load %arg16[%c7_222, %c0_223, %c0_224] : memref<8x8x128xf32, #tpu.memory_space<vmem>>, vector<1x8x128xf32>
    %831 = vector.shape_cast %830 : vector<1x8x128xf32> to vector<8x128xf32>
    %832 = vector.shape_cast %829 : vector<8x128xf32> to vector<1x8x128xf32>
    tpu.vector_store %arg16[%c7_222, %c0_223, %c0_224], %832 {strides = array<i32>} : memref<8x8x128xf32, #tpu.memory_space<vmem>>, vector<1x8x128xf32>,
    return
  }
}

</mosaic_0001>

<bundles_post_ra>
// kernel: tpu_custom_call.1
= control target key start
LH: loop header
LB: loop body
LE: loop exit
PB: predicated region body
PF: predicated region fallthrough
CT: control target
= control target key end

     0   :  { %s4493_s0 = inlined_call_operand.hbm [shape: s32[8], index: 0, kind: input, shape index: {}]   ;;  %s4494_s1 = inlined_call_operand.vmem [shape: f32[8,8,128], index: 1, kind: input, shape index: {}]   ;;  %s4495_s2 = inlined_call_operand.hbm [shape: bf16[8,8,16], index: 2, kind: input, shape index: {}]   ;;  %s4496_s3 = inlined_call_operand.hbm [shape: bf16[32,128], index: 3, kind: input, shape index: {}]   ;;  %s4497_s4 = inlined_call_operand.hbm [shape: bf16[32,128], index: 4, kind: input, shape index: {}]   ;;  %s4498_s5 = inlined_call_operand.hbm [shape: bf16[32,128], index: 5, kind: input, shape index: {}]   ;;  %s4499_s6 = inlined_call_operand.vmem [shape: f32[1,128], index: 6, kind: input, shape index: {}]   ;;  %s4500_s7 = inlined_call_operand.vmem [shape: bf16[16,128], index: 7, kind: input, shape index: {}]   ;;  %s4501_s8 = inlined_call_operand.hbm [shape: bf16[32,128], index: 8, kind: input, shape index: {}]   ;;  %s4502_s9 = inlined_call_operand.vmem [shape: f32[1,128], index: 9, kind: input, shape index: {}]   ;;  %s4503_s10 = inlined_call_operand.hbm [shape: bf16[32,128], index: 10, kind: input, shape index: {}]   ;;  %s4504_s11 = inlined_call_operand.hbm [shape: bf16[32,128], index: 11, kind: input, shape index: {}]   ;;  %s4505_s12 = inlined_call_operand.vmem [shape: f32[1,128], index: 12, kind: input, shape index: {}]   ;;  %s4506_s13 = inlined_call_operand.vmem [shape: bf16[128,16], index: 13, kind: input, shape index: {}]   ;;  %s4507_s14 = inlined_call_operand.hbm [shape: bf16[32,128], index: 14, kind: input, shape index: {}]   ;;  %s4508_s15 = inlined_call_operand.vmem [shape: f32[1,128], index: 15, kind: input, shape index: {}]   ;;  %s4509_s16 = inlined_call_operand.hbm [shape: f32[8,8,128], index: 16, kind: output, shape index: {}]  }
   0x1   :  { %4510 = sst [smem:[#allocation26_spill]] %s4493_s0 }
   0x2   :  { %21 = vsyncpa [#allocation5], 0 }
   0x3   :  { %22 = vsyncpa [#allocation3], 0 }
   0x4   :  { %23 = vsyncpa [#allocation8], 0 }
   0x5   :  { %24 = vsyncpa [#allocation11], 0 }
   0x6   :  { %25 = vsyncpa [#allocation14], 0 }
   0x7   :  { %26 = vsyncpa [#allocation17], 0 }
   0x8   :  { %27 = vsyncpa [#allocation4], 0  ;;  %s56_s23 = sshll.u32 %s4496_s3, 4  ;;  %s3622_s24 = smov [#allocation7]   ;;  %s57_s23 = int_to_ptr.hbm [resolvable:$true] %s56_s23 }
   0x9   :  { %s58_s25 = sshll.u32 %s3622_s24, 4  ;;  %s82_s28 = sshll.u32 %s4498_s5, 4  ;;  %s59_s25 = int_to_ptr.vmem [resolvable:$true] %s58_s25  ;;  %s83_s28 = int_to_ptr.hbm [resolvable:$true] %s82_s28 }
   0xa   :  { %s3623_s29 = smov 64   ;;  %s3624_s30 = smov 4  }
   0xb   :  { %64 = dma.hbm_to_vmem [thread:$0]  %s57_s23, 256, %s59_s25, [#allocation8], %s3623_s29, %s3623_s29, %s3624_s30  }
   0xc   :  { %s3625_s0 = smov [#allocation10]   ;;  %s114_s3 = sshll.u32 %s4503_s10, 4  ;;  %s115_s3 = int_to_ptr.hbm [resolvable:$true] %s114_s3 }
   0xd   :  { %s84_s17 = sshll.u32 %s3625_s0, 4  ;;  %s4511_s21 = sld [smem:[#allocation26_spill]]  ;;  %s85_s17 = int_to_ptr.vmem [resolvable:$true] %s84_s17 }
   0xe   :  { %90 = dma.hbm_to_vmem [thread:$0]  %s83_s28, 256, %s85_s17, [#allocation11], %s3623_s29, %s3623_s29, %s3624_s30  }
   0xf   :  { %s3626_s24 = smov [#allocation13]   ;;  %s3627_s23 = smov [#allocation2]  }
  0x10   :  { %s116_s26 = sshll.u32 %s3626_s24, 4  ;;  %s43_s27 = sshll.u32 %s4495_s2, 4  ;;  %s117_s26 = int_to_ptr.vmem [resolvable:$true] %s116_s26  ;;  %s44_s27 = int_to_ptr.hbm [resolvable:$true] %s43_s27 }
  0x11   :  { %122 = dma.hbm_to_vmem [thread:$0]  %s115_s3, 256, %s117_s26, [#allocation14], %s3623_s29, %s3623_s29, %s3624_s30  }
  0x12   :  { %s3628_s28 = smov [#allocation6]   ;;  %s69_s19 = sshll.u32 %s4497_s4, 4  ;;  %s70_s19 = int_to_ptr.hbm [resolvable:$true] %s69_s19 }
  0x13   :  { %s33_s22 = sshll.u32 %s4511_s21, 4  ;;  %s45_s0 = sshll.u32 %s3628_s28, 4  ;;  %s34_s22 = int_to_ptr.hbm [resolvable:$true] %s33_s22  ;;  %s46_s0 = int_to_ptr.vmem [resolvable:$true] %s45_s0 }
  0x14   :  { %36 = dma.hbm_to_smem %s34_s22, 16, %s3627_s23, [#allocation5]  }
  0x15   :  { %51 = dma.hbm_to_vmem [thread:$0]  %s44_s27, 512, %s46_s0, [#allocation3], %s3623_s29, %s3623_s29, %s3624_s30  }
  0x16   :  { %s3629_s3 = smov [#allocation9]   ;;  %s99_s22 = sshll.u32 %s4501_s8, 4  ;;  %s100_s22 = int_to_ptr.hbm [resolvable:$true] %s99_s22 }
  0x17   :  { %s71_s5 = sshll.u32 %s3629_s3, 4  ;;  %s127_s4 = sshll.u32 %s4504_s11, 4  ;;  %s72_s5 = int_to_ptr.vmem [resolvable:$true] %s71_s5  ;;  %s128_s4 = int_to_ptr.hbm [resolvable:$true] %s127_s4 }
  0x18   :  { %77 = dma.hbm_to_vmem [thread:$0]  %s70_s19, 256, %s72_s5, [#allocation8], %s3623_s29, %s3623_s29, %s3624_s30  }
  0x19   :  { %s3630_s26 = smov [#allocation12]   ;;  %s3631_s10 = smov [#allocation15]  }
  0x1a   :  { %s101_s23 = sshll.u32 %s3630_s26, 4  ;;  %s129_s8 = sshll.u32 %s3631_s10, 4  ;;  %s102_s23 = int_to_ptr.vmem [resolvable:$true] %s101_s23  ;;  %s130_s8 = int_to_ptr.vmem [resolvable:$true] %s129_s8 }
  0x1b   :  { %107 = dma.hbm_to_vmem [thread:$0]  %s100_s22, 256, %s102_s23, [#allocation11], %s3623_s29, %s3623_s29, %s3624_s30  }
  0x1c   :  { %s144_s28 = sshll.u32 %s4507_s14, 4  ;;  %s3632_s11 = smov [#allocation16]   ;;  %s145_s28 = int_to_ptr.hbm [resolvable:$true] %s144_s28 }
  0x1d   :  { %135 = dma.hbm_to_vmem [thread:$0]  %s128_s4, 256, %s130_s8, [#allocation14], %s3623_s29, %s3623_s29, %s3624_s30  }
  0x1e   :  { %s146_s0 = sshll.u32 %s3632_s11, 4  ;;  %s147_s0 = int_to_ptr.vmem [resolvable:$true] %s146_s0 }
  0x1f   :  { %152 = dma.hbm_to_vmem [thread:$0]  %s145_s28, 256, %s147_s0, [#allocation17], %s3623_s29, %s3623_s29, %s3624_s30  }
  0x20   :  { %3608 = dma.done.wait [#allocation5], 16  }
  0x21   :  { %3609 = vsyncadd [#allocation5], 4294967280 }
  0x22   :  { %3610 = dma.done.wait [#allocation3], 512  }
  0x23   :  { %3611 = vsyncadd [#allocation3], 4294966784 }
  0x24   :  { %3612 = dma.done.wait [#allocation8], 512  }
  0x25   :  { %3613 = vsyncadd [#allocation8], 4294966784 }
  0x26   :  { %3614 = dma.done.wait [#allocation11], 512  }
  0x27   :  { %3615 = vsyncadd [#allocation11], 4294966784 }
  0x28   :  { %3616 = dma.done.wait [#allocation14], 512  }
  0x29   :  { %3617 = vsyncadd [#allocation14], 4294966784 }
  0x2a   :  { %3618 = dma.done.wait [#allocation17], 256  }
  0x2b   :  { %3619 = vsyncadd [#allocation17], 4294967040 }
  0x2c   :  { %191 = sfence }
  0x2d   :  { %v3776_v0 = vld [vmem:[#allocation7 + $0x8] sm:$0xff]  ;;  %v3779_v1 = vld [vmem:[#allocation7] sm:$0xff]  ;;  %v3633_v2 = vmov 0   ;;  %s3634_s17 = smov 32   ;;  %v3795_v28 = vld [vmem:[#allocation9 + $0x8] sm:$0xff]  ;;  %vm268_vm4 = vcmask 261120  }
  0x2e   :  { %278 = vmatpush.bf16.msra.mxu0 %v3776_v0  ;;  %426 = vmatpush.bf16.msra.mxu3 %v3776_v0  ;;  %v255_v3 = vld [vmem:[%s4494_s1] sm:$0xff]  ;;  %v3793_v27 = vld [vmem:[#allocation10 + $0x8] sm:$0xff]  ;;  %v3801_v30 = vld [vmem:[#allocation9] sm:$0xff]  ;;  %s3022_s14 = sld [smem:[#allocation2 + $0x2]]  ;;  %s2846_s22 = sshll.u32 %s4509_s16, 4  ;;  %s2847_s22 = int_to_ptr.hbm [resolvable:$true] %s2846_s22 }
  0x2f   :  { %342 = vmatpush.bf16.msra.mxu1 %v3793_v27  ;;  %373 = vmatpush.bf16.msra.mxu2 %v3795_v28  ;;  %v3799_v29 = vld [vmem:[#allocation10] sm:$0xff]  ;;  %v2891_v42 = vld [vmem:[%s4494_s1 + $0x8] sm:$0xff]  ;;  %s3033_s18 = sld [smem:[#allocation2 + $0x3]]  ;;  %s3639_s2 = smov 8  }
  0x30   :  { %v3827_v37 = vld [vmem:[%s4499_s6] ss:$0 sm:$0xff]  ;;  %s3066_s3 = sld [smem:[#allocation2 + $0x6]] }
  0x32   :  { %279 = vmatpush.bf16.msra.mxu0 %v3779_v1  ;;  %427 = vmatpush.bf16.msra.mxu3 %v3779_v1 }
  0x33   :  { %343 = vmatpush.bf16.msra.mxu1 %v3799_v29  ;;  %374 = vmatpush.bf16.msra.mxu2 %v3801_v30 }
  0x34   :  { %p1855_p1 = scmp.ne.s32.totalorder %s3022_s14, 0 }
  0x35   :  { %280 = vmatmul.bf16.vlgmr.msra.gmra.mxu0 %v3633_v2  ;;  %p2060_p2 = scmp.ne.s32.totalorder %s3033_s18, 0 }
  0x36   :  { %485 = vmatpush.bf16.msrb.mxu0 %v3793_v27  ;;  %616 = vmatpush.bf16.msrb.mxu3 %v3793_v27  ;;  %s1856_s30 = scalar_select %p1855_p1, 1, 0 }
  0x37   :  { %557 = vmatpush.bf16.msrb.mxu2 %v3776_v0  ;;  %504 = vmatpush.bf16.msrb.mxu1 %v3795_v28  ;;  %s2061_s19 = scalar_select %p2060_p2, 1, 0 }
  0x38   :  { %344 = vmatmul.bf16.vlgmr.msra.gmra.mxu1 %v3633_v2  ;;  %p2675_p5 = scmp.ne.s32.totalorder %s3066_s3, 0 }
  0x3a   :  { %486 = vmatpush.bf16.msrb.mxu0 %v3799_v29  ;;  %617 = vmatpush.bf16.msrb.mxu3 %v3799_v29  ;;  %s2676_s5 = scalar_select %p2675_p5, 1, 0 }
  0x3b   :  { %558 = vmatpush.bf16.msrb.mxu2 %v3779_v1  ;;  %505 = vmatpush.bf16.msrb.mxu1 %v3801_v30 }
  0x3e   :  { %635 = vmatpush.bf16.msra.mxu0 %v3795_v28 }
  0x3f   :  { %688 = vmatpush.bf16.msra.mxu1 %v3776_v0 }
  0x42   :  { %636 = vmatpush.bf16.msra.mxu0 %v3801_v30 }
  0x43   :  { %689 = vmatpush.bf16.msra.mxu1 %v3779_v1 }
  0xb2   :  { %v281_v4 = vpop.f32.mrf.mxu0 }
  0xb3   :  { %v285_v5 = vadd.f32 %v281_v4, %v255_v3 }
  0xb5   :  { %3119 = vtanh.f32 %v285_v5  ;;  %v2872_v8 = vmul.f32 -1.442695, %v285_v5  ;;  %v345_v34 = vpop.f32.mrf.mxu1 }
  0xb7   :  { %3121 = vpow2.f32 %v2872_v8 }
  0xba   :  { %v283_v6 = vpop.f32.mrf.mxu0 }
  0xbb   :  { %v3120_v7 = vpop.eup %3119 }
  0xbc   :  { %308 = vrot.lane.b32.xlu0 %v3120_v7, %s3623_s29 }
  0xbd   :  { %v3122_v9 = vpop.eup %3121  ;;  %v347_v35 = vpop.f32.mrf.mxu1 }
  0xbe   :  { %v289_v10 = vadd.f32 1.0, %v3122_v9 }
  0xc0   :  { %3123 = vrcp.f32 %v289_v10  ;;  %v301_v16 = vand.u32 2147483648, %v289_v10  ;;  %vm295_vm1 = vweird.f32 %v289_v10  ;;  %v299_v17 = vand.u32 2147483647, %v289_v10 }
  0xc2   :  { %v302_v19 = vor.u32 1.1754944e-38, %v301_v16  ;;  %vm300_vm3 = vcmp.eq.f32.partialorder %v299_v17, 8.507059e+37 }
  0xc6   :  { %v3124_v11 = vpop.eup %3123 }
  0xc7   :  { %v291_v12 = vmul.f32 %v3124_v11, %v289_v10  ;;  %vm296_vm0 = vweird.f32 %v3124_v11 }
  0xc8   :  { %vm297_vm2 = vmor %vm295_vm1, %vm296_vm0 }
  0xc9   :  { %v292_v13 = vsub.f32 1.0, %v291_v12 }
  0xcb   :  { %v293_v14 = vmul.f32 %v3124_v11, %v292_v13 }
  0xcd   :  { %v294_v15 = vadd.f32 %v3124_v11, %v293_v14 }
  0xcf   :  { %v298_v18 = vsel %vm297_vm2, %v3124_v11, %v294_v15 }
  0xd0   :  { %v303_v21 = vsel %vm300_vm3, %v302_v19, %v298_v18 }
  0xd1   :  { %v306_v23 = vmul.f32 0.0, %v303_v21 }
 0x12e   :  { %v309_v20 = vpop.permute.xlu0 %308 }
 0x12f   :  { %v311_v22 = vmul.f32 %v309_v20, %v303_v21 }
 0x131   :  { %313 = vrot.lane.b32.xlu0 %v311_v22, %s3634_s17 }
 0x1a3   :  { %v314_v24 = vpop.permute.xlu0 %313 }
 0x1a4   :  { %v3789_v25 = vadd.f32 %v314_v24, %v306_v23 }
 0x1a6   :  { %3125 = vtanh.f32 %v3789_v25 }
 0x1ac   :  { %v3126_v26 = vpop.eup %3125 }
 0x1ad   :  { %319 = vrot.lane.b32.xlu1 %v3126_v26, %s3623_s29 }
 0x21f   :  { %v320_v31 = vpop.permute.xlu1 %319 }
 0x220   :  { %v322_v32 = vmul.f32 %v320_v31, %v303_v21 }
 0x222   :  { %v323_v33 = vpack.c.bf16 %v322_v32, %v322_v32 }
 0x224   :  { %350 = vrot.lane.b32.xlu1 %v323_v33, %s3634_s17 }
 0x296   :  { %v351_v36 = vpop.permute.xlu1 %350 }
 0x297   :  { %2889 = vmatmul.msk.bf16.vlgmr.msra.gmra.mxu2 %vm268_vm4, %v351_v36  ;;  %2892 = vmatmul.msk.bf16.vlgmr.msra.gmra.mxu3 %vm268_vm4, %v351_v36 }
 0x298   :  { %747 = vmatpush.bf16.msra.mxu2 %v3793_v27  ;;  %766 = vmatpush.bf16.msra.mxu3 %v3795_v28 }
 0x29c   :  { %748 = vmatpush.bf16.msra.mxu2 %v3799_v29  ;;  %767 = vmatpush.bf16.msra.mxu3 %v3801_v30 }
 0x31a   :  { %v376_v38 = vpop.f32.mrf.mxu2  ;;  %v429_v39 = vpop.f32.mrf.mxu3 }
 0x31b   :  { %v377_v40 = vadd.f32 %v376_v38, %v345_v34  ;;  %v433_v45 = vadd.f32 %v2891_v42, %v429_v39  ;;  %v2897_v42 = vld [vmem:[%s4494_s1 + $0x10] sm:$0xff] }
 0x31d   :  { %v380_v41 = vadd.f32 %v3827_v37, %v377_v40  ;;  %v2893_v49 = vmul.f32 -1.442695, %v433_v45 }
 0x31f   :  { %3127 = vtanh.f32 %v380_v41  ;;  %v2890_v48 = vmul.f32 -1.442695, %v380_v41 }
 0x320   :  { %3129 = vtanh.f32 %v433_v45 }
 0x321   :  { %3131 = vpow2.f32 %v2890_v48 }
 0x322   :  { %v378_v43 = vpop.f32.mrf.mxu2  ;;  %v431_v44 = vpop.f32.mrf.mxu3  ;;  %3133 = vpow2.f32 %v2893_v49 }
 0x325   :  { %v3128_v46 = vpop.eup %3127 }
 0x326   :  { %403 = vrot.lane.b32.xlu2 %v3128_v46, %s3623_s29  ;;  %v3130_v47 = vpop.eup %3129 }
 0x327   :  { %v3132_v50 = vpop.eup %3131 }
 0x328   :  { %v384_v51 = vadd.f32 1.0, %v3132_v50  ;;  %v3134_v52 = vpop.eup %3133 }
 0x329   :  { %v437_v53 = vadd.f32 1.0, %v3134_v52 }
 0x32a   :  { %3135 = vrcp.f32 %v384_v51  ;;  %v396_v62 = vand.u32 2147483648, %v384_v51  ;;  %vm390_vm6 = vweird.f32 %v384_v51  ;;  %v394_v63 = vand.u32 2147483647, %v384_v51 }
 0x32b   :  { %3137 = vrcp.f32 %v437_v53  ;;  %v449_v9 = vand.u32 2147483648, %v437_v53  ;;  %vm443_vm10 = vweird.f32 %v437_v53  ;;  %v447_v10 = vand.u32 2147483647, %v437_v53 }
 0x32c   :  { %v397_v4 = vor.u32 1.1754944e-38, %v396_v62  ;;  %vm395_vm8 = vcmp.eq.f32.partialorder %v394_v63, 8.507059e+37 }
 0x32d   :  { %v450_v12 = vor.u32 1.1754944e-38, %v449_v9  ;;  %vm448_vm12 = vcmp.eq.f32.partialorder %v447_v10, 8.507059e+37 }
 0x32e   :  { %456 = vrot.lane.b32.xlu2 %v3130_v47, %s3623_s29 }
 0x330   :  { %v3136_v54 = vpop.eup %3135 }
 0x331   :  { %v386_v55 = vmul.f32 %v3136_v54, %v384_v51  ;;  %v3138_v57 = vpop.eup %3137  ;;  %vm391_vm5 = vweird.f32 %v3136_v54 }
 0x332   :  { %v439_v59 = vmul.f32 %v3138_v57, %v437_v53  ;;  %vm392_vm7 = vmor %vm390_vm6, %vm391_vm5  ;;  %vm444_vm9 = vweird.f32 %v3138_v57 }
 0x333   :  { %v387_v56 = vsub.f32 1.0, %v386_v55  ;;  %vm445_vm11 = vmor %vm443_vm10, %vm444_vm9 }
 0x334   :  { %v440_v61 = vsub.f32 1.0, %v439_v59 }
 0x335   :  { %v388_v58 = vmul.f32 %v3136_v54, %v387_v56 }
 0x336   :  { %v441_v3 = vmul.f32 %v3138_v57, %v440_v61 }
 0x337   :  { %v389_v60 = vadd.f32 %v3136_v54, %v388_v58 }
 0x338   :  { %v442_v8 = vadd.f32 %v3138_v57, %v441_v3 }
 0x339   :  { %v393_v2 = vsel %vm392_vm7, %v3136_v54, %v389_v60 }
 0x33a   :  { %v398_v6 = vsel %vm395_vm8, %v397_v4, %v393_v2  ;;  %v446_v11 = vsel %vm445_vm11, %v3138_v57, %v442_v8 }
 0x33b   :  { %v451_v13 = vsel %vm448_vm12, %v450_v12, %v446_v11  ;;  %v401_v16 = vmul.f32 0.0, %v398_v6 }
 0x33c   :  { %v454_v19 = vmul.f32 %v451_v13, %v3789_v25 }
 0x380   :  { %v404_v5 = vpop.permute.xlu2 %403 }
 0x381   :  { %v406_v7 = vmul.f32 %v404_v5, %v398_v6 }
 0x383   :  { %408 = vrot.lane.b32.xlu0 %v406_v7, %s3634_s17 }
 0x388   :  { %v457_v14 = vpop.permute.xlu2 %456 }
 0x389   :  { %v459_v15 = vmul.f32 %v457_v14, %v451_v13 }
 0x38b   :  { %461 = vrot.lane.b32.xlu1 %v459_v15, %s3634_s17 }
 0x3f5   :  { %v409_v17 = vpop.permute.xlu0 %408 }
 0x3f6   :  { %v3837_v18 = vadd.f32 %v409_v17, %v401_v16 }
 0x3f8   :  { %3139 = vtanh.f32 %v3837_v18 }
 0x3fd   :  { %v462_v20 = vpop.permute.xlu1 %461 }
 0x3fe   :  { %v3140_v21 = vpop.eup %3139  ;;  %v3841_v22 = vadd.f32 %v462_v20, %v454_v19 }
 0x3ff   :  { %414 = vrot.lane.b32.xlu2 %v3140_v21, %s3623_s29 }
 0x400   :  { %3141 = vtanh.f32 %v3841_v22 }
 0x406   :  { %v3142_v23 = vpop.eup %3141 }
 0x407   :  { %467 = vrot.lane.b32.xlu0 %v3142_v23, %s3623_s29 }
 0x459   :  { %v415_v24 = vpop.permute.xlu2 %414 }
 0x45a   :  { %v417_v26 = vmul.f32 %v415_v24, %v398_v6 }
 0x45c   :  { %v472_v31 = vpack.c.bf16 %v417_v26, %v417_v26 }
 0x45e   :  { %474 = vrot.lane.b32.xlu1 %v472_v31, %s3634_s17 }
 0x479   :  { %v468_v32 = vpop.permute.xlu0 %467 }
 0x47a   :  { %v470_v33 = vmul.f32 %v468_v32, %v451_v13 }
 0x47c   :  { %v471_v34 = vpack.c.bf16 %v470_v33, %v470_v33 }
 0x47e   :  { %493 = vrot.lane.b32.xlu2 %v471_v34, %s3634_s17 }
 0x4d0   :  { %v475_v25 = vpop.permute.xlu1 %474 }
 0x4d1   :  { %2894 = vmatmul.msk.bf16.vlgmr.msrb.gmra.mxu0 %vm268_vm4, %v475_v25 }
 0x4d2   :  { %819 = vmatpush.bf16.msrb.mxu0 %v3776_v0 }
 0x4d6   :  { %820 = vmatpush.bf16.msrb.mxu0 %v3779_v1 }
 0x4d8   :  { %v494_v35 = vpop.permute.xlu2 %493 }
 0x4d9   :  { %2895 = vmatmul.msk.bf16.vlgmr.msrb.gmra.mxu1 %vm268_vm4, %v494_v35  ;;  %2898 = vmatmul.msk.bf16.vlgmr.msrb.gmra.mxu2 %vm268_vm4, %v494_v35 }
 0x4da   :  { %878 = vmatpush.bf16.msrb.mxu1 %v3793_v27  ;;  %897 = vmatpush.bf16.msrb.mxu2 %v3795_v28 }
 0x4de   :  { %879 = vmatpush.bf16.msrb.mxu1 %v3799_v29  ;;  %898 = vmatpush.bf16.msrb.mxu2 %v3801_v30 }
 0x54e   :  { %v488_v36 = vpop.f32.mrf.mxu0 }
 0x556   :  { %v490_v38 = vpop.f32.mrf.mxu0  ;;  %v507_v39 = vpop.f32.mrf.mxu1 }
 0x557   :  { %v508_v40 = vadd.f32 %v507_v39, %v488_v36  ;;  %v2903_v38 = vld [vmem:[%s4494_s1 + $0x18] sm:$0xff] }
 0x559   :  { %v511_v41 = vadd.f32 %v3827_v37, %v508_v40 }
 0x55b   :  { %3143 = vtanh.f32 %v511_v41  ;;  %v2896_v49 = vmul.f32 -1.442695, %v511_v41 }
 0x55c   :  { %v560_v43 = vpop.f32.mrf.mxu2 }
 0x55d   :  { %v564_v44 = vadd.f32 %v2897_v42, %v560_v43 }
 0x55e   :  { %v509_v45 = vpop.f32.mrf.mxu1 }
 0x55f   :  { %3145 = vtanh.f32 %v564_v44  ;;  %v2899_v50 = vmul.f32 -1.442695, %v564_v44 }
 0x560   :  { %3147 = vpow2.f32 %v2896_v49 }
 0x561   :  { %v3144_v46 = vpop.eup %3143  ;;  %3149 = vpow2.f32 %v2899_v50 }
 0x562   :  { %534 = vrot.lane.b32.xlu0 %v3144_v46, %s3623_s29 }
 0x564   :  { %v562_v47 = vpop.f32.mrf.mxu2 }
 0x565   :  { %v3146_v48 = vpop.eup %3145 }
 0x566   :  { %587 = vrot.lane.b32.xlu1 %v3146_v48, %s3623_s29  ;;  %v3148_v51 = vpop.eup %3147 }
 0x567   :  { %v515_v52 = vadd.f32 1.0, %v3148_v51  ;;  %v3150_v53 = vpop.eup %3149 }
 0x568   :  { %v568_v54 = vadd.f32 1.0, %v3150_v53 }
 0x569   :  { %3151 = vrcp.f32 %v515_v52  ;;  %v527_v2 = vand.u32 2147483648, %v515_v52  ;;  %vm521_vm14 = vweird.f32 %v515_v52  ;;  %v525_v3 = vand.u32 2147483647, %v515_v52 }
 0x56a   :  { %3153 = vrcp.f32 %v568_v54  ;;  %v580_v7 = vand.u32 2147483648, %v568_v54  ;;  %vm574_vm2 = vweird.f32 %v568_v54  ;;  %v578_v8 = vand.u32 2147483647, %v568_v54 }
 0x56b   :  { %v528_v6 = vor.u32 1.1754944e-38, %v527_v2  ;;  %vm526_vm1 = vcmp.eq.f32.partialorder %v525_v3, 8.507059e+37 }
 0x56c   :  { %v581_v13 = vor.u32 1.1754944e-38, %v580_v7  ;;  %vm579_vm5 = vcmp.eq.f32.partialorder %v578_v8, 8.507059e+37 }
 0x56f   :  { %v3152_v55 = vpop.eup %3151 }
 0x570   :  { %v517_v56 = vmul.f32 %v3152_v55, %v515_v52  ;;  %v3154_v57 = vpop.eup %3153  ;;  %vm522_vm13 = vweird.f32 %v3152_v55 }
 0x571   :  { %v570_v59 = vmul.f32 %v3154_v57, %v568_v54  ;;  %vm523_vm15 = vmor %vm521_vm14, %vm522_vm13  ;;  %vm575_vm0 = vweird.f32 %v3154_v57 }
 0x572   :  { %v518_v58 = vsub.f32 1.0, %v517_v56  ;;  %vm576_vm3 = vmor %vm574_vm2, %vm575_vm0 }
 0x573   :  { %v571_v61 = vsub.f32 1.0, %v570_v59 }
 0x574   :  { %v519_v60 = vmul.f32 %v3152_v55, %v518_v58 }
 0x575   :  { %v572_v63 = vmul.f32 %v3154_v57, %v571_v61 }
 0x576   :  { %v520_v62 = vadd.f32 %v3152_v55, %v519_v60 }
 0x577   :  { %v573_v5 = vadd.f32 %v3154_v57, %v572_v63 }
 0x578   :  { %v524_v4 = vsel %vm523_vm15, %v3152_v55, %v520_v62 }
 0x579   :  { %v529_v10 = vsel %vm526_vm1, %v528_v6, %v524_v4  ;;  %v577_v12 = vsel %vm576_vm3, %v3154_v57, %v573_v5 }
 0x57a   :  { %v582_v15 = vsel %vm579_vm5, %v581_v13, %v577_v12  ;;  %v532_v17 = vmul.f32 %v529_v10, %v3837_v18 }
 0x57b   :  { %v585_v23 = vmul.f32 %v582_v15, %v3841_v22 }
 0x5d4   :  { %v535_v9 = vpop.permute.xlu0 %534 }
 0x5d5   :  { %v537_v11 = vmul.f32 %v535_v9, %v529_v10 }
 0x5d7   :  { %539 = vrot.lane.b32.xlu2 %v537_v11, %s3634_s17 }
 0x5d8   :  { %v588_v14 = vpop.permute.xlu1 %587 }
 0x5d9   :  { %v590_v16 = vmul.f32 %v588_v14, %v582_v15 }
 0x5db   :  { %592 = vrot.lane.b32.xlu0 %v590_v16, %s3634_s17 }
 0x631   :  { %v540_v19 = vpop.permute.xlu2 %539 }
 0x632   :  { %v3866_v20 = vadd.f32 %v540_v19, %v532_v17 }
 0x634   :  { %3155 = vtanh.f32 %v3866_v20 }
 0x63a   :  { %v3156_v21 = vpop.eup %3155 }
 0x63b   :  { %545 = vrot.lane.b32.xlu1 %v3156_v21, %s3623_s29 }
 0x64d   :  { %v593_v24 = vpop.permute.xlu0 %592 }
 0x64e   :  { %v3871_v26 = vadd.f32 %v593_v24, %v585_v23 }
 0x650   :  { %3157 = vtanh.f32 %v3871_v26 }
 0x656   :  { %v3158_v31 = vpop.eup %3157 }
 0x657   :  { %598 = vrot.lane.b32.xlu2 %v3158_v31, %s3623_s29 }
 0x6ad   :  { %v546_v32 = vpop.permute.xlu1 %545 }
 0x6ae   :  { %v548_v18 = vmul.f32 %v546_v32, %v529_v10 }
 0x6b0   :  { %v603_v33 = vpack.c.bf16 %v548_v18, %v548_v18 }
 0x6b1   :  { %v599_v34 = vpop.permute.xlu2 %598 }
 0x6b2   :  { %v601_v25 = vmul.f32 %v599_v34, %v582_v15  ;;  %605 = vrot.lane.b32.xlu0 %v603_v33, %s3634_s17 }
 0x6b4   :  { %v602_v35 = vpack.c.bf16 %v601_v25, %v601_v25 }
 0x6b6   :  { %624 = vrot.lane.b32.xlu1 %v602_v35, %s3634_s17 }
 0x724   :  { %v606_v36 = vpop.permute.xlu0 %605 }
 0x725   :  { %2900 = vmatmul.msk.bf16.vlgmr.msrb.gmra.mxu3 %vm268_vm4, %v606_v36 }
 0x726   :  { %950 = vmatpush.bf16.msrb.mxu3 %v3776_v0 }
 0x728   :  { %v625_v22 = vpop.permute.xlu1 %624 }
 0x729   :  { %2901 = vmatmul.msk.bf16.vlgmr.msra.gmra.mxu0 %vm268_vm4, %v625_v22  ;;  %2904 = vmatmul.msk.bf16.vlgmr.msra.gmra.mxu1 %vm268_vm4, %v625_v22 }
 0x72a   :  { %951 = vmatpush.bf16.msrb.mxu3 %v3779_v1  ;;  %1028 = vmatpush.bf16.msra.mxu1 %v3795_v28 }
 0x72b   :  { %1009 = vmatpush.bf16.msra.mxu0 %v3793_v27 }
 0x72e   :  { %1029 = vmatpush.bf16.msra.mxu1 %v3801_v30 }
 0x72f   :  { %1010 = vmatpush.bf16.msra.mxu0 %v3799_v29 }
 0x7a6   :  { %v638_v39 = vpop.f32.mrf.mxu0  ;;  %v691_v40 = vpop.f32.mrf.mxu1 }
 0x7a7   :  { %v695_v41 = vadd.f32 %v2903_v38, %v691_v40 }
 0x7a8   :  { %v619_v42 = vpop.f32.mrf.mxu3 }
 0x7a9   :  { %3159 = vtanh.f32 %v695_v41  ;;  %v639_v43 = vadd.f32 %v638_v39, %v619_v42  ;;  %v2905_v53 = vmul.f32 -1.442695, %v695_v41  ;;  %v2909_v41 = vld [vmem:[%s4494_s1 + $0x20] sm:$0xff] }
 0x7ab   :  { %v642_v44 = vadd.f32 %v3827_v37, %v639_v43 }
 0x7ad   :  { %3161 = vtanh.f32 %v642_v44  ;;  %v2902_v50 = vmul.f32 -1.442695, %v642_v44 }
 0x7ae   :  { %v640_v45 = vpop.f32.mrf.mxu0  ;;  %v693_v46 = vpop.f32.mrf.mxu1 }
 0x7af   :  { %v3160_v47 = vpop.eup %3159  ;;  %3163 = vpow2.f32 %v2902_v50 }
 0x7b0   :  { %v621_v48 = vpop.f32.mrf.mxu3  ;;  %718 = vrot.lane.b32.xlu0 %v3160_v47, %s3623_s29 }
 0x7b3   :  { %v3162_v49 = vpop.eup %3161 }
 0x7b4   :  { %665 = vrot.lane.b32.xlu2 %v3162_v49, %s3623_s29 }
 0x7b5   :  { %v3164_v51 = vpop.eup %3163 }
 0x7b6   :  { %v646_v52 = vadd.f32 1.0, %v3164_v51 }
 0x7b8   :  { %3165 = vrcp.f32 %v646_v52  ;;  %v658_v61 = vand.u32 2147483648, %v646_v52  ;;  %vm652_vm7 = vweird.f32 %v646_v52  ;;  %v656_v62 = vand.u32 2147483647, %v646_v52 }
 0x7b9   :  { %3167 = vpow2.f32 %v2905_v53 }
 0x7ba   :  { %v659_v3 = vor.u32 1.1754944e-38, %v658_v61  ;;  %vm657_vm9 = vcmp.eq.f32.partialorder %v656_v62, 8.507059e+37 }
 0x7be   :  { %v3166_v54 = vpop.eup %3165 }
 0x7bf   :  { %v648_v55 = vmul.f32 %v3166_v54, %v646_v52  ;;  %v3168_v56 = vpop.eup %3167  ;;  %vm653_vm6 = vweird.f32 %v3166_v54 }
 0x7c0   :  { %v699_v58 = vadd.f32 1.0, %v3168_v56  ;;  %vm654_vm8 = vmor %vm652_vm7, %vm653_vm6 }
 0x7c1   :  { %v649_v57 = vsub.f32 1.0, %v648_v55 }
 0x7c2   :  { %3169 = vrcp.f32 %v699_v58  ;;  %v711_v11 = vand.u32 2147483648, %v699_v58  ;;  %vm705_vm11 = vweird.f32 %v699_v58  ;;  %v709_v12 = vand.u32 2147483647, %v699_v58 }
 0x7c3   :  { %v650_v59 = vmul.f32 %v3166_v54, %v649_v57 }
 0x7c4   :  { %v712_v14 = vor.u32 1.1754944e-38, %v711_v11  ;;  %vm710_vm13 = vcmp.eq.f32.partialorder %v709_v12, 8.507059e+37 }
 0x7c5   :  { %v651_v60 = vadd.f32 %v3166_v54, %v650_v59 }
 0x7c7   :  { %v655_v63 = vsel %vm654_vm8, %v3166_v54, %v651_v60 }
 0x7c8   :  { %v3170_v2 = vpop.eup %3169  ;;  %v660_v5 = vsel %vm657_vm9, %v659_v3, %v655_v63 }
 0x7c9   :  { %v701_v7 = vmul.f32 %v3170_v2, %v699_v58  ;;  %vm706_vm10 = vweird.f32 %v3170_v2  ;;  %v663_v24 = vmul.f32 %v660_v5, %v3866_v20 }
 0x7ca   :  { %vm707_vm12 = vmor %vm705_vm11, %vm706_vm10 }
 0x7cb   :  { %v702_v8 = vsub.f32 1.0, %v701_v7 }
 0x7cd   :  { %v703_v9 = vmul.f32 %v3170_v2, %v702_v8 }
 0x7cf   :  { %v704_v10 = vadd.f32 %v3170_v2, %v703_v9 }
 0x7d1   :  { %v708_v13 = vsel %vm707_vm12, %v3170_v2, %v704_v10 }
 0x7d2   :  { %v713_v16 = vsel %vm710_vm13, %v712_v14, %v708_v13 }
 0x7d3   :  { %v716_v19 = vmul.f32 %v713_v16, %v3871_v26 }
 0x80e   :  { %v666_v4 = vpop.permute.xlu2 %665 }
 0x80f   :  { %v668_v6 = vmul.f32 %v666_v4, %v660_v5 }
 0x811   :  { %670 = vrot.lane.b32.xlu1 %v668_v6, %s3634_s17 }
 0x822   :  { %v719_v15 = vpop.permute.xlu0 %718 }
 0x823   :  { %v721_v17 = vmul.f32 %v719_v15, %v713_v16 }
 0x825   :  { %723 = vrot.lane.b32.xlu2 %v721_v17, %s3634_s17 }
 0x87f   :  { %v724_v21 = vpop.permute.xlu2 %723 }
 0x880   :  { %v3895_v23 = vadd.f32 %v724_v21, %v716_v19 }
 0x882   :  { %3171 = vtanh.f32 %v3895_v23 }
 0x883   :  { %v671_v31 = vpop.permute.xlu1 %670 }
 0x884   :  { %v3899_v32 = vadd.f32 %v671_v31, %v663_v24 }
 0x886   :  { %3173 = vtanh.f32 %v3899_v32 }
 0x888   :  { %v3172_v18 = vpop.eup %3171 }
 0x889   :  { %729 = vrot.lane.b32.xlu1 %v3172_v18, %s3623_s29 }
 0x88c   :  { %v3174_v33 = vpop.eup %3173 }
 0x88d   :  { %676 = vrot.lane.b32.xlu0 %v3174_v33, %s3623_s29 }
 0x8fb   :  { %v730_v34 = vpop.permute.xlu1 %729 }
 0x8fc   :  { %v732_v26 = vmul.f32 %v730_v34, %v713_v16 }
 0x8fe   :  { %v733_v25 = vpack.c.bf16 %v732_v26, %v732_v26 }
 0x8ff   :  { %v677_v35 = vpop.permute.xlu0 %676 }
 0x900   :  { %v679_v36 = vmul.f32 %v677_v35, %v660_v5  ;;  %755 = vrot.lane.b32.xlu0 %v733_v25, %s3634_s17 }
 0x902   :  { %v734_v22 = vpack.c.bf16 %v679_v36, %v679_v36 }
 0x904   :  { %736 = vrot.lane.b32.xlu2 %v734_v22, %s3634_s17 }
 0x95e   :  { %v737_v20 = vpop.permute.xlu2 %736 }
 0x95f   :  { %2906 = vmatmul.msk.bf16.vlgmr.msra.gmra.mxu2 %vm268_vm4, %v737_v20 }
 0x960   :  { %1081 = vmatpush.bf16.msra.mxu2 %v3776_v0 }
 0x964   :  { %1082 = vmatpush.bf16.msra.mxu2 %v3779_v1 }
 0x972   :  { %v756_v38 = vpop.permute.xlu0 %755 }
 0x973   :  { %2907 = vmatmul.msk.bf16.vlgmr.msra.gmra.mxu3 %vm268_vm4, %v756_v38  ;;  %2910 = vmatmul.msk.bf16.vlgmr.msrb.gmra.mxu0 %vm268_vm4, %v756_v38 }
 0x974   :  { %1140 = vmatpush.bf16.msra.mxu3 %v3793_v27  ;;  %1159 = vmatpush.bf16.msrb.mxu0 %v3795_v28 }
 0x978   :  { %1141 = vmatpush.bf16.msra.mxu3 %v3799_v29  ;;  %1160 = vmatpush.bf16.msrb.mxu0 %v3801_v30 }
 0x9e2   :  { %v750_v39 = vpop.f32.mrf.mxu2 }
 0x9ea   :  { %v752_v40 = vpop.f32.mrf.mxu2 }
 0x9f0   :  { %v822_v42 = vpop.f32.mrf.mxu0 }
 0x9f1   :  { %v826_v43 = vadd.f32 %v2909_v41, %v822_v42 }
 0x9f3   :  { %3175 = vtanh.f32 %v826_v43  ;;  %v2911_v54 = vmul.f32 -1.442695, %v826_v43 }
 0x9f6   :  { %v769_v44 = vpop.f32.mrf.mxu3 }
 0x9f7   :  { %v770_v45 = vadd.f32 %v769_v44, %v750_v39 }
 0x9f8   :  { %v824_v46 = vpop.f32.mrf.mxu0 }
 0x9f9   :  { %v3176_v47 = vpop.eup %3175  ;;  %v773_v48 = vadd.f32 %v3827_v37, %v770_v45 }
 0x9fa   :  { %849 = vrot.lane.b32.xlu1 %v3176_v47, %s3623_s29 }
 0x9fb   :  { %3177 = vtanh.f32 %v773_v48  ;;  %v2908_v51 = vmul.f32 -1.442695, %v773_v48 }
 0x9fd   :  { %3179 = vpow2.f32 %v2908_v51 }
 0x9fe   :  { %v771_v49 = vpop.f32.mrf.mxu3 }
 0xa01   :  { %v3178_v50 = vpop.eup %3177 }
 0xa02   :  { %796 = vrot.lane.b32.xlu2 %v3178_v50, %s3623_s29 }
 0xa03   :  { %v3180_v52 = vpop.eup %3179 }
 0xa04   :  { %v777_v53 = vadd.f32 1.0, %v3180_v52 }
 0xa06   :  { %3181 = vrcp.f32 %v777_v53  ;;  %v789_v63 = vand.u32 2147483648, %v777_v53  ;;  %vm783_vm15 = vweird.f32 %v777_v53  ;;  %v787_v2 = vand.u32 2147483647, %v777_v53 }
 0xa07   :  { %3183 = vpow2.f32 %v2911_v54 }
 0xa08   :  { %v790_v5 = vor.u32 1.1754944e-38, %v789_v63  ;;  %vm788_vm1 = vcmp.eq.f32.partialorder %v787_v2, 8.507059e+37 }
 0xa0c   :  { %v3182_v55 = vpop.eup %3181 }
 0xa0d   :  { %v3184_v56 = vpop.eup %3183  ;;  %v779_v57 = vmul.f32 %v3182_v55, %v777_v53  ;;  %vm784_vm14 = vweird.f32 %v3182_v55 }
 0xa0e   :  { %v830_v58 = vadd.f32 1.0, %v3184_v56  ;;  %vm785_vm0 = vmor %vm783_vm15, %vm784_vm14 }
 0xa0f   :  { %v780_v59 = vsub.f32 1.0, %v779_v57 }
 0xa10   :  { %3185 = vrcp.f32 %v830_v58  ;;  %v842_v12 = vand.u32 2147483648, %v830_v58  ;;  %vm836_vm3 = vweird.f32 %v830_v58  ;;  %v840_v13 = vand.u32 2147483647, %v830_v58 }
 0xa11   :  { %v781_v60 = vmul.f32 %v3182_v55, %v780_v59 }
 0xa12   :  { %v843_v15 = vor.u32 1.1754944e-38, %v842_v12  ;;  %vm841_vm6 = vcmp.eq.f32.partialorder %v840_v13, 8.507059e+37 }
 0xa13   :  { %v782_v61 = vadd.f32 %v3182_v55, %v781_v60 }
 0xa15   :  { %v786_v3 = vsel %vm785_vm0, %v3182_v55, %v782_v61 }
 0xa16   :  { %v3186_v62 = vpop.eup %3185  ;;  %v791_v7 = vsel %vm788_vm1, %v790_v5, %v786_v3 }
 0xa17   :  { %v832_v4 = vmul.f32 %v3186_v62, %v830_v58  ;;  %vm837_vm2 = vweird.f32 %v3186_v62  ;;  %v794_v21 = vmul.f32 %v791_v7, %v3899_v32 }
 0xa18   :  { %vm838_vm5 = vmor %vm836_vm3, %vm837_vm2 }
 0xa19   :  { %v833_v9 = vsub.f32 1.0, %v832_v4 }
 0xa1b   :  { %v834_v10 = vmul.f32 %v3186_v62, %v833_v9 }
 0xa1d   :  { %v835_v11 = vadd.f32 %v3186_v62, %v834_v10 }
 0xa1f   :  { %v839_v14 = vsel %vm838_vm5, %v3186_v62, %v835_v11 }
 0xa20   :  { %v844_v17 = vsel %vm841_vm6, %v843_v15, %v839_v14 }
 0xa21   :  { %v847_v33 = vmul.f32 %v844_v17, %v3895_v23 }
 0xa5c   :  { %v797_v6 = vpop.permute.xlu2 %796 }
 0xa5d   :  { %v799_v8 = vmul.f32 %v797_v6, %v791_v7 }
 0xa5f   :  { %801 = vrot.lane.b32.xlu1 %v799_v8, %s3634_s17 }
 0xa6c   :  { %v850_v16 = vpop.permute.xlu1 %849 }
 0xa6d   :  { %v852_v19 = vmul.f32 %v850_v16, %v844_v17 }
 0xa6f   :  { %854 = vrot.lane.b32.xlu0 %v852_v19, %s3634_s17 }
 0xad1   :  { %v802_v24 = vpop.permute.xlu1 %801 }
 0xad2   :  { %v3924_v31 = vadd.f32 %v802_v24, %v794_v21 }
 0xad4   :  { %3187 = vtanh.f32 %v3924_v31 }
 0xada   :  { %v3188_v18 = vpop.eup %3187 }
 0xadb   :  { %807 = vrot.lane.b32.xlu0 %v3188_v18, %s3623_s29 }
 0xae1   :  { %v855_v34 = vpop.permute.xlu0 %854 }
 0xae2   :  { %v3929_v26 = vadd.f32 %v855_v34, %v847_v33 }
 0xae4   :  { %3189 = vtanh.f32 %v3929_v26 }
 0xaea   :  { %v3190_v25 = vpop.eup %3189 }
 0xaeb   :  { %860 = vrot.lane.b32.xlu2 %v3190_v25, %s3623_s29 }
 0xb45   :  { %v861_v35 = vpop.permute.xlu2 %860 }
 0xb46   :  { %v863_v32 = vmul.f32 %v861_v35, %v844_v17 }
 0xb48   :  { %v864_v36 = vpack.c.bf16 %v863_v32, %v863_v32 }
 0xb4a   :  { %886 = vrot.lane.b32.xlu1 %v864_v36, %s3634_s17 }
 0xb4d   :  { %v808_v22 = vpop.permute.xlu0 %807 }
 0xb4e   :  { %v810_v20 = vmul.f32 %v808_v22, %v791_v7 }
 0xb50   :  { %v865_v38 = vpack.c.bf16 %v810_v20, %v810_v20 }
 0xb52   :  { %867 = vrot.lane.b32.xlu2 %v865_v38, %s3634_s17 }
 0xbac   :  { %v868_v39 = vpop.permute.xlu2 %867 }
 0xbad   :  { %2912 = vmatmul.msk.bf16.vlgmr.msrb.gmra.mxu1 %vm268_vm4, %v868_v39  ;;  %v2921_v39 = vld [vmem:[%s4494_s1 + $0x30] sm:$0xff] }
 0xbae   :  { %1212 = vmatpush.bf16.msrb.mxu1 %v3776_v0  ;;  %v2915_v0 = vld [vmem:[%s4494_s1 + $0x28] sm:$0xff] }
 0xbb2   :  { %1213 = vmatpush.bf16.msrb.mxu1 %v3779_v1 }
 0xbbc   :  { %v887_v23 = vpop.permute.xlu1 %886 }
 0xbbd   :  { %2913 = vmatmul.msk.bf16.vlgmr.msrb.gmra.mxu2 %vm268_vm4, %v887_v23  ;;  %2916 = vmatmul.msk.bf16.vlgmr.msrb.gmra.mxu3 %vm268_vm4, %v887_v23 }
 0xbbe   :  { %1290 = vmatpush.bf16.msrb.mxu3 %v3795_v28  ;;  %1271 = vmatpush.bf16.msrb.mxu2 %v3793_v27 }
 0xbc2   :  { %1291 = vmatpush.bf16.msrb.mxu3 %v3801_v30  ;;  %1272 = vmatpush.bf16.msrb.mxu2 %v3799_v29 }
 0xc2a   :  { %v881_v40 = vpop.f32.mrf.mxu1 }
 0xc32   :  { %v883_v41 = vpop.f32.mrf.mxu1 }
 0xc40   :  { %v900_v1 = vpop.f32.mrf.mxu2  ;;  %v953_v42 = vpop.f32.mrf.mxu3 }
 0xc41   :  { %v901_v43 = vadd.f32 %v900_v1, %v881_v40  ;;  %v957_v44 = vadd.f32 %v2915_v0, %v953_v42 }
 0xc43   :  { %v904_v45 = vadd.f32 %v3827_v37, %v901_v43  ;;  %3191 = vtanh.f32 %v957_v44  ;;  %v2917_v30 = vmul.f32 -1.442695, %v957_v44 }
 0xc45   :  { %3193 = vtanh.f32 %v904_v45  ;;  %v2914_v47 = vmul.f32 -1.442695, %v904_v45 }
 0xc46   :  { %3195 = vpow2.f32 %v2917_v30 }
 0xc47   :  { %3197 = vpow2.f32 %v2914_v47 }
 0xc48   :  { %v902_v28 = vpop.f32.mrf.mxu2  ;;  %v955_v27 = vpop.f32.mrf.mxu3 }
 0xc49   :  { %v3192_v46 = vpop.eup %3191 }
 0xc4a   :  { %980 = vrot.lane.b32.xlu1 %v3192_v46, %s3623_s29 }
 0xc4b   :  { %v3194_v29 = vpop.eup %3193 }
 0xc4c   :  { %927 = vrot.lane.b32.xlu0 %v3194_v29, %s3623_s29  ;;  %v3196_v48 = vpop.eup %3195 }
 0xc4d   :  { %v3198_v49 = vpop.eup %3197  ;;  %v961_v50 = vadd.f32 1.0, %v3196_v48 }
 0xc4e   :  { %v908_v51 = vadd.f32 1.0, %v3198_v49 }
 0xc4f   :  { %3199 = vrcp.f32 %v961_v50  ;;  %v973_v61 = vand.u32 2147483648, %v961_v50  ;;  %vm967_vm8 = vweird.f32 %v961_v50  ;;  %v971_v62 = vand.u32 2147483647, %v961_v50 }
 0xc50   :  { %3201 = vrcp.f32 %v908_v51  ;;  %v920_v2 = vand.u32 2147483648, %v908_v51  ;;  %vm914_vm11 = vweird.f32 %v908_v51  ;;  %v918_v4 = vand.u32 2147483647, %v908_v51 }
 0xc51   :  { %v974_v5 = vor.u32 1.1754944e-38, %v973_v61  ;;  %vm972_vm13 = vcmp.eq.f32.partialorder %v971_v62, 8.507059e+37 }
 0xc52   :  { %v921_v9 = vor.u32 1.1754944e-38, %v920_v2  ;;  %vm919_vm14 = vcmp.eq.f32.partialorder %v918_v4, 8.507059e+37 }
 0xc55   :  { %v3200_v52 = vpop.eup %3199 }
 0xc56   :  { %v3202_v53 = vpop.eup %3201  ;;  %v963_v54 = vmul.f32 %v3200_v52, %v961_v50  ;;  %vm968_vm7 = vweird.f32 %v3200_v52 }
 0xc57   :  { %v910_v55 = vmul.f32 %v3202_v53, %v908_v51  ;;  %vm915_vm9 = vweird.f32 %v3202_v53  ;;  %vm969_vm10 = vmor %vm967_vm8, %vm968_vm7 }
 0xc58   :  { %v964_v56 = vsub.f32 1.0, %v963_v54  ;;  %vm916_vm12 = vmor %vm914_vm11, %vm915_vm9 }
 0xc59   :  { %v911_v57 = vsub.f32 1.0, %v910_v55 }
 0xc5a   :  { %v965_v58 = vmul.f32 %v3200_v52, %v964_v56 }
 0xc5b   :  { %v912_v59 = vmul.f32 %v3202_v53, %v911_v57 }
 0xc5c   :  { %v966_v60 = vadd.f32 %v3200_v52, %v965_v58 }
 0xc5d   :  { %v913_v63 = vadd.f32 %v3202_v53, %v912_v59 }
 0xc5e   :  { %v970_v3 = vsel %vm969_vm10, %v3200_v52, %v966_v60 }
 0xc5f   :  { %v917_v6 = vsel %vm916_vm12, %v3202_v53, %v913_v63  ;;  %v975_v8 = vsel %vm972_vm13, %v974_v5, %v970_v3 }
 0xc60   :  { %v922_v12 = vsel %vm919_vm14, %v921_v9, %v917_v6  ;;  %v978_v19 = vmul.f32 %v975_v8, %v3929_v26 }
 0xc61   :  { %v925_v14 = vmul.f32 %v922_v12, %v3924_v31 }
 0xcbc   :  { %v981_v7 = vpop.permute.xlu1 %980 }
 0xcbd   :  { %v983_v10 = vmul.f32 %v981_v7, %v975_v8 }
 0xcbe   :  { %v928_v11 = vpop.permute.xlu0 %927 }
 0xcbf   :  { %v930_v13 = vmul.f32 %v928_v11, %v922_v12  ;;  %985 = vrot.lane.b32.xlu0 %v983_v10, %s3634_s17 }
 0xcc1   :  { %932 = vrot.lane.b32.xlu2 %v930_v13, %s3634_s17 }
 0xd1b   :  { %v933_v15 = vpop.permute.xlu2 %932 }
 0xd1c   :  { %v3953_v16 = vadd.f32 %v933_v15, %v925_v14 }
 0xd1e   :  { %3203 = vtanh.f32 %v3953_v16 }
 0xd24   :  { %v3204_v17 = vpop.eup %3203 }
 0xd25   :  { %938 = vrot.lane.b32.xlu1 %v3204_v17, %s3623_s29 }
 0xd31   :  { %v986_v21 = vpop.permute.xlu0 %985 }
 0xd32   :  { %v3958_v24 = vadd.f32 %v986_v21, %v978_v19 }
 0xd34   :  { %3205 = vtanh.f32 %v3958_v24 }
 0xd3a   :  { %v3206_v18 = vpop.eup %3205 }
 0xd3b   :  { %991 = vrot.lane.b32.xlu2 %v3206_v18, %s3623_s29 }
 0xd95   :  { %v992_v33 = vpop.permute.xlu2 %991 }
 0xd96   :  { %v994_v31 = vmul.f32 %v992_v33, %v975_v8 }
 0xd97   :  { %v939_v34 = vpop.permute.xlu1 %938 }
 0xd98   :  { %v995_v25 = vpack.c.bf16 %v994_v31, %v994_v31  ;;  %v941_v35 = vmul.f32 %v939_v34, %v922_v12 }
 0xd9a   :  { %v996_v32 = vpack.c.bf16 %v941_v35, %v941_v35  ;;  %1017 = vrot.lane.b32.xlu1 %v995_v25, %s3634_s17  ;;  %v2927_v35 = vld [vmem:[%s4494_s1 + $0x38] sm:$0xff] }
 0xd9c   :  { %998 = vrot.lane.b32.xlu0 %v996_v32, %s3634_s17 }
 0xe0c   :  { %v1018_v36 = vpop.permute.xlu1 %1017 }
 0xe0d   :  { %2919 = vmatmul.msk.bf16.vlgmr.msra.gmra.mxu1 %vm268_vm4, %v1018_v36  ;;  %2922 = vmatmul.msk.bf16.vlgmr.msra.gmra.mxu2 %vm268_vm4, %v1018_v36 }
 0xe0e   :  { %v999_v26 = vpop.permute.xlu0 %998 }
 0xe0f   :  { %2918 = vmatmul.msk.bf16.vlgmr.msra.gmra.mxu0 %vm268_vm4, %v999_v26 }
 0xe8a   :  { %v1031_v22 = vpop.f32.mrf.mxu1 }
 0xe8c   :  { %v1012_v20 = vpop.f32.mrf.mxu0 }
 0xe8d   :  { %v1032_v38 = vadd.f32 %v1031_v22, %v1012_v20  ;;  %v3996_v20 = vld [vmem:[%s4499_s6] ss:$0 sm:$0xff]  ;;  %s3011_s6 = sld [smem:[#allocation2 + $0x1]] }
 0xe8f   :  { %v1035_v23 = vadd.f32 %v3827_v37, %v1032_v38 }
 0xe90   :  { %v1084_v40 = vpop.f32.mrf.mxu2 }
 0xe91   :  { %3207 = vtanh.f32 %v1035_v23  ;;  %v1088_v41 = vadd.f32 %v2921_v39, %v1084_v40  ;;  %v2920_v45 = vmul.f32 -1.442695, %v1035_v23 }
 0xe92   :  { %v1033_v0 = vpop.f32.mrf.mxu1 }
 0xe93   :  { %3209 = vtanh.f32 %v1088_v41  ;;  %v2923_v29 = vmul.f32 -1.442695, %v1088_v41  ;;  %p1650_p0 = scmp.ne.s32.totalorder %s3011_s6, 0 }
 0xe94   :  { %v1014_v1 = vpop.f32.mrf.mxu0  ;;  %3211 = vpow2.f32 %v2920_v45 }
 0xe95   :  { %s1651_s0 = scalar_select %p1650_p0, 1, 0 }
 0xe97   :  { %v3208_v42 = vpop.eup %3207 }
 0xe98   :  { %v1086_v43 = vpop.f32.mrf.mxu2  ;;  %1058 = vrot.lane.b32.xlu2 %v3208_v42, %s3623_s29 }
 0xe99   :  { %v3210_v44 = vpop.eup %3209 }
 0xe9a   :  { %1111 = vrot.lane.b32.xlu0 %v3210_v44, %s3623_s29  ;;  %v3212_v28 = vpop.eup %3211 }
 0xe9b   :  { %v1039_v27 = vadd.f32 1.0, %v3212_v28 }
 0xe9d   :  { %3213 = vrcp.f32 %v1039_v27  ;;  %v1051_v50 = vand.u32 2147483648, %v1039_v27  ;;  %vm1045_vm0 = vweird.f32 %v1039_v27  ;;  %v1049_v52 = vand.u32 2147483647, %v1039_v27 }
 0xe9e   :  { %3215 = vpow2.f32 %v2923_v29 }
 0xe9f   :  { %v1052_v54 = vor.u32 1.1754944e-38, %v1051_v50  ;;  %vm1050_vm2 = vcmp.eq.f32.partialorder %v1049_v52, 8.507059e+37 }
 0xea3   :  { %v3214_v46 = vpop.eup %3213 }
 0xea4   :  { %v1041_v37 = vmul.f32 %v3214_v46, %v1039_v27  ;;  %v3216_v48 = vpop.eup %3215  ;;  %vm1046_vm15 = vweird.f32 %v3214_v46 }
 0xea5   :  { %v1092_v51 = vadd.f32 1.0, %v3216_v48  ;;  %vm1047_vm1 = vmor %vm1045_vm0, %vm1046_vm15  ;;  %vm1370_vm0 = vcmask 130048  }
 0xea6   :  { %v1042_v30 = vsub.f32 1.0, %v1041_v37 }
 0xea7   :  { %3217 = vrcp.f32 %v1092_v51  ;;  %v1104_v63 = vand.u32 2147483648, %v1092_v51  ;;  %vm1098_vm5 = vweird.f32 %v1092_v51  ;;  %v1102_v2 = vand.u32 2147483647, %v1092_v51 }
 0xea8   :  { %v1043_v47 = vmul.f32 %v3214_v46, %v1042_v30 }
 0xea9   :  { %v1105_v4 = vor.u32 1.1754944e-38, %v1104_v63  ;;  %vm1103_vm7 = vcmp.eq.f32.partialorder %v1102_v2, 8.507059e+37 }
 0xeaa   :  { %v1044_v49 = vadd.f32 %v3214_v46, %v1043_v47 }
 0xeac   :  { %v1048_v53 = vsel %vm1047_vm1, %v3214_v46, %v1044_v49 }
 0xead   :  { %v1053_v56 = vsel %vm1050_vm2, %v1052_v54, %v1048_v53  ;;  %v3218_v58 = vpop.eup %3217 }
 0xeae   :  { %v1094_v59 = vmul.f32 %v3218_v58, %v1092_v51  ;;  %vm1099_vm3 = vweird.f32 %v3218_v58  ;;  %v1056_v8 = vmul.f32 %v1053_v56, %v3953_v16 }
 0xeaf   :  { %vm1100_vm6 = vmor %vm1098_vm5, %vm1099_vm3 }
 0xeb0   :  { %v1095_v60 = vsub.f32 1.0, %v1094_v59 }
 0xeb2   :  { %v1096_v61 = vmul.f32 %v3218_v58, %v1095_v60 }
 0xeb4   :  { %v1097_v62 = vadd.f32 %v3218_v58, %v1096_v61 }
 0xeb6   :  { %v1101_v3 = vsel %vm1100_vm6, %v3218_v58, %v1097_v62 }
 0xeb7   :  { %v1106_v6 = vsel %vm1103_vm7, %v1105_v4, %v1101_v3 }
 0xeb8   :  { %v1109_v11 = vmul.f32 %v1106_v6, %v3958_v24 }
 0xef2   :  { %v1059_v55 = vpop.permute.xlu2 %1058 }
 0xef3   :  { %v1061_v57 = vmul.f32 %v1059_v55, %v1053_v56 }
 0xef5   :  { %1063 = vrot.lane.b32.xlu1 %v1061_v57, %s3634_s17 }
 0xf0c   :  { %v1112_v5 = vpop.permute.xlu0 %1111 }
 0xf0d   :  { %v1114_v7 = vmul.f32 %v1112_v5, %v1106_v6 }
 0xf0f   :  { %1116 = vrot.lane.b32.xlu2 %v1114_v7, %s3634_s17 }
 0xf67   :  { %v1064_v9 = vpop.permute.xlu1 %1063 }
 0xf68   :  { %v3976_v10 = vadd.f32 %v1064_v9, %v1056_v8 }
 0xf69   :  { %v1117_v12 = vpop.permute.xlu2 %1116 }
 0xf6a   :  { %3219 = vtanh.f32 %v3976_v10  ;;  %v3980_v13 = vadd.f32 %v1117_v12, %v1109_v11  ;;  %v4013_v12 = vld [vmem:[#allocation12 + $0x8] sm:$0xff] }
 0xf6b   :  { %1357 = vmatpush.bf16.msra.mxu0 %v4013_v12 }
 0xf6c   :  { %3221 = vtanh.f32 %v3980_v13 }
 0xf70   :  { %v3220_v14 = vpop.eup %3219 }
 0xf71   :  { %1069 = vrot.lane.b32.xlu0 %v3220_v14, %s3623_s29  ;;  %v4021_v14 = vld [vmem:[#allocation12] sm:$0xff] }
 0xf72   :  { %v3222_v15 = vpop.eup %3221  ;;  %1358 = vmatpush.bf16.msra.mxu0 %v4021_v14 }
 0xf73   :  { %1122 = vrot.lane.b32.xlu1 %v3222_v15, %s3623_s29 }
 0xfe3   :  { %v1070_v17 = vpop.permute.xlu0 %1069 }
 0xfe4   :  { %v1072_v16 = vmul.f32 %v1070_v17, %v1053_v56 }
 0xfe5   :  { %v1123_v21 = vpop.permute.xlu1 %1122 }
 0xfe6   :  { %v1127_v19 = vpack.c.bf16 %v1072_v16, %v1072_v16  ;;  %v1125_v18 = vmul.f32 %v1123_v21, %v1106_v6 }
 0xfe8   :  { %1129 = vrot.lane.b32.xlu2 %v1127_v19, %s3634_s17  ;;  %v1126_v24 = vpack.c.bf16 %v1125_v18, %v1125_v18  ;;  %v1338_v18 = vld [vmem:[#allocation6] sm:$0xf] }
 0xfea   :  { %1148 = vrot.lane.b32.xlu0 %v1126_v24, %s3634_s17 }
0x1042   :  { %v1130_v33 = vpop.permute.xlu2 %1129 }
0x1043   :  { %2924 = vmatmul.msk.bf16.vlgmr.msra.gmra.mxu3 %vm268_vm4, %v1130_v33 }
0x105c   :  { %v1149_v31 = vpop.permute.xlu0 %1148 }
0x105d   :  { %2925 = vmatmul.msk.bf16.vlgmr.msrb.gmra.mxu0 %vm268_vm4, %v1149_v31  ;;  %2928 = vmatmul.msk.bf16.vlgmr.msrb.gmra.mxu1 %vm268_vm4, %v1149_v31 }
0x10c6   :  { %v1143_v34 = vpop.f32.mrf.mxu3 }
0x10ce   :  { %v1145_v25 = vpop.f32.mrf.mxu3 }
0x10cf   :  { %v4034_v25 = vld [vmem:[%s4502_s9] ss:$0 sm:$0xff] }
0x10da   :  { %v1162_v32 = vpop.f32.mrf.mxu0  ;;  %v1215_v36 = vpop.f32.mrf.mxu1 }
0x10db   :  { %v1163_v26 = vadd.f32 %v1162_v32, %v1143_v34  ;;  %v1219_v22 = vadd.f32 %v2927_v35, %v1215_v36 }
0x10dd   :  { %v1166_v38 = vadd.f32 %v3996_v20, %v1163_v26  ;;  %3223 = vtanh.f32 %v1219_v22  ;;  %v2929_v0 = vmul.f32 -1.442695, %v1219_v22 }
0x10df   :  { %3225 = vtanh.f32 %v1166_v38  ;;  %v2926_v44 = vmul.f32 -1.442695, %v1166_v38 }
0x10e0   :  { %3227 = vpow2.f32 %v2929_v0 }
0x10e2   :  { %v1164_v39 = vpop.f32.mrf.mxu0  ;;  %v1217_v23 = vpop.f32.mrf.mxu1 }
0x10e3   :  { %v3224_v40 = vpop.eup %3223 }
0x10e4   :  { %1242 = vrot.lane.b32.xlu2 %v3224_v40, %s3623_s29 }
0x10e5   :  { %v3226_v41 = vpop.eup %3225 }
0x10e6   :  { %1189 = vrot.lane.b32.xlu1 %v3226_v41, %s3623_s29  ;;  %v3228_v1 = vpop.eup %3227 }
0x10e7   :  { %v1223_v42 = vadd.f32 1.0, %v3228_v1 }
0x10e9   :  { %3229 = vrcp.f32 %v1223_v42  ;;  %v1235_v30 = vand.u32 2147483648, %v1223_v42  ;;  %vm1229_vm9 = vweird.f32 %v1223_v42  ;;  %v1233_v47 = vand.u32 2147483647, %v1223_v42 }
0x10ea   :  { %3231 = vpow2.f32 %v2926_v44 }
0x10eb   :  { %v1236_v49 = vor.u32 1.1754944e-38, %v1235_v30  ;;  %vm1234_vm11 = vcmp.eq.f32.partialorder %v1233_v47, 8.507059e+37 }
0x10ef   :  { %v3230_v43 = vpop.eup %3229 }
0x10f0   :  { %v1225_v45 = vmul.f32 %v3230_v43, %v1223_v42  ;;  %v3232_v46 = vpop.eup %3231  ;;  %vm1230_vm8 = vweird.f32 %v3230_v43 }
0x10f1   :  { %v1170_v29 = vadd.f32 1.0, %v3232_v46  ;;  %vm1231_vm10 = vmor %vm1229_vm9, %vm1230_vm8 }
0x10f2   :  { %v1226_v28 = vsub.f32 1.0, %v1225_v45 }
0x10f3   :  { %3233 = vrcp.f32 %v1170_v29  ;;  %v1182_v58 = vand.u32 2147483648, %v1170_v29  ;;  %vm1176_vm13 = vweird.f32 %v1170_v29  ;;  %v1180_v59 = vand.u32 2147483647, %v1170_v29 }
0x10f4   :  { %v1227_v27 = vmul.f32 %v3230_v43, %v1226_v28 }
0x10f5   :  { %v1183_v61 = vor.u32 1.1754944e-38, %v1182_v58  ;;  %vm1181_vm15 = vcmp.eq.f32.partialorder %v1180_v59, 8.507059e+37 }
0x10f6   :  { %v1228_v37 = vadd.f32 %v3230_v43, %v1227_v27 }
0x10f8   :  { %v1232_v48 = vsel %vm1231_vm10, %v3230_v43, %v1228_v37 }
0x10f9   :  { %v1237_v51 = vsel %vm1234_vm11, %v1236_v49, %v1232_v48  ;;  %v3234_v53 = vpop.eup %3233 }
0x10fa   :  { %v1172_v54 = vmul.f32 %v3234_v53, %v1170_v29  ;;  %vm1177_vm12 = vweird.f32 %v3234_v53  ;;  %v1240_v3 = vmul.f32 %v1237_v51, %v3980_v13  ;;  %v4018_v13 = vld [vmem:[%s4500_s7] sm:$0xff] }
0x10fb   :  { %vm1178_vm14 = vmor %vm1176_vm13, %vm1177_vm12  ;;  %1381 = vmatpush.bf16.msra.mxu1 %v4018_v13 }
0x10fc   :  { %v1173_v55 = vsub.f32 1.0, %v1172_v54 }
0x10fe   :  { %v1174_v56 = vmul.f32 %v3234_v53, %v1173_v55  ;;  %2946 = vmatmul.msk.bf16.vlgmr.msra.gmra.mxu1 %vm1370_vm0, %v1338_v18 }
0x1100   :  { %v1175_v57 = vadd.f32 %v3234_v53, %v1174_v56 }
0x1102   :  { %v1179_v60 = vsel %vm1178_vm14, %v3234_v53, %v1175_v57 }
0x1103   :  { %v1184_v63 = vsel %vm1181_vm15, %v1183_v61, %v1179_v60 }
0x1104   :  { %v1187_v7 = vmul.f32 %v1184_v63, %v3976_v10 }
0x113e   :  { %v1243_v50 = vpop.permute.xlu2 %1242 }
0x113f   :  { %v1245_v52 = vmul.f32 %v1243_v50, %v1237_v51 }
0x1141   :  { %1247 = vrot.lane.b32.xlu1 %v1245_v52, %s3634_s17 }
0x1158   :  { %v1190_v62 = vpop.permute.xlu1 %1189 }
0x1159   :  { %v1192_v2 = vmul.f32 %v1190_v62, %v1184_v63 }
0x115b   :  { %1194 = vrot.lane.b32.xlu0 %v1192_v2, %s3634_s17 }
0x117b   :  { %v1383_v31 = vpop.f32.mrf.mxu1 }
0x1183   :  { %v1385_v34 = vpop.f32.mrf.mxu1 }
0x1184   :  { %v4064_v34 = vld [vmem:[#allocation15] sm:$0xff] }
0x11b3   :  { %v1248_v4 = vpop.permute.xlu1 %1247 }
0x11b4   :  { %v4004_v5 = vadd.f32 %v1248_v4, %v1240_v3 }
0x11b6   :  { %3235 = vtanh.f32 %v4004_v5 }
0x11bc   :  { %v3236_v6 = vpop.eup %3235 }
0x11bd   :  { %1253 = vrot.lane.b32.xlu0 %v3236_v6, %s3623_s29 }
0x11cd   :  { %v1195_v8 = vpop.permute.xlu0 %1194 }
0x11ce   :  { %v4009_v9 = vadd.f32 %v1195_v8, %v1187_v7 }
0x11d0   :  { %3237 = vtanh.f32 %v4009_v9 }
0x11d6   :  { %v3238_v11 = vpop.eup %3237 }
0x11d7   :  { %1200 = vrot.lane.b32.xlu2 %v3238_v11, %s3623_s29 }
0x122f   :  { %v1254_v10 = vpop.permute.xlu0 %1253 }
0x1230   :  { %v1256_v15 = vmul.f32 %v1254_v10, %v1237_v51 }
0x1231   :  { %v1201_v17 = vpop.permute.xlu2 %1200 }
0x1232   :  { %v1257_v16 = vpack.c.bf16 %v1256_v15, %v1256_v15  ;;  %v1203_v19 = vmul.f32 %v1201_v17, %v1184_v63 }
0x1234   :  { %v1258_v21 = vpack.c.bf16 %v1203_v19, %v1203_v19  ;;  %1279 = vrot.lane.b32.xlu2 %v1257_v16, %s3634_s17 }
0x1236   :  { %1260 = vrot.lane.b32.xlu1 %v1258_v21, %s3634_s17  ;;  %v4053_v21 = vld [vmem:[#allocation13 + $0x8] sm:$0xff] }
0x1237   :  { %1482 = vmatpush.bf16.msra.mxu3 %v4053_v21 }
0x128e   :  { %v1280_v24 = vpop.permute.xlu2 %1279 }
0x128f   :  { %2931 = vmatmul.msk.bf16.vlgmr.msrb.gmra.mxu3 %vm268_vm4, %v1280_v24  ;;  %2941 = vmatmul.msk.bf16.vlgmr.msra.gmra.mxu0 %vm268_vm4, %v1280_v24 }
0x12a8   :  { %v1261_v33 = vpop.permute.xlu1 %1260 }
0x12a9   :  { %2930 = vmatmul.msk.bf16.vlgmr.msrb.gmra.mxu2 %vm268_vm4, %v1261_v33 }
0x130c   :  { %v1360_v35 = vpop.f32.mrf.mxu0 }
0x130d   :  { %v1384_v32 = vadd.f32 %v1383_v31, %v1360_v35  ;;  %v4061_v31 = vld [vmem:[#allocation15 + $0x8] sm:$0xff] }
0x130e   :  { %1451 = vmatpush.bf16.msra.mxu2 %v4061_v31 }
0x130f   :  { %v1387_v36 = vadd.f32 %v4034_v25, %v1384_v32 }
0x1311   :  { %3239 = vtanh.f32 %v1387_v36  ;;  %v2947_v42 = vmul.f32 -1.442695, %v1387_v36 }
0x1312   :  { %v1293_v26 = vpop.f32.mrf.mxu3  ;;  %1452 = vmatpush.bf16.msra.mxu2 %v4064_v34 }
0x1314   :  { %v1362_v22 = vpop.f32.mrf.mxu0 }
0x1315   :  { %v4078_v22 = vld [vmem:[%s4505_s12] ss:$0 sm:$0xff] }
0x1316   :  { %1661 = vmatpush.bf16.msrb.mxu2 %v4013_v12 }
0x1317   :  { %v3240_v38 = vpop.eup %3239 }
0x1318   :  { %1410 = vrot.lane.b32.xlu1 %v3240_v38, %s3623_s29 }
0x131a   :  { %v1295_v39 = vpop.f32.mrf.mxu3  ;;  %1662 = vmatpush.bf16.msrb.mxu2 %v4021_v14 }
0x132c   :  { %v1274_v23 = vpop.f32.mrf.mxu2 }
0x132d   :  { %v1294_v40 = vadd.f32 %v1293_v26, %v1274_v23 }
0x132f   :  { %v1297_v41 = vadd.f32 %v3996_v20, %v1294_v40 }
0x1331   :  { %3241 = vtanh.f32 %v1297_v41  ;;  %v2932_v46 = vmul.f32 -1.442695, %v1297_v41 }
0x1332   :  { %3243 = vpow2.f32 %v2947_v42 }
0x1334   :  { %v1276_v0 = vpop.f32.mrf.mxu2 }
0x1337   :  { %v3242_v1 = vpop.eup %3241 }
0x1338   :  { %1320 = vrot.lane.b32.xlu0 %v3242_v1, %s3623_s29  ;;  %v3244_v43 = vpop.eup %3243 }
0x1339   :  { %v1391_v44 = vadd.f32 1.0, %v3244_v43 }
0x133b   :  { %3245 = vrcp.f32 %v1391_v44  ;;  %v1403_v30 = vand.u32 2147483648, %v1391_v44  ;;  %vm1397_vm2 = vweird.f32 %v1391_v44  ;;  %v1401_v20 = vand.u32 2147483647, %v1391_v44 }
0x133c   :  { %3247 = vpow2.f32 %v2932_v46 }
0x133d   :  { %v1404_v49 = vor.u32 1.1754944e-38, %v1403_v30  ;;  %vm1402_vm5 = vcmp.eq.f32.partialorder %v1401_v20, 8.507059e+37 }
0x1341   :  { %v3246_v45 = vpop.eup %3245 }
0x1342   :  { %v1393_v28 = vmul.f32 %v3246_v45, %v1391_v44  ;;  %vm1398_vm1 = vweird.f32 %v3246_v45  ;;  %v3248_v47 = vpop.eup %3247 }
0x1343   :  { %vm1399_vm3 = vmor %vm1397_vm2, %vm1398_vm1  ;;  %v1301_v50 = vadd.f32 1.0, %v3248_v47 }
0x1344   :  { %v1394_v27 = vsub.f32 1.0, %v1393_v28 }
0x1345   :  { %3249 = vrcp.f32 %v1301_v50  ;;  %v1313_v59 = vand.u32 2147483648, %v1301_v50  ;;  %vm1307_vm7 = vweird.f32 %v1301_v50  ;;  %v1311_v60 = vand.u32 2147483647, %v1301_v50 }
0x1346   :  { %v1395_v37 = vmul.f32 %v3246_v45, %v1394_v27 }
0x1347   :  { %v1314_v62 = vor.u32 1.1754944e-38, %v1313_v59  ;;  %vm1312_vm9 = vcmp.eq.f32.partialorder %v1311_v60, 8.507059e+37 }
0x1348   :  { %v1396_v29 = vadd.f32 %v3246_v45, %v1395_v37 }
0x134a   :  { %v1400_v48 = vsel %vm1399_vm3, %v3246_v45, %v1396_v29 }
0x134b   :  { %v1405_v52 = vsel %vm1402_vm5, %v1404_v49, %v1400_v48  ;;  %v3250_v54 = vpop.eup %3249 }
0x134c   :  { %v1303_v55 = vmul.f32 %v3250_v54, %v1301_v50  ;;  %vm1308_vm6 = vweird.f32 %v3250_v54  ;;  %v1408_v4 = vmul.f32 %v1405_v52, %v4004_v5 }
0x134d   :  { %vm1309_vm8 = vmor %vm1307_vm7, %vm1308_vm6 }
0x134e   :  { %v1304_v56 = vsub.f32 1.0, %v1303_v55  ;;  %v4090_v55 = vld [vmem:[#allocation16 + $0x8] sm:$0xff] }
0x134f   :  { %1552 = vmatpush.bf16.msrb.mxu0 %v4090_v55 }
0x1350   :  { %v1305_v57 = vmul.f32 %v3250_v54, %v1304_v56  ;;  %v4093_v56 = vld [vmem:[#allocation16] sm:$0xff] }
0x1352   :  { %v1306_v58 = vadd.f32 %v3250_v54, %v1305_v57 }
0x1353   :  { %1553 = vmatpush.bf16.msrb.mxu0 %v4093_v56 }
0x1354   :  { %v1310_v61 = vsel %vm1309_vm8, %v3250_v54, %v1306_v58 }
0x1355   :  { %v1315_v2 = vsel %vm1312_vm9, %v1314_v62, %v1310_v61  ;;  %v1336_v61 = vlaneseq }
0x1356   :  { %v1318_v8 = vmul.f32 %v1315_v2, %v4009_v9  ;;  %v4056_v9 = vld [vmem:[#allocation13] sm:$0xff] }
0x1357   :  { %1483 = vmatpush.bf16.msra.mxu3 %v4056_v9  ;;  %1729 = vmatpush.bf16.msra.mxu0 %v4061_v31  ;;  %v4103_v62 = vand.u32 127, %v1336_v61 }
0x1359   :  { %vm1561_vm14 = vcmp.lt.s32.totalorder %v4103_v62, 24 }
0x135b   :  { %1678 = vmatpush.bf16.msrb.mxu3 %v4018_v13  ;;  %1730 = vmatpush.bf16.msra.mxu0 %v4064_v34 }
0x138a   :  { %v1411_v51 = vpop.permute.xlu1 %1410 }
0x138b   :  { %v1413_v53 = vmul.f32 %v1411_v51, %v1405_v52 }
0x138d   :  { %1415 = vrot.lane.b32.xlu0 %v1413_v53, %s3634_s17 }
0x13aa   :  { %v1321_v63 = vpop.permute.xlu0 %1320 }
0x13ab   :  { %v1323_v3 = vmul.f32 %v1321_v63, %v1315_v2  ;;  %v4108_v63 = vld [vmem:[%s4508_s15] ss:$0 sm:$0xff] }
0x13ad   :  { %1325 = vrot.lane.b32.xlu2 %v1323_v3, %s3634_s17 }
0x13ff   :  { %v1416_v6 = vpop.permute.xlu0 %1415 }
0x1400   :  { %v4043_v7 = vadd.f32 %v1416_v6, %v1408_v4 }
0x1402   :  { %3251 = vtanh.f32 %v4043_v7 }
0x1407   :  { %v1326_v11 = vpop.permute.xlu2 %1325 }
0x1408   :  { %v3252_v10 = vpop.eup %3251  ;;  %v4047_v15 = vadd.f32 %v1326_v11, %v1318_v8 }
0x1409   :  { %1421 = vrot.lane.b32.xlu2 %v3252_v10, %s3623_s29 }
0x140a   :  { %3253 = vtanh.f32 %v4047_v15 }
0x1410   :  { %v3254_v17 = vpop.eup %3253 }
0x1411   :  { %1331 = vrot.lane.b32.xlu1 %v3254_v17, %s3623_s29 }
0x1463   :  { %v1422_v16 = vpop.permute.xlu2 %1421 }
0x1464   :  { %v1424_v5 = vmul.f32 %v1422_v16, %v1405_v52 }
0x1466   :  { %v1425_v19 = vpack.c.bf16 %v1424_v5, %v1424_v5  ;;  %v4120_v5 = vld [vmem:[%s4506_s13 + $0x38] sm:$0xff] }
0x1467   :  { %1633 = vmatpush.bf16.msrb.mxu1 %v4120_v5 }
0x1468   :  { %1459 = vrot.lane.b32.xlu1 %v1425_v19, %s3634_s17  ;;  %v4126_v19 = vld [vmem:[%s4506_s13 + $0x30] sm:$0xff] }
0x146b   :  { %1634 = vmatpush.bf16.msrb.mxu1 %v4126_v19 }
0x1483   :  { %v1332_v18 = vpop.permute.xlu1 %1331 }
0x1484   :  { %v1334_v24 = vmul.f32 %v1332_v18, %v1315_v2  ;;  %v4133_v18 = vld [vmem:[%s4506_s13 + $0x28] sm:$0xff] }
0x1485   :  { %1635 = vmatpush.bf16.msrb.mxu1 %v4133_v18 }
0x1486   :  { %v1426_v33 = vpack.c.bf16 %v1334_v24, %v1334_v24  ;;  %v4140_v24 = vld [vmem:[%s4506_s13 + $0x20] sm:$0xff] }
0x1488   :  { %1428 = vrot.lane.b32.xlu0 %v1426_v33, %s3634_s17  ;;  %v4147_v33 = vld [vmem:[%s4506_s13 + $0x18] sm:$0xff] }
0x1489   :  { %1636 = vmatpush.bf16.msrb.mxu1 %v4140_v24 }
0x148d   :  { %1637 = vmatpush.bf16.msrb.mxu1 %v4147_v33 }
0x14da   :  { %v1460_v35 = vpop.permute.xlu1 %1459 }
0x14db   :  { %2965 = vmatmul.msk.bf16.vlgmr.msra.gmra.mxu3 %vm268_vm4, %v1460_v35 }
0x14dc   :  { %1806 = vmatpush.bf16.msra.mxu3 %v4090_v55 }
0x14e0   :  { %1807 = vmatpush.bf16.msra.mxu3 %v4093_v56 }
0x14fa   :  { %v1429_v32 = vpop.permute.xlu0 %1428 }
0x14fb   :  { %2956 = vmatmul.msk.bf16.vlgmr.msra.gmra.mxu2 %vm268_vm4, %v1429_v32  ;;  %v4161_v32 = vld [vmem:[%s4506_s13 + $0x8] sm:$0xff] }
0x14fc   :  { %1748 = vmatpush.bf16.msra.mxu2 %v4053_v21 }
0x1500   :  { %1749 = vmatpush.bf16.msra.mxu2 %v4056_v9 }
0x150b   :  { %3012 = vmatmul.msk.bf16.vlgmr.msrb.gmra.mxu2 %vm268_vm4, %v1460_v35  ;;  %v4154_v35 = vld [vmem:[%s4506_s13 + $0x10] sm:$0xff] }
0x150c   :  { %1883 = vmatpush.bf16.msrb.mxu2 %v4018_v13  ;;  %1638 = vmatpush.bf16.msrb.mxu1 %v4154_v35 }
0x1510   :  { %1639 = vmatpush.bf16.msrb.mxu1 %v4161_v32 }
0x155e   :  { %v1485_v36 = vpop.f32.mrf.mxu3 }
0x1566   :  { %v1487_v26 = vpop.f32.mrf.mxu3 }
0x157e   :  { %v1454_v38 = vpop.f32.mrf.mxu2 }
0x157f   :  { %v1486_v39 = vadd.f32 %v1485_v36, %v1454_v38 }
0x1581   :  { %v1489_v23 = vadd.f32 %v4078_v22, %v1486_v39 }
0x1583   :  { %3255 = vtanh.f32 %v1489_v23  ;;  %v2966_v42 = vmul.f32 -1.442695, %v1489_v23  ;;  %v4169_v23 = vld [vmem:[%s4506_s13] sm:$0xff] }
0x1584   :  { %1640 = vmatpush.bf16.msrb.mxu1 %v4169_v23 }
0x1585   :  { %3257 = vpow2.f32 %v2966_v42 }
0x1586   :  { %v1456_v40 = vpop.f32.mrf.mxu2 }
0x1588   :  { %1866 = vmatpush.bf16.msra.mxu1 %v4013_v12 }
0x1589   :  { %v3256_v41 = vpop.eup %3255 }
0x158a   :  { %1512 = vrot.lane.b32.xlu2 %v3256_v41, %s3623_s29 }
0x158b   :  { %v3258_v43 = vpop.eup %3257 }
0x158c   :  { %v1493_v44 = vadd.f32 1.0, %v3258_v43  ;;  %1867 = vmatpush.bf16.msra.mxu1 %v4021_v14 }
0x158e   :  { %v4082_v0 = vpop.f32.mrf.mxu2  ;;  %3259 = vrcp.f32 %v1493_v44  ;;  %v1505_v29 = vand.u32 2147483648, %v1493_v44  ;;  %vm1499_vm11 = vweird.f32 %v1493_v44  ;;  %v1503_v30 = vand.u32 2147483647, %v1493_v44 }
0x1590   :  { %v1506_v47 = vor.u32 1.1754944e-38, %v1505_v29  ;;  %vm1504_vm13 = vcmp.eq.f32.partialorder %v1503_v30, 8.507059e+37 }
0x1594   :  { %v3260_v45 = vpop.eup %3259 }
0x1595   :  { %v1495_v28 = vmul.f32 %v3260_v45, %v1493_v44  ;;  %vm1500_vm10 = vweird.f32 %v3260_v45  ;;  %v3635_v44 = vmov 1.0|1.0  }
0x1596   :  { %v1666_v1 = vpop.f32.mrf.mxu2  ;;  %vm1501_vm12 = vmor %vm1499_vm11, %vm1500_vm10 }
0x1597   :  { %v1496_v27 = vsub.f32 1.0, %v1495_v28 }
0x1599   :  { %v1497_v46 = vmul.f32 %v3260_v45, %v1496_v27  ;;  %v1648_v27 = vld [vmem:[#allocation6 + $0x4] sm:$0xf] }
0x159b   :  { %v1498_v37 = vadd.f32 %v3260_v45, %v1497_v46 }
0x159d   :  { %v1502_v20 = vsel %vm1501_vm12, %v3260_v45, %v1498_v37  ;;  %v1652_v45 = vstv %s1651_s0 }
0x159e   :  { %v1507_v49 = vsel %vm1504_vm13, %v1506_v47, %v1502_v20  ;;  %vm1653_vm5 = vcmp.eq.s32.totalorder %v1652_v45, 1 }
0x159f   :  { %v1510_v51 = vmul.f32 %v1507_v49, %v4047_v15 }
0x15e4   :  { %v1513_v48 = vpop.permute.xlu2 %1512 }
0x15e5   :  { %v1515_v50 = vmul.f32 %v1513_v48, %v1507_v49 }
0x15e7   :  { %1517 = vrot.lane.b32.xlu0 %v1515_v50, %s3634_s17 }
0x1659   :  { %v1518_v52 = vpop.permute.xlu0 %1517 }
0x165a   :  { %v4086_v53 = vadd.f32 %v1518_v52, %v1510_v51 }
0x165c   :  { %3261 = vtanh.f32 %v4086_v53 }
0x1662   :  { %v3262_v54 = vpop.eup %3261 }
0x1663   :  { %1523 = vrot.lane.b32.xlu1 %v3262_v54, %s3623_s29 }
0x16d5   :  { %v1524_v57 = vpop.permute.xlu1 %1523 }
0x16d6   :  { %v1526_v58 = vmul.f32 %v1524_v57, %v1507_v49 }
0x16d8   :  { %v1527_v59 = vpack.c.bf16 %v1526_v58, %v1526_v58 }
0x16da   :  { %1529 = vrot.lane.b32.xlu2 %v1527_v59, %s3634_s17 }
0x1734   :  { %v1530_v60 = vpop.permute.xlu2 %1529 }
0x1735   :  { %2975 = vmatmul.msk.bf16.vlgmr.msrb.gmra.mxu0 %vm268_vm4, %v1530_v60 }
0x1736   :  { %1838 = vmatpush.bf16.msrb.mxu0 %v4120_v5 }
0x173a   :  { %1839 = vmatpush.bf16.msrb.mxu0 %v4126_v19 }
0x173e   :  { %1840 = vmatpush.bf16.msrb.mxu0 %v4133_v18 }
0x1742   :  { %1841 = vmatpush.bf16.msrb.mxu0 %v4140_v24 }
0x1745   :  { %3015 = vmatmul.msk.bf16.vlgmr.msra.gmra.mxu0 %vm268_vm4, %v1530_v60 }
0x1746   :  { %1842 = vmatpush.bf16.msrb.mxu0 %v4147_v33 }
0x174a   :  { %1843 = vmatpush.bf16.msrb.mxu0 %v4154_v35 }
0x174e   :  { %1844 = vmatpush.bf16.msrb.mxu0 %v4161_v32 }
0x1752   :  { %1845 = vmatpush.bf16.msrb.mxu0 %v4169_v23 }
0x1756   :  { %2071 = vmatpush.bf16.msra.mxu0 %v4013_v12 }
0x175a   :  { %2072 = vmatpush.bf16.msra.mxu0 %v4021_v14 }
0x17b2   :  { %v1555_v2 = vpop.f32.mrf.mxu0 }
0x17b3   :  { %v1556_v3 = vadd.f32 %v4108_v63, %v1555_v2 }
0x17b5   :  { %1560 = vst [vmem:[#allocation18 + $0x8] sm:$0xff] %v1556_v3  ;;  %v1562_v4 = vsel %vm1561_vm14, %v1556_v3, -1e+30 }
0x17b6   :  { %1563 = vmax.xlane.f32.xlu0 %v1562_v4 }
0x17ba   :  { %v1557_v6 = vpop.f32.mrf.mxu0 }
0x17c2   :  { %v4114_v8 = vpop.f32.mrf.mxu0 }
0x17ca   :  { %v1734_v11 = vpop.f32.mrf.mxu0 }
0x1829   :  { %v1564_v10 = vpop.xlane.xlu0 %1563 }
0x182a   :  { %vm1565_vm15 = vcmp.eq.f32.partialorder %v1562_v4, %v1564_v10 }
0x182b   :  { %v1566_v15 = vsel %vm1565_vm15, %v4103_v62, 128 }
0x182c   :  { %v1568_v17 = vshra.s32 %v1566_v15, 16  ;;  %v1567_v36 = vand.u32 65535, %v1566_v15 }
0x182e   :  { %v1570_v16 = vcvt.s32.f32 %v1568_v17  ;;  %v1569_v38 = vcvt.s32.f32 %v1567_v36 }
0x1830   :  { %1571 = vmin.xlane.f32.xlu1 %v1570_v16 }
0x18a3   :  { %v1572_v26 = vpop.xlane.xlu1 %1571 }
0x18a4   :  { %vm1573_vm1 = vcmp.eq.f32.partialorder %v1570_v16, %v1572_v26  ;;  %v1578_v40 = vcvt.f32.s32 %v1572_v26 }
0x18a5   :  { %v1574_v39 = vsel %vm1573_vm1, %v1569_v38, inf }
0x18a6   :  { %1575 = vmin.xlane.f32.xlu2 %v1574_v39  ;;  %v1579_v1 = vshll.u32 %v1578_v40, 16 }
0x1919   :  { %v1576_v41 = vpop.xlane.xlu2 %1575 }
0x191a   :  { %v1577_v42 = vcvt.f32.s32 %v1576_v41 }
0x191c   :  { %v1580_v43 = vadd.s32 %v1579_v1, %v1577_v42 }
0x191e   :  { %vm1581_vm2 = vcmp.eq.s32.totalorder %v4103_v62, %v1580_v43 }
0x191f   :  { %vm3009_vm3 = vmpackc.low %vm1581_vm2, %vm1581_vm2 }
0x1920   :  { %3010 = vmatmul.msk.bf16.vlgmr.msrb.gmra.mxu1 %vm3009_vm3, %v3635_v44 }
0x1921   :  { %1953 = vmatpush.bf16.msrb.mxu1 %v4053_v21 }
0x1925   :  { %1954 = vmatpush.bf16.msrb.mxu1 %v4056_v9 }
0x199d   :  { %v1642_v28 = vpop.f32.mrf.mxu1 }
0x199e   :  { %v1646_v46 = vpack.c.bf16 %v1642_v28, %v1642_v28 }
0x19a0   :  { %v1654_v37 = vsel %vm1653_vm5, %v1648_v27, %v1646_v46 }
0x19a1   :  { %3013 = vmatmul.msk.bf16.vlgmr.msrb.gmra.mxu3 %vm1370_vm0, %v1654_v37 }
0x19a2   :  { %1934 = vmatpush.bf16.msrb.mxu3 %v4061_v31 }
0x19a5   :  { %v1644_v29 = vpop.f32.mrf.mxu1 }
0x19a6   :  { %1935 = vmatpush.bf16.msrb.mxu3 %v4064_v34 }
0x1a24   :  { %v1680_v30 = vpop.f32.mrf.mxu3 }
0x1a25   :  { %v1681_v20 = vadd.f32 %v1680_v30, %v4082_v0 }
0x1a27   :  { %v1684_v47 = vadd.f32 %v4034_v25, %v1681_v20 }
0x1a29   :  { %3263 = vtanh.f32 %v1684_v47  ;;  %v3014_v50 = vmul.f32 -1.442695, %v1684_v47 }
0x1a2b   :  { %3265 = vpow2.f32 %v3014_v50 }
0x1a2c   :  { %v1682_v48 = vpop.f32.mrf.mxu3 }
0x1a2f   :  { %v3264_v49 = vpop.eup %3263 }
0x1a30   :  { %1707 = vrot.lane.b32.xlu2 %v3264_v49, %s3623_s29 }
0x1a31   :  { %v3266_v51 = vpop.eup %3265 }
0x1a32   :  { %v1688_v52 = vadd.f32 1.0, %v3266_v51 }
0x1a34   :  { %3267 = vrcp.f32 %v1688_v52  ;;  %v1700_v61 = vand.u32 2147483648, %v1688_v52  ;;  %vm1694_vm7 = vweird.f32 %v1688_v52  ;;  %v1698_v0 = vand.u32 2147483647, %v1688_v52 }
0x1a36   :  { %v1701_v3 = vor.u32 1.1754944e-38, %v1700_v61  ;;  %vm1699_vm9 = vcmp.eq.f32.partialorder %v1698_v0, 8.507059e+37 }
0x1a3a   :  { %v3268_v54 = vpop.eup %3267 }
0x1a3b   :  { %v1690_v57 = vmul.f32 %v3268_v54, %v1688_v52  ;;  %vm1695_vm6 = vweird.f32 %v3268_v54 }
0x1a3c   :  { %vm1696_vm8 = vmor %vm1694_vm7, %vm1695_vm6 }
0x1a3d   :  { %v1691_v58 = vsub.f32 1.0, %v1690_v57 }
0x1a3f   :  { %v1692_v59 = vmul.f32 %v3268_v54, %v1691_v58 }
0x1a41   :  { %v1693_v60 = vadd.f32 %v3268_v54, %v1692_v59 }
0x1a43   :  { %v1697_v2 = vsel %vm1696_vm8, %v3268_v54, %v1693_v60 }
0x1a44   :  { %v1702_v6 = vsel %vm1699_vm9, %v1701_v3, %v1697_v2 }
0x1a45   :  { %v1705_v10 = vmul.f32 %v1702_v6, %v4043_v7 }
0x1a8a   :  { %v1708_v4 = vpop.permute.xlu2 %1707 }
0x1a8b   :  { %v1710_v11 = vmul.f32 %v1708_v4, %v1702_v6 }
0x1a8d   :  { %1712 = vrot.lane.b32.xlu0 %v1710_v11, %s3634_s17 }
0x1aff   :  { %v1713_v15 = vpop.permute.xlu0 %1712 }
0x1b00   :  { %v4189_v17 = vadd.f32 %v1713_v15, %v1705_v10 }
0x1b02   :  { %3269 = vtanh.f32 %v4189_v17 }
0x1b08   :  { %v3270_v16 = vpop.eup %3269 }
0x1b09   :  { %1718 = vrot.lane.b32.xlu1 %v3270_v16, %s3623_s29 }
0x1b7b   :  { %v1719_v36 = vpop.permute.xlu1 %1718 }
0x1b7c   :  { %v1721_v26 = vmul.f32 %v1719_v36, %v1702_v6 }
0x1b7e   :  { %v1722_v38 = vpack.c.bf16 %v1721_v26, %v1721_v26 }
0x1b80   :  { %1737 = vrot.lane.b32.xlu0 %v1722_v38, %s3634_s17 }
0x1bf2   :  { %v1738_v39 = vpop.permute.xlu0 %1737 }
0x1bf3   :  { %3016 = vmatmul.msk.bf16.vlgmr.msra.gmra.mxu2 %vm268_vm4, %v1738_v39  ;;  %3023 = vmatmul.msk.bf16.vlgmr.msra.gmra.mxu1 %vm268_vm4, %v1738_v39 }
0x1bf4   :  { %2011 = vmatpush.bf16.msra.mxu2 %v4090_v55  ;;  %2088 = vmatpush.bf16.msra.mxu1 %v4018_v13 }
0x1bf8   :  { %2012 = vmatpush.bf16.msra.mxu2 %v4093_v56 }
0x1c70   :  { %v4199_v7 = vpop.f32.mrf.mxu1 }
0x1c76   :  { %v1751_v40 = vpop.f32.mrf.mxu2 }
0x1c77   :  { %v1752_v41 = vadd.f32 %v1751_v40, %v4114_v8 }
0x1c78   :  { %v1871_v1 = vpop.f32.mrf.mxu1 }
0x1c79   :  { %v1755_v42 = vadd.f32 %v4078_v22, %v1752_v41 }
0x1c7b   :  { %3271 = vtanh.f32 %v1755_v42  ;;  %v3017_v28 = vmul.f32 -1.442695, %v1755_v42 }
0x1c7d   :  { %3273 = vpow2.f32 %v3017_v28 }
0x1c7e   :  { %v1753_v43 = vpop.f32.mrf.mxu2 }
0x1c81   :  { %v3272_v45 = vpop.eup %3271 }
0x1c82   :  { %1778 = vrot.lane.b32.xlu2 %v3272_v45, %s3623_s29 }
0x1c83   :  { %v3274_v27 = vpop.eup %3273 }
0x1c84   :  { %v1759_v46 = vadd.f32 1.0, %v3274_v27 }
0x1c86   :  { %3275 = vrcp.f32 %v1759_v46  ;;  %v1771_v8 = vand.u32 2147483648, %v1759_v46  ;;  %vm1765_vm11 = vweird.f32 %v1759_v46  ;;  %v1769_v48 = vand.u32 2147483647, %v1759_v46 }
0x1c88   :  { %v1772_v50 = vor.u32 1.1754944e-38, %v1771_v8  ;;  %vm1770_vm13 = vcmp.eq.f32.partialorder %v1769_v48, 8.507059e+37 }
0x1c8c   :  { %v3276_v37 = vpop.eup %3275 }
0x1c8d   :  { %v1761_v29 = vmul.f32 %v3276_v37, %v1759_v46  ;;  %vm1766_vm10 = vweird.f32 %v3276_v37  ;;  %v1857_v46 = vstv %s1856_s30 }
0x1c8e   :  { %vm1767_vm12 = vmor %vm1765_vm11, %vm1766_vm10  ;;  %vm1858_vm5 = vcmp.eq.s32.totalorder %v1857_v46, 1 }
0x1c8f   :  { %v1762_v30 = vsub.f32 1.0, %v1761_v29  ;;  %v1853_v29 = vld [vmem:[#allocation6 + $0x8] sm:$0xf] }
0x1c91   :  { %v1763_v20 = vmul.f32 %v3276_v37, %v1762_v30 }
0x1c93   :  { %v1764_v47 = vadd.f32 %v3276_v37, %v1763_v20 }
0x1c95   :  { %v1768_v49 = vsel %vm1767_vm12, %v3276_v37, %v1764_v47 }
0x1c96   :  { %v1773_v52 = vsel %vm1770_vm13, %v1772_v50, %v1768_v49 }
0x1c97   :  { %v1776_v57 = vmul.f32 %v1773_v52, %v4086_v53 }
0x1cdc   :  { %v1779_v51 = vpop.permute.xlu2 %1778 }
0x1cdd   :  { %v1781_v54 = vmul.f32 %v1779_v51, %v1773_v52 }
0x1cdf   :  { %1783 = vrot.lane.b32.xlu1 %v1781_v54, %s3634_s17 }
0x1d51   :  { %v1784_v58 = vpop.permute.xlu1 %1783 }
0x1d52   :  { %v4206_v59 = vadd.f32 %v1784_v58, %v1776_v57 }
0x1d54   :  { %3277 = vtanh.f32 %v4206_v59 }
0x1d5a   :  { %v3278_v60 = vpop.eup %3277 }
0x1d5b   :  { %1789 = vrot.lane.b32.xlu0 %v3278_v60, %s3623_s29 }
0x1dcd   :  { %v1790_v61 = vpop.permute.xlu0 %1789 }
0x1dce   :  { %v1792_v0 = vmul.f32 %v1790_v61, %v1773_v52 }
0x1dd0   :  { %v1793_v2 = vpack.c.bf16 %v1792_v0, %v1792_v0 }
0x1dd2   :  { %1795 = vrot.lane.b32.xlu2 %v1793_v2, %s3634_s17 }
0x1e2c   :  { %v1796_v3 = vpop.permute.xlu2 %1795 }
0x1e2d   :  { %3018 = vmatmul.msk.bf16.vlgmr.msra.gmra.mxu3 %vm268_vm4, %v1796_v3 }
0x1e2e   :  { %2043 = vmatpush.bf16.msra.mxu3 %v4120_v5 }
0x1e32   :  { %2044 = vmatpush.bf16.msra.mxu3 %v4126_v19 }
0x1e36   :  { %2045 = vmatpush.bf16.msra.mxu3 %v4133_v18 }
0x1e3a   :  { %2046 = vmatpush.bf16.msra.mxu3 %v4140_v24 }
0x1e3d   :  { %3026 = vmatmul.msk.bf16.vlgmr.msrb.gmra.mxu3 %vm268_vm4, %v1796_v3 }
0x1e3e   :  { %2047 = vmatpush.bf16.msra.mxu3 %v4147_v33 }
0x1e42   :  { %2048 = vmatpush.bf16.msra.mxu3 %v4154_v35 }
0x1e46   :  { %2049 = vmatpush.bf16.msra.mxu3 %v4161_v32 }
0x1e4a   :  { %2050 = vmatpush.bf16.msra.mxu3 %v4169_v23 }
0x1e4e   :  { %2276 = vmatpush.bf16.msrb.mxu3 %v4013_v12 }
0x1e52   :  { %2277 = vmatpush.bf16.msrb.mxu3 %v4021_v14 }
0x1eb0   :  { %v1809_v53 = vpop.f32.mrf.mxu3 }
0x1eb1   :  { %v1810_v4 = vadd.f32 %v4108_v63, %v1809_v53 }
0x1eb3   :  { %1814 = vst [vmem:[#allocation18 + $0x10] sm:$0xff] %v1810_v4  ;;  %v1815_v6 = vsel %vm1561_vm14, %v1810_v4, -1e+30 }
0x1eb4   :  { %1816 = vmax.xlane.f32.xlu1 %v1815_v6 }
0x1eb8   :  { %v1811_v11 = vpop.f32.mrf.mxu3 }
0x1ec0   :  { %v4226_v10 = vpop.f32.mrf.mxu3 }
0x1ec8   :  { %v1939_v15 = vpop.f32.mrf.mxu3 }
0x1f27   :  { %v1817_v16 = vpop.xlane.xlu1 %1816 }
0x1f28   :  { %vm1818_vm15 = vcmp.eq.f32.partialorder %v1815_v6, %v1817_v16 }
0x1f29   :  { %v1819_v36 = vsel %vm1818_vm15, %v4103_v62, 128 }
0x1f2a   :  { %v1821_v26 = vshra.s32 %v1819_v36, 16  ;;  %v1820_v39 = vand.u32 65535, %v1819_v36 }
0x1f2c   :  { %v1823_v38 = vcvt.s32.f32 %v1821_v26  ;;  %v1822_v41 = vcvt.s32.f32 %v1820_v39 }
0x1f2e   :  { %1824 = vmin.xlane.f32.xlu0 %v1823_v38 }
0x1fa1   :  { %v1825_v40 = vpop.xlane.xlu0 %1824 }
0x1fa2   :  { %vm1826_vm1 = vcmp.eq.f32.partialorder %v1823_v38, %v1825_v40  ;;  %v1831_v42 = vcvt.f32.s32 %v1825_v40 }
0x1fa3   :  { %v1827_v1 = vsel %vm1826_vm1, %v1822_v41, inf }
0x1fa4   :  { %1828 = vmin.xlane.f32.xlu2 %v1827_v1  ;;  %v1832_v45 = vshll.u32 %v1831_v42, 16 }
0x2017   :  { %v1829_v43 = vpop.xlane.xlu2 %1828 }
0x2018   :  { %v1830_v28 = vcvt.f32.s32 %v1829_v43 }
0x201a   :  { %v1833_v27 = vadd.s32 %v1832_v45, %v1830_v28 }
0x201c   :  { %vm1834_vm2 = vcmp.eq.s32.totalorder %v4103_v62, %v1833_v27 }
0x201d   :  { %vm3020_vm3 = vmpackc.low %vm1834_vm2, %vm1834_vm2 }
0x201e   :  { %3021 = vmatmul.msk.bf16.vlgmr.msrb.gmra.mxu0 %vm3020_vm3, %v3635_v44 }
0x201f   :  { %2158 = vmatpush.bf16.msrb.mxu0 %v4053_v21 }
0x2023   :  { %2159 = vmatpush.bf16.msrb.mxu0 %v4056_v9 }
0x209b   :  { %v1847_v37 = vpop.f32.mrf.mxu0 }
0x209c   :  { %v1851_v30 = vpack.c.bf16 %v1847_v37, %v1847_v37 }
0x209e   :  { %v1859_v20 = vsel %vm1858_vm5, %v1853_v29, %v1851_v30 }
0x209f   :  { %3024 = vmatmul.msk.bf16.vlgmr.msrb.gmra.mxu2 %vm1370_vm0, %v1859_v20 }
0x20a0   :  { %2139 = vmatpush.bf16.msrb.mxu2 %v4061_v31 }
0x20a3   :  { %v1849_v47 = vpop.f32.mrf.mxu0 }
0x20a4   :  { %2140 = vmatpush.bf16.msrb.mxu2 %v4064_v34 }
0x2122   :  { %v1885_v8 = vpop.f32.mrf.mxu2 }
0x2123   :  { %v1886_v48 = vadd.f32 %v1885_v8, %v4199_v7 }
0x2125   :  { %v1889_v49 = vadd.f32 %v4034_v25, %v1886_v48 }
0x2127   :  { %3279 = vtanh.f32 %v1889_v49  ;;  %v3025_v52 = vmul.f32 -1.442695, %v1889_v49 }
0x2129   :  { %3281 = vpow2.f32 %v3025_v52 }
0x212a   :  { %v1887_v50 = vpop.f32.mrf.mxu2 }
0x212d   :  { %v3280_v51 = vpop.eup %3279 }
0x212e   :  { %1912 = vrot.lane.b32.xlu1 %v3280_v51, %s3623_s29 }
0x212f   :  { %v3282_v54 = vpop.eup %3281 }
0x2130   :  { %v1893_v57 = vadd.f32 1.0, %v3282_v54 }
0x2132   :  { %3283 = vrcp.f32 %v1893_v57  ;;  %v1905_v3 = vand.u32 2147483648, %v1893_v57  ;;  %vm1899_vm7 = vweird.f32 %v1893_v57  ;;  %v1903_v7 = vand.u32 2147483647, %v1893_v57 }
0x2134   :  { %v1906_v53 = vor.u32 1.1754944e-38, %v1905_v3  ;;  %vm1904_vm9 = vcmp.eq.f32.partialorder %v1903_v7, 8.507059e+37 }
0x2138   :  { %v3284_v58 = vpop.eup %3283 }
0x2139   :  { %v1895_v60 = vmul.f32 %v3284_v58, %v1893_v57  ;;  %vm1900_vm6 = vweird.f32 %v3284_v58 }
0x213a   :  { %vm1901_vm8 = vmor %vm1899_vm7, %vm1900_vm6 }
0x213b   :  { %v1896_v61 = vsub.f32 1.0, %v1895_v60 }
0x213d   :  { %v1897_v0 = vmul.f32 %v3284_v58, %v1896_v61 }
0x213f   :  { %v1898_v2 = vadd.f32 %v3284_v58, %v1897_v0 }
0x2141   :  { %v1902_v25 = vsel %vm1901_vm8, %v3284_v58, %v1898_v2 }
0x2142   :  { %v1907_v6 = vsel %vm1904_vm9, %v1906_v53, %v1902_v25 }
0x2143   :  { %v1910_v15 = vmul.f32 %v1907_v6, %v4189_v17 }
0x21a0   :  { %v1913_v4 = vpop.permute.xlu1 %1912 }
0x21a1   :  { %v1915_v11 = vmul.f32 %v1913_v4, %v1907_v6 }
0x21a3   :  { %1917 = vrot.lane.b32.xlu0 %v1915_v11, %s3634_s17 }
0x2215   :  { %v1918_v16 = vpop.permute.xlu0 %1917 }
0x2216   :  { %v4241_v36 = vadd.f32 %v1918_v16, %v1910_v15 }
0x2218   :  { %3285 = vtanh.f32 %v4241_v36 }
0x221e   :  { %v3286_v26 = vpop.eup %3285 }
0x221f   :  { %1923 = vrot.lane.b32.xlu2 %v3286_v26, %s3623_s29 }
0x2279   :  { %v1924_v38 = vpop.permute.xlu2 %1923 }
0x227a   :  { %v1926_v39 = vmul.f32 %v1924_v38, %v1907_v6 }
0x227c   :  { %v1927_v40 = vpack.c.bf16 %v1926_v39, %v1926_v39 }
0x227e   :  { %1942 = vrot.lane.b32.xlu0 %v1927_v40, %s3634_s17 }
0x22f0   :  { %v1943_v41 = vpop.permute.xlu0 %1942 }
0x22f1   :  { %3027 = vmatmul.msk.bf16.vlgmr.msrb.gmra.mxu1 %vm268_vm4, %v1943_v41  ;;  %3034 = vmatmul.msk.bf16.vlgmr.msra.gmra.mxu0 %vm268_vm4, %v1943_v41 }
0x22f2   :  { %2216 = vmatpush.bf16.msrb.mxu1 %v4090_v55  ;;  %2293 = vmatpush.bf16.msra.mxu0 %v4018_v13 }
0x22f6   :  { %2217 = vmatpush.bf16.msrb.mxu1 %v4093_v56 }
0x236e   :  { %v1956_v17 = vpop.f32.mrf.mxu1  ;;  %v4251_v1 = vpop.f32.mrf.mxu0 }
0x236f   :  { %v1957_v42 = vadd.f32 %v1956_v17, %v4226_v10 }
0x2371   :  { %v1960_v43 = vadd.f32 %v4078_v22, %v1957_v42 }
0x2373   :  { %3287 = vtanh.f32 %v1960_v43  ;;  %v3028_v46 = vmul.f32 -1.442695, %v1960_v43 }
0x2375   :  { %3289 = vpow2.f32 %v3028_v46  ;;  %v2058_v46 = vld [vmem:[#allocation6 + $0xc] sm:$0xf] }
0x2376   :  { %v1958_v45 = vpop.f32.mrf.mxu1  ;;  %v2076_v28 = vpop.f32.mrf.mxu0 }
0x2377   :  { %v2062_v28 = vstv %s2061_s19 }
0x2378   :  { %vm2063_vm5 = vcmp.eq.s32.totalorder %v2062_v28, 1 }
0x2379   :  { %v3288_v27 = vpop.eup %3287 }
0x237a   :  { %1983 = vrot.lane.b32.xlu1 %v3288_v27, %s3623_s29 }
0x237b   :  { %v3290_v37 = vpop.eup %3289 }
0x237c   :  { %v1964_v29 = vadd.f32 1.0, %v3290_v37 }
0x237e   :  { %3291 = vrcp.f32 %v1964_v29  ;;  %v1976_v10 = vand.u32 2147483648, %v1964_v29  ;;  %vm1970_vm11 = vweird.f32 %v1964_v29  ;;  %v1974_v48 = vand.u32 2147483647, %v1964_v29 }
0x2380   :  { %v1977_v50 = vor.u32 1.1754944e-38, %v1976_v10  ;;  %vm1975_vm13 = vcmp.eq.f32.partialorder %v1974_v48, 8.507059e+37 }
0x2384   :  { %v3292_v13 = vpop.eup %3291 }
0x2385   :  { %v1966_v30 = vmul.f32 %v3292_v13, %v1964_v29  ;;  %vm1971_vm10 = vweird.f32 %v3292_v13 }
0x2386   :  { %vm1972_vm12 = vmor %vm1970_vm11, %vm1971_vm10 }
0x2387   :  { %v1967_v20 = vsub.f32 1.0, %v1966_v30 }
0x2389   :  { %v1968_v47 = vmul.f32 %v3292_v13, %v1967_v20 }
0x238b   :  { %v1969_v8 = vadd.f32 %v3292_v13, %v1968_v47 }
0x238d   :  { %v1973_v49 = vsel %vm1972_vm12, %v3292_v13, %v1969_v8 }
0x238e   :  { %v1978_v52 = vsel %vm1975_vm13, %v1977_v50, %v1973_v49 }
0x238f   :  { %v1981_v57 = vmul.f32 %v1978_v52, %v4206_v59 }
0x23ec   :  { %v1984_v51 = vpop.permute.xlu1 %1983 }
0x23ed   :  { %v1986_v54 = vmul.f32 %v1984_v51, %v1978_v52 }
0x23ef   :  { %1988 = vrot.lane.b32.xlu2 %v1986_v54, %s3634_s17 }
0x2449   :  { %v1989_v58 = vpop.permute.xlu2 %1988 }
0x244a   :  { %v4258_v60 = vadd.f32 %v1989_v58, %v1981_v57 }
0x244c   :  { %3293 = vtanh.f32 %v4258_v60 }
0x2452   :  { %v3294_v61 = vpop.eup %3293 }
0x2453   :  { %1994 = vrot.lane.b32.xlu0 %v3294_v61, %s3623_s29 }
0x24c5   :  { %v1995_v0 = vpop.permute.xlu0 %1994 }
0x24c6   :  { %v1997_v2 = vmul.f32 %v1995_v0, %v1978_v52 }
0x24c8   :  { %v1998_v3 = vpack.c.bf16 %v1997_v2, %v1997_v2 }
0x24ca   :  { %2000 = vrot.lane.b32.xlu1 %v1998_v3, %s3634_s17 }
0x253c   :  { %v2001_v7 = vpop.permute.xlu1 %2000 }
0x253d   :  { %3029 = vmatmul.msk.bf16.vlgmr.msra.gmra.mxu2 %vm268_vm4, %v2001_v7 }
0x253e   :  { %2248 = vmatpush.bf16.msra.mxu2 %v4120_v5 }
0x2542   :  { %2249 = vmatpush.bf16.msra.mxu2 %v4126_v19 }
0x2546   :  { %2250 = vmatpush.bf16.msra.mxu2 %v4133_v18 }
0x254a   :  { %2251 = vmatpush.bf16.msra.mxu2 %v4140_v24 }
0x254d   :  { %3037 = vmatmul.msk.bf16.vlgmr.msrb.gmra.mxu2 %vm268_vm4, %v2001_v7 }
0x254e   :  { %2252 = vmatpush.bf16.msra.mxu2 %v4147_v33 }
0x2552   :  { %2253 = vmatpush.bf16.msra.mxu2 %v4154_v35 }
0x2556   :  { %2254 = vmatpush.bf16.msra.mxu2 %v4161_v32 }
0x255a   :  { %2255 = vmatpush.bf16.msra.mxu2 %v4169_v23 }
0x255e   :  { %2481 = vmatpush.bf16.msrb.mxu2 %v4013_v12 }
0x2562   :  { %2482 = vmatpush.bf16.msrb.mxu2 %v4021_v14 }
0x25c0   :  { %v2014_v59 = vpop.f32.mrf.mxu2 }
0x25c1   :  { %v2015_v25 = vadd.f32 %v4108_v63, %v2014_v59 }
0x25c3   :  { %2019 = vst [vmem:[#allocation18 + $0x18] sm:$0xff] %v2015_v25  ;;  %v2020_v53 = vsel %vm1561_vm14, %v2015_v25, -1e+30 }
0x25c4   :  { %2021 = vmax.xlane.f32.xlu2 %v2020_v53 }
0x25c8   :  { %v2016_v4 = vpop.f32.mrf.mxu2 }
0x25d0   :  { %v4278_v6 = vpop.f32.mrf.mxu2 }
0x25d8   :  { %v2144_v11 = vpop.f32.mrf.mxu2 }
0x2637   :  { %v2022_v15 = vpop.xlane.xlu2 %2021 }
0x2638   :  { %vm2023_vm15 = vcmp.eq.f32.partialorder %v2020_v53, %v2022_v15 }
0x2639   :  { %v2024_v16 = vsel %vm2023_vm15, %v4103_v62, 128 }
0x263a   :  { %v2026_v26 = vshra.s32 %v2024_v16, 16  ;;  %v2025_v14 = vand.u32 65535, %v2024_v16 }
0x263c   :  { %v2028_v12 = vcvt.s32.f32 %v2026_v26  ;;  %v2027_v39 = vcvt.s32.f32 %v2025_v14 }
0x263e   :  { %2029 = vmin.xlane.f32.xlu0 %v2028_v12 }
0x26b1   :  { %v2030_v38 = vpop.xlane.xlu0 %2029 }
0x26b2   :  { %vm2031_vm1 = vcmp.eq.f32.partialorder %v2028_v12, %v2030_v38  ;;  %v2036_v41 = vcvt.f32.s32 %v2030_v38 }
0x26b3   :  { %v2032_v40 = vsel %vm2031_vm1, %v2027_v39, inf }
0x26b4   :  { %2033 = vmin.xlane.f32.xlu1 %v2032_v40  ;;  %v2037_v42 = vshll.u32 %v2036_v41, 16 }
0x2727   :  { %v2034_v17 = vpop.xlane.xlu1 %2033 }
0x2728   :  { %v2035_v43 = vcvt.f32.s32 %v2034_v17 }
0x272a   :  { %v2038_v45 = vadd.s32 %v2037_v42, %v2035_v43 }
0x272c   :  { %vm2039_vm2 = vcmp.eq.s32.totalorder %v4103_v62, %v2038_v45 }
0x272d   :  { %vm3031_vm3 = vmpackc.low %vm2039_vm2, %vm2039_vm2 }
0x272e   :  { %3032 = vmatmul.msk.bf16.vlgmr.msra.gmra.mxu3 %vm3031_vm3, %v3635_v44 }
0x272f   :  { %2363 = vmatpush.bf16.msra.mxu3 %v4053_v21 }
0x2733   :  { %2364 = vmatpush.bf16.msra.mxu3 %v4056_v9  ;;  %v4292_v9 = vld [vmem:[%s4502_s9] ss:$0 sm:$0xff]  ;;  %s3637_s9 = smov [#allocation18]  }
0x2734   :  { %s2844_s20 = sshll.u32 %s3637_s9, 4  ;;  %s2845_s20 = int_to_ptr.vmem [resolvable:$true] %s2844_s20 }
0x27b1   :  { %v2052_v27 = vpop.f32.mrf.mxu3 }
0x27b2   :  { %v2056_v37 = vpack.c.bf16 %v2052_v27, %v2052_v27 }
0x27b4   :  { %v2064_v29 = vsel %vm2063_vm5, %v2058_v46, %v2056_v37 }
0x27b5   :  { %3035 = vmatmul.msk.bf16.vlgmr.msra.gmra.mxu1 %vm1370_vm0, %v2064_v29 }
0x27b6   :  { %2344 = vmatpush.bf16.msra.mxu1 %v4061_v31 }
0x27b9   :  { %v2054_v13 = vpop.f32.mrf.mxu3 }
0x27ba   :  { %2345 = vmatpush.bf16.msra.mxu1 %v4064_v34 }
0x2832   :  { %v2090_v30 = vpop.f32.mrf.mxu1 }
0x2833   :  { %v2091_v21 = vadd.f32 %v2090_v30, %v4251_v1 }
0x2835   :  { %v2094_v20 = vadd.f32 %v4292_v9, %v2091_v21 }
0x2837   :  { %3295 = vtanh.f32 %v2094_v20  ;;  %v3036_v10 = vmul.f32 -1.442695, %v2094_v20 }
0x2839   :  { %3297 = vpow2.f32 %v3036_v10 }
0x283a   :  { %v2092_v47 = vpop.f32.mrf.mxu1 }
0x283d   :  { %v3296_v8 = vpop.eup %3295 }
0x283e   :  { %2117 = vrot.lane.b32.xlu2 %v3296_v8, %s3623_s29 }
0x283f   :  { %v3298_v31 = vpop.eup %3297 }
0x2840   :  { %v2098_v48 = vadd.f32 1.0, %v3298_v31 }
0x2842   :  { %3299 = vrcp.f32 %v2098_v48  ;;  %v2110_v52 = vand.u32 2147483648, %v2098_v48  ;;  %vm2104_vm7 = vweird.f32 %v2098_v48  ;;  %v2108_v54 = vand.u32 2147483647, %v2098_v48 }
0x2844   :  { %v2111_v58 = vor.u32 1.1754944e-38, %v2110_v52  ;;  %vm2109_vm9 = vcmp.eq.f32.partialorder %v2108_v54, 8.507059e+37 }
0x2848   :  { %v3300_v34 = vpop.eup %3299 }
0x2849   :  { %v2100_v49 = vmul.f32 %v3300_v34, %v2098_v48  ;;  %vm2105_vm6 = vweird.f32 %v3300_v34 }
0x284a   :  { %vm2106_vm8 = vmor %vm2104_vm7, %vm2105_vm6 }
0x284b   :  { %v2101_v1 = vsub.f32 1.0, %v2100_v49 }
0x284d   :  { %v2102_v50 = vmul.f32 %v3300_v34, %v2101_v1 }
0x284f   :  { %v2103_v51 = vadd.f32 %v3300_v34, %v2102_v50 }
0x2851   :  { %v2107_v57 = vsel %vm2106_vm8, %v3300_v34, %v2103_v51  ;;  %v3363_v34 = vld [vmem:[#allocation12] sm:$0xff] }
0x2852   :  { %v2112_v0 = vsel %vm2109_vm9, %v2111_v58, %v2107_v57 }
0x2853   :  { %v2115_v3 = vmul.f32 %v2112_v0, %v4241_v36  ;;  %v4309_v36 = vld [vmem:[%s4500_s7] sm:$0xff]  ;;  %s3044_s7 = sld [smem:[#allocation2 + $0x4]] }
0x2859   :  { %p2265_p3 = scmp.ne.s32.totalorder %s3044_s7, 0 }
0x285b   :  { %s2266_s21 = scalar_select %p2265_p3, 1, 0 }
0x2898   :  { %v2118_v61 = vpop.permute.xlu2 %2117 }
0x2899   :  { %v2120_v2 = vmul.f32 %v2118_v61, %v2112_v0 }
0x289b   :  { %2122 = vrot.lane.b32.xlu0 %v2120_v2, %s3634_s17  ;;  %v4343_v2 = vld [vmem:[#allocation13 + $0x8] sm:$0xff] }
0x290d   :  { %v2123_v7 = vpop.permute.xlu0 %2122 }
0x290e   :  { %v4298_v59 = vadd.f32 %v2123_v7, %v2115_v3  ;;  %v4346_v3 = vld [vmem:[#allocation13] sm:$0xff]  ;;  %v2267_v7 = vstv %s2266_s21 }
0x290f   :  { %vm2268_vm5 = vcmp.eq.s32.totalorder %v2267_v7, 1 }
0x2910   :  { %3301 = vtanh.f32 %v4298_v59 }
0x2916   :  { %v3302_v25 = vpop.eup %3301 }
0x2917   :  { %2128 = vrot.lane.b32.xlu1 %v3302_v25, %s3623_s29 }
0x2989   :  { %v2129_v53 = vpop.permute.xlu1 %2128 }
0x298a   :  { %v2131_v4 = vmul.f32 %v2129_v53, %v2112_v0  ;;  %v2263_v53 = vld [vmem:[#allocation6 + $0x10] sm:$0xf] }
0x298c   :  { %v2132_v11 = vpack.c.bf16 %v2131_v4, %v2131_v4 }
0x298e   :  { %2147 = vrot.lane.b32.xlu0 %v2132_v11, %s3634_s17 }
0x2a00   :  { %v2148_v15 = vpop.permute.xlu0 %2147 }
0x2a01   :  { %3038 = vmatmul.msk.bf16.vlgmr.msrb.gmra.mxu0 %vm268_vm4, %v2148_v15  ;;  %3045 = vmatmul.msk.bf16.vlgmr.msrb.gmra.mxu3 %vm268_vm4, %v2148_v15  ;;  %v4350_v15 = vld [vmem:[#allocation15 + $0x8] sm:$0xff] }
0x2a02   :  { %2421 = vmatpush.bf16.msrb.mxu0 %v4090_v55  ;;  %2498 = vmatpush.bf16.msrb.mxu3 %v4309_v36 }
0x2a06   :  { %2422 = vmatpush.bf16.msrb.mxu0 %v4093_v56 }
0x2a7e   :  { %v2161_v16 = vpop.f32.mrf.mxu0 }
0x2a7f   :  { %v2162_v26 = vadd.f32 %v2161_v16, %v4278_v6 }
0x2a81   :  { %v2165_v12 = vadd.f32 %v4078_v22, %v2162_v26  ;;  %v4353_v26 = vld [vmem:[#allocation15] sm:$0xff] }
0x2a83   :  { %3303 = vtanh.f32 %v2165_v12  ;;  %v3039_v40 = vmul.f32 -1.442695, %v2165_v12 }
0x2a84   :  { %v4315_v14 = vpop.f32.mrf.mxu3 }
0x2a85   :  { %3305 = vpow2.f32 %v3039_v40 }
0x2a86   :  { %v2163_v38 = vpop.f32.mrf.mxu0 }
0x2a89   :  { %v3304_v39 = vpop.eup %3303 }
0x2a8a   :  { %2188 = vrot.lane.b32.xlu2 %v3304_v39, %s3623_s29 }
0x2a8b   :  { %v3306_v41 = vpop.eup %3305 }
0x2a8c   :  { %v2281_v55 = vpop.f32.mrf.mxu3  ;;  %v2169_v17 = vadd.f32 1.0, %v3306_v41 }
0x2a8e   :  { %3307 = vrcp.f32 %v2169_v17  ;;  %v2181_v22 = vand.u32 2147483648, %v2169_v17  ;;  %vm2175_vm11 = vweird.f32 %v2169_v17  ;;  %v2179_v28 = vand.u32 2147483647, %v2169_v17 }
0x2a90   :  { %v2182_v46 = vor.u32 1.1754944e-38, %v2181_v22  ;;  %vm2180_vm13 = vcmp.eq.f32.partialorder %v2179_v28, 8.507059e+37 }
0x2a94   :  { %v3308_v42 = vpop.eup %3307 }
0x2a95   :  { %v2171_v56 = vmul.f32 %v3308_v42, %v2169_v17  ;;  %vm2176_vm10 = vweird.f32 %v3308_v42 }
0x2a96   :  { %vm2177_vm12 = vmor %vm2175_vm11, %vm2176_vm10 }
0x2a97   :  { %v2172_v43 = vsub.f32 1.0, %v2171_v56 }
0x2a99   :  { %v2173_v45 = vmul.f32 %v3308_v42, %v2172_v43 }
0x2a9b   :  { %v2174_v6 = vadd.f32 %v3308_v42, %v2173_v45 }
0x2a9d   :  { %v2178_v27 = vsel %vm2177_vm12, %v3308_v42, %v2174_v6 }
0x2a9e   :  { %v2183_v29 = vsel %vm2180_vm13, %v2182_v46, %v2178_v27 }
0x2a9f   :  { %v2186_v30 = vmul.f32 %v2183_v29, %v4258_v60  ;;  %v3362_v60 = vld [vmem:[#allocation12 + $0x8] sm:$0xff] }
0x2ae4   :  { %v2189_v37 = vpop.permute.xlu2 %2188 }
0x2ae5   :  { %v2191_v13 = vmul.f32 %v2189_v37, %v2183_v29 }
0x2ae7   :  { %2193 = vrot.lane.b32.xlu1 %v2191_v13, %s3634_s17 }
0x2b59   :  { %v2194_v21 = vpop.permute.xlu1 %2193 }
0x2b5a   :  { %v4320_v20 = vadd.f32 %v2194_v21, %v2186_v30 }
0x2b5c   :  { %3309 = vtanh.f32 %v4320_v20 }
0x2b62   :  { %v3310_v47 = vpop.eup %3309 }
0x2b63   :  { %2199 = vrot.lane.b32.xlu0 %v3310_v47, %s3623_s29 }
0x2bd5   :  { %v2200_v8 = vpop.permute.xlu0 %2199 }
0x2bd6   :  { %v2202_v10 = vmul.f32 %v2200_v8, %v2183_v29 }
0x2bd8   :  { %v2203_v31 = vpack.c.bf16 %v2202_v10, %v2202_v10 }
0x2bda   :  { %2205 = vrot.lane.b32.xlu2 %v2203_v31, %s3634_s17 }
0x2c34   :  { %v2206_v48 = vpop.permute.xlu2 %2205 }
0x2c35   :  { %3040 = vmatmul.msk.bf16.vlgmr.msrb.gmra.mxu1 %vm268_vm4, %v2206_v48 }
0x2c36   :  { %2453 = vmatpush.bf16.msrb.mxu1 %v4120_v5 }
0x2c3a   :  { %2454 = vmatpush.bf16.msrb.mxu1 %v4126_v19 }
0x2c3e   :  { %2455 = vmatpush.bf16.msrb.mxu1 %v4133_v18 }
0x2c42   :  { %2456 = vmatpush.bf16.msrb.mxu1 %v4140_v24 }
0x2c45   :  { %3048 = vmatmul.msk.bf16.vlgmr.msra.gmra.mxu1 %vm268_vm4, %v2206_v48 }
0x2c46   :  { %2457 = vmatpush.bf16.msrb.mxu1 %v4147_v33 }
0x2c4a   :  { %2458 = vmatpush.bf16.msrb.mxu1 %v4154_v35 }
0x2c4e   :  { %2459 = vmatpush.bf16.msrb.mxu1 %v4161_v32 }
0x2c52   :  { %2460 = vmatpush.bf16.msrb.mxu1 %v4169_v23 }
0x2c56   :  { %2686 = vmatpush.bf16.msra.mxu1 %v3362_v60 }
0x2c5a   :  { %2687 = vmatpush.bf16.msra.mxu1 %v3363_v34  ;;  %v4368_v34 = vld [vmem:[#allocation16 + $0x8] sm:$0xff] }
0x2cb2   :  { %v2219_v5 = vpop.f32.mrf.mxu1 }
0x2cb3   :  { %v2220_v19 = vadd.f32 %v4108_v63, %v2219_v5 }
0x2cb5   :  { %2224 = vst [vmem:[#allocation18 + $0x20] sm:$0xff] %v2220_v19  ;;  %v2225_v18 = vsel %vm1561_vm14, %v2220_v19, -1e+30 }
0x2cb6   :  { %2226 = vmax.xlane.f32.xlu1 %v2225_v18 }
0x2cba   :  { %v2221_v24 = vpop.f32.mrf.mxu1 }
0x2cbb   :  { %v4381_v24 = vld [vmem:[%s4505_s12] ss:$0 sm:$0xff] }
0x2cc2   :  { %v4338_v33 = vpop.f32.mrf.mxu1 }
0x2cca   :  { %v2349_v35 = vpop.f32.mrf.mxu1 }
0x2d29   :  { %v2227_v49 = vpop.xlane.xlu1 %2226 }
0x2d2a   :  { %vm2228_vm15 = vcmp.eq.f32.partialorder %v2225_v18, %v2227_v49 }
0x2d2b   :  { %v2229_v32 = vsel %vm2228_vm15, %v4103_v62, 128 }
0x2d2c   :  { %v2231_v23 = vshra.s32 %v2229_v32, 16  ;;  %v2230_v50 = vand.u32 65535, %v2229_v32 }
0x2d2e   :  { %v2233_v1 = vcvt.s32.f32 %v2231_v23  ;;  %v2232_v52 = vcvt.s32.f32 %v2230_v50 }
0x2d30   :  { %2234 = vmin.xlane.f32.xlu0 %v2233_v1 }
0x2da3   :  { %v2235_v51 = vpop.xlane.xlu0 %2234 }
0x2da4   :  { %vm2236_vm1 = vcmp.eq.f32.partialorder %v2233_v1, %v2235_v51  ;;  %v2241_v54 = vcvt.f32.s32 %v2235_v51 }
0x2da5   :  { %v2237_v63 = vsel %vm2236_vm1, %v2232_v52, inf }
0x2da6   :  { %2238 = vmin.xlane.f32.xlu2 %v2237_v63  ;;  %v2242_v58 = vshll.u32 %v2241_v54, 16 }
0x2e19   :  { %v2239_v57 = vpop.xlane.xlu2 %2238 }
0x2e1a   :  { %v2240_v61 = vcvt.f32.s32 %v2239_v57 }
0x2e1c   :  { %v2243_v0 = vadd.s32 %v2242_v58, %v2240_v61 }
0x2e1e   :  { %vm2244_vm2 = vcmp.eq.s32.totalorder %v4103_v62, %v2243_v0 }
0x2e1f   :  { %vm3042_vm3 = vmpackc.low %vm2244_vm2, %vm2244_vm2 }
0x2e20   :  { %3043 = vmatmul.msk.bf16.vlgmr.msra.gmra.mxu2 %vm3042_vm3, %v3635_v44 }
0x2e21   :  { %2568 = vmatpush.bf16.msra.mxu2 %v4343_v2 }
0x2e25   :  { %2569 = vmatpush.bf16.msra.mxu2 %v4346_v3 }
0x2ea3   :  { %v2257_v25 = vpop.f32.mrf.mxu2 }
0x2ea4   :  { %v2261_v4 = vpack.c.bf16 %v2257_v25, %v2257_v25 }
0x2ea6   :  { %v2269_v11 = vsel %vm2268_vm5, %v2263_v53, %v2261_v4 }
0x2ea7   :  { %3046 = vmatmul.msk.bf16.vlgmr.msra.gmra.mxu0 %vm1370_vm0, %v2269_v11 }
0x2ea8   :  { %2549 = vmatpush.bf16.msra.mxu0 %v4350_v15 }
0x2eab   :  { %v2259_v16 = vpop.f32.mrf.mxu2 }
0x2eac   :  { %2550 = vmatpush.bf16.msra.mxu0 %v4353_v26 }
0x2f24   :  { %v2295_v12 = vpop.f32.mrf.mxu0 }
0x2f25   :  { %v2296_v38 = vadd.f32 %v2295_v12, %v4315_v14 }
0x2f27   :  { %v2299_v39 = vadd.f32 %v4292_v9, %v2296_v38 }
0x2f29   :  { %3311 = vtanh.f32 %v2299_v39  ;;  %v3047_v41 = vmul.f32 -1.442695, %v2299_v39 }
0x2f2b   :  { %3313 = vpow2.f32 %v3047_v41  ;;  %v3372_v41 = vld [vmem:[%s4506_s13 + $0x30] sm:$0xff] }
0x2f2c   :  { %v2297_v55 = vpop.f32.mrf.mxu0 }
0x2f2f   :  { %v3312_v40 = vpop.eup %3311 }
0x2f30   :  { %2322 = vrot.lane.b32.xlu1 %v3312_v40, %s3623_s29 }
0x2f31   :  { %v3314_v17 = vpop.eup %3313 }
0x2f32   :  { %v2303_v42 = vadd.f32 1.0, %v3314_v17  ;;  %v3373_v17 = vld [vmem:[%s4506_s13 + $0x28] sm:$0xff] }
0x2f34   :  { %3315 = vrcp.f32 %v2303_v42  ;;  %v2315_v28 = vand.u32 2147483648, %v2303_v42  ;;  %vm2309_vm7 = vweird.f32 %v2303_v42  ;;  %v2313_v14 = vand.u32 2147483647, %v2303_v42 }
0x2f36   :  { %v2316_v46 = vor.u32 1.1754944e-38, %v2315_v28  ;;  %vm2314_vm9 = vcmp.eq.f32.partialorder %v2313_v14, 8.507059e+37  ;;  %v4421_v28 = vld [vmem:[%s4508_s15] ss:$0 sm:$0xff] }
0x2f3a   :  { %v3316_v56 = vpop.eup %3315 }
0x2f3b   :  { %v2305_v43 = vmul.f32 %v3316_v56, %v2303_v42  ;;  %vm2310_vm6 = vweird.f32 %v3316_v56  ;;  %v3374_v42 = vld [vmem:[%s4506_s13 + $0x20] sm:$0xff] }
0x2f3c   :  { %vm2311_vm8 = vmor %vm2309_vm7, %vm2310_vm6 }
0x2f3d   :  { %v2306_v45 = vsub.f32 1.0, %v2305_v43  ;;  %v3376_v43 = vld [vmem:[%s4506_s13 + $0x10] sm:$0xff] }
0x2f3f   :  { %v2307_v6 = vmul.f32 %v3316_v56, %v2306_v45  ;;  %v3377_v45 = vld [vmem:[%s4506_s13 + $0x8] sm:$0xff] }
0x2f41   :  { %v2308_v22 = vadd.f32 %v3316_v56, %v2307_v6  ;;  %v3378_v6 = vld [vmem:[%s4506_s13] sm:$0xff] }
0x2f43   :  { %v2312_v27 = vsel %vm2311_vm8, %v3316_v56, %v2308_v22  ;;  %v3375_v56 = vld [vmem:[%s4506_s13 + $0x18] sm:$0xff] }
0x2f44   :  { %v2317_v29 = vsel %vm2314_vm9, %v2316_v46, %v2312_v27 }
0x2f45   :  { %v2320_v30 = vmul.f32 %v2317_v29, %v4298_v59  ;;  %v4372_v59 = vld [vmem:[#allocation16] sm:$0xff] }
0x2fa2   :  { %v2323_v37 = vpop.permute.xlu1 %2322 }
0x2fa3   :  { %v2325_v13 = vmul.f32 %v2323_v37, %v2317_v29 }
0x2fa5   :  { %2327 = vrot.lane.b32.xlu0 %v2325_v13, %s3634_s17 }
0x3017   :  { %v2328_v21 = vpop.permute.xlu0 %2327 }
0x3018   :  { %v4361_v47 = vadd.f32 %v2328_v21, %v2320_v30 }
0x301a   :  { %3317 = vtanh.f32 %v4361_v47 }
0x3020   :  { %v3318_v8 = vpop.eup %3317 }
0x3021   :  { %2333 = vrot.lane.b32.xlu2 %v3318_v8, %s3623_s29 }
0x307b   :  { %v2334_v10 = vpop.permute.xlu2 %2333 }
0x307c   :  { %v2336_v31 = vmul.f32 %v2334_v10, %v2317_v29 }
0x307e   :  { %v2337_v48 = vpack.c.bf16 %v2336_v31, %v2336_v31 }
0x3080   :  { %2352 = vrot.lane.b32.xlu0 %v2337_v48, %s3634_s17 }
0x30f2   :  { %v2353_v60 = vpop.permute.xlu0 %2352 }
0x30f3   :  { %3049 = vmatmul.msk.bf16.vlgmr.msra.gmra.mxu3 %vm268_vm4, %v2353_v60  ;;  %3056 = vmatmul.msk.bf16.vlgmr.msrb.gmra.mxu2 %vm268_vm4, %v2353_v60 }
0x30f4   :  { %2626 = vmatpush.bf16.msra.mxu3 %v4368_v34  ;;  %2703 = vmatpush.bf16.msrb.mxu2 %v4309_v36 }
0x30f8   :  { %2627 = vmatpush.bf16.msra.mxu3 %v4372_v59 }
0x3176   :  { %v2366_v5 = vpop.f32.mrf.mxu3  ;;  %v4375_v19 = vpop.f32.mrf.mxu2 }
0x3177   :  { %v2367_v18 = vadd.f32 %v2366_v5, %v4338_v33 }
0x3179   :  { %v2370_v35 = vadd.f32 %v4381_v24, %v2367_v18 }
0x317b   :  { %3319 = vtanh.f32 %v2370_v35  ;;  %v3050_v23 = vmul.f32 -1.442695, %v2370_v35 }
0x317d   :  { %3321 = vpow2.f32 %v3050_v23 }
0x317e   :  { %v2368_v49 = vpop.f32.mrf.mxu3  ;;  %v2486_v32 = vpop.f32.mrf.mxu2 }
0x3181   :  { %v3320_v36 = vpop.eup %3319 }
0x3182   :  { %2393 = vrot.lane.b32.xlu1 %v3320_v36, %s3623_s29 }
0x3183   :  { %v3322_v1 = vpop.eup %3321 }
0x3184   :  { %v2374_v50 = vadd.f32 1.0, %v3322_v1  ;;  %v2468_v1 = vld [vmem:[#allocation6 + $0x14] sm:$0xf] }
0x3186   :  { %3323 = vrcp.f32 %v2374_v50  ;;  %v2386_v57 = vand.u32 2147483648, %v2374_v50  ;;  %vm2380_vm11 = vweird.f32 %v2374_v50  ;;  %v2384_v58 = vand.u32 2147483647, %v2374_v50 }
0x3188   :  { %v2387_v0 = vor.u32 1.1754944e-38, %v2386_v57  ;;  %vm2385_vm13 = vcmp.eq.f32.partialorder %v2384_v58, 8.507059e+37 }
0x318c   :  { %v3324_v51 = vpop.eup %3323 }
0x318d   :  { %v2376_v33 = vmul.f32 %v3324_v51, %v2374_v50  ;;  %vm2381_vm10 = vweird.f32 %v3324_v51 }
0x318e   :  { %vm2382_vm12 = vmor %vm2380_vm11, %vm2381_vm10 }
0x318f   :  { %v2377_v52 = vsub.f32 1.0, %v2376_v33 }
0x3191   :  { %v2378_v63 = vmul.f32 %v3324_v51, %v2377_v52 }
0x3193   :  { %v2379_v54 = vadd.f32 %v3324_v51, %v2378_v63 }
0x3195   :  { %v2383_v61 = vsel %vm2382_vm12, %v3324_v51, %v2379_v54 }
0x3196   :  { %v2388_v25 = vsel %vm2385_vm13, %v2387_v0, %v2383_v61 }
0x3197   :  { %v2391_v4 = vmul.f32 %v2388_v25, %v4320_v20  ;;  %v3371_v20 = vld [vmem:[%s4506_s13 + $0x38] sm:$0xff]  ;;  %s3055_s13 = sld [smem:[#allocation2 + $0x5]] }
0x319d   :  { %p2470_p4 = scmp.ne.s32.totalorder %s3055_s13, 0 }
0x319f   :  { %s2471_s15 = scalar_select %p2470_p4, 1, 0 }
0x31a1   :  { %v2472_v36 = vstv %s2471_s15 }
0x31a2   :  { %vm2473_vm5 = vcmp.eq.s32.totalorder %v2472_v36, 1 }
0x31f4   :  { %v2394_v7 = vpop.permute.xlu1 %2393 }
0x31f5   :  { %v2396_v53 = vmul.f32 %v2394_v7, %v2388_v25 }
0x31f7   :  { %2398 = vrot.lane.b32.xlu2 %v2396_v53, %s3634_s17 }
0x3251   :  { %v2399_v11 = vpop.permute.xlu2 %2398 }
0x3252   :  { %v4387_v16 = vadd.f32 %v2399_v11, %v2391_v4 }
0x3254   :  { %3325 = vtanh.f32 %v4387_v16 }
0x325a   :  { %v3326_v12 = vpop.eup %3325 }
0x325b   :  { %2404 = vrot.lane.b32.xlu0 %v3326_v12, %s3623_s29 }
0x32cd   :  { %v2405_v38 = vpop.permute.xlu0 %2404 }
0x32ce   :  { %v2407_v39 = vmul.f32 %v2405_v38, %v2388_v25 }
0x32d0   :  { %v2408_v55 = vpack.c.bf16 %v2407_v39, %v2407_v39 }
0x32d2   :  { %2410 = vrot.lane.b32.xlu1 %v2408_v55, %s3634_s17 }
0x3344   :  { %v2411_v40 = vpop.permute.xlu1 %2410 }
0x3345   :  { %3051 = vmatmul.msk.bf16.vlgmr.msrb.gmra.mxu0 %vm268_vm4, %v2411_v40 }
0x3346   :  { %2658 = vmatpush.bf16.msrb.mxu0 %v3371_v20 }
0x334a   :  { %2659 = vmatpush.bf16.msrb.mxu0 %v3372_v41 }
0x334e   :  { %2660 = vmatpush.bf16.msrb.mxu0 %v3373_v17 }
0x3352   :  { %2661 = vmatpush.bf16.msrb.mxu0 %v3374_v42 }
0x3355   :  { %3059 = vmatmul.msk.bf16.vlgmr.msra.gmra.mxu0 %vm268_vm4, %v2411_v40 }
0x3356   :  { %2662 = vmatpush.bf16.msrb.mxu0 %v3375_v56 }
0x335a   :  { %2663 = vmatpush.bf16.msrb.mxu0 %v3376_v43 }
0x335e   :  { %2664 = vmatpush.bf16.msrb.mxu0 %v3377_v45 }
0x3362   :  { %2665 = vmatpush.bf16.msrb.mxu0 %v3378_v6 }
0x33c2   :  { %v2424_v22 = vpop.f32.mrf.mxu0 }
0x33c3   :  { %v2425_v14 = vadd.f32 %v4421_v28, %v2424_v22 }
0x33c5   :  { %2429 = vst [vmem:[#allocation18 + $0x28] sm:$0xff] %v2425_v14  ;;  %v2430_v27 = vsel %vm1561_vm14, %v2425_v14, -1e+30 }
0x33c6   :  { %2431 = vmax.xlane.f32.xlu2 %v2430_v27 }
0x33ca   :  { %v2426_v46 = vpop.f32.mrf.mxu0 }
0x33d2   :  { %v4426_v37 = vpop.f32.mrf.mxu0 }
0x33da   :  { %v2554_v29 = vpop.f32.mrf.mxu0 }
0x3439   :  { %v2432_v13 = vpop.xlane.xlu2 %2431 }
0x343a   :  { %vm2433_vm15 = vcmp.eq.f32.partialorder %v2430_v27, %v2432_v13 }
0x343b   :  { %v2434_v30 = vsel %vm2433_vm15, %v4103_v62, 128 }
0x343c   :  { %v2436_v21 = vshra.s32 %v2434_v30, 16  ;;  %v2435_v10 = vand.u32 65535, %v2434_v30 }
0x343e   :  { %v2438_v8 = vcvt.s32.f32 %v2436_v21  ;;  %v2437_v48 = vcvt.s32.f32 %v2435_v10 }
0x3440   :  { %2439 = vmin.xlane.f32.xlu0 %v2438_v8 }
0x34b3   :  { %v2440_v31 = vpop.xlane.xlu0 %2439 }
0x34b4   :  { %vm2441_vm1 = vcmp.eq.f32.partialorder %v2438_v8, %v2440_v31  ;;  %v2446_v5 = vcvt.f32.s32 %v2440_v31 }
0x34b5   :  { %v2442_v60 = vsel %vm2441_vm1, %v2437_v48, inf }
0x34b6   :  { %2443 = vmin.xlane.f32.xlu1 %v2442_v60  ;;  %v2447_v35 = vshll.u32 %v2446_v5, 16 }
0x3529   :  { %v2444_v18 = vpop.xlane.xlu1 %2443 }
0x352a   :  { %v2445_v49 = vcvt.f32.s32 %v2444_v18 }
0x352c   :  { %v2448_v32 = vadd.s32 %v2447_v35, %v2445_v49 }
0x352e   :  { %vm2449_vm2 = vcmp.eq.s32.totalorder %v4103_v62, %v2448_v32 }
0x352f   :  { %vm3053_vm3 = vmpackc.low %vm2449_vm2, %vm2449_vm2 }
0x3530   :  { %3054 = vmatmul.msk.bf16.vlgmr.msrb.gmra.mxu1 %vm3053_vm3, %v3635_v44 }
0x3531   :  { %2773 = vmatpush.bf16.msrb.mxu1 %v4343_v2 }
0x3535   :  { %2774 = vmatpush.bf16.msrb.mxu1 %v4346_v3 }
0x35ad   :  { %v2462_v23 = vpop.f32.mrf.mxu1 }
0x35ae   :  { %v2466_v50 = vpack.c.bf16 %v2462_v23, %v2462_v23 }
0x35b0   :  { %v2474_v51 = vsel %vm2473_vm5, %v2468_v1, %v2466_v50 }
0x35b1   :  { %3057 = vmatmul.msk.bf16.vlgmr.msrb.gmra.mxu3 %vm1370_vm0, %v2474_v51 }
0x35b2   :  { %2754 = vmatpush.bf16.msrb.mxu3 %v4350_v15 }
0x35b5   :  { %v2464_v33 = vpop.f32.mrf.mxu1 }
0x35b6   :  { %2755 = vmatpush.bf16.msrb.mxu3 %v4353_v26 }
0x3634   :  { %v2500_v52 = vpop.f32.mrf.mxu3 }
0x3635   :  { %v2501_v2 = vadd.f32 %v2500_v52, %v4375_v19 }
0x3637   :  { %v2504_v3 = vadd.f32 %v4292_v9, %v2501_v2 }
0x3639   :  { %3327 = vtanh.f32 %v2504_v3  ;;  %v3058_v57 = vmul.f32 -1.442695, %v2504_v3 }
0x363b   :  { %3329 = vpow2.f32 %v3058_v57 }
0x363c   :  { %v2502_v63 = vpop.f32.mrf.mxu3 }
0x363f   :  { %v3328_v54 = vpop.eup %3327 }
0x3640   :  { %2527 = vrot.lane.b32.xlu2 %v3328_v54, %s3623_s29 }
0x3641   :  { %v3330_v58 = vpop.eup %3329 }
0x3642   :  { %v2508_v61 = vadd.f32 1.0, %v3330_v58 }
0x3644   :  { %3331 = vrcp.f32 %v2508_v61  ;;  %v2520_v53 = vand.u32 2147483648, %v2508_v61  ;;  %vm2514_vm7 = vweird.f32 %v2508_v61  ;;  %v2518_v19 = vand.u32 2147483647, %v2508_v61 }
0x3646   :  { %v2521_v11 = vor.u32 1.1754944e-38, %v2520_v53  ;;  %vm2519_vm9 = vcmp.eq.f32.partialorder %v2518_v19, 8.507059e+37 }
0x364a   :  { %v3332_v0 = vpop.eup %3331 }
0x364b   :  { %v2510_v15 = vmul.f32 %v3332_v0, %v2508_v61  ;;  %vm2515_vm6 = vweird.f32 %v3332_v0 }
0x364c   :  { %vm2516_vm8 = vmor %vm2514_vm7, %vm2515_vm6 }
0x364d   :  { %v2511_v7 = vsub.f32 1.0, %v2510_v15 }
0x364f   :  { %v2512_v25 = vmul.f32 %v3332_v0, %v2511_v7 }
0x3651   :  { %v2513_v26 = vadd.f32 %v3332_v0, %v2512_v25 }
0x3653   :  { %v2517_v4 = vsel %vm2516_vm8, %v3332_v0, %v2513_v26 }
0x3654   :  { %v2522_v38 = vsel %vm2519_vm9, %v2521_v11, %v2517_v4 }
0x3655   :  { %v2525_v55 = vmul.f32 %v2522_v38, %v4361_v47 }
0x369a   :  { %v2528_v12 = vpop.permute.xlu2 %2527 }
0x369b   :  { %v2530_v39 = vmul.f32 %v2528_v12, %v2522_v38 }
0x369d   :  { %2532 = vrot.lane.b32.xlu0 %v2530_v39, %s3634_s17 }
0x370f   :  { %v2533_v40 = vpop.permute.xlu0 %2532 }
0x3710   :  { %v4441_v20 = vadd.f32 %v2533_v40, %v2525_v55  ;;  %v2673_v55 = vld [vmem:[#allocation6 + $0x18] sm:$0xf] }
0x3712   :  { %3333 = vtanh.f32 %v4441_v20 }
0x3718   :  { %v3334_v41 = vpop.eup %3333 }
0x3719   :  { %2538 = vrot.lane.b32.xlu1 %v3334_v41, %s3623_s29 }
0x378b   :  { %v2539_v17 = vpop.permute.xlu1 %2538 }
0x378c   :  { %v2541_v42 = vmul.f32 %v2539_v17, %v2522_v38  ;;  %v2677_v38 = vstv %s2676_s5 }
0x378d   :  { %vm2678_vm3 = vcmp.eq.s32.totalorder %v2677_v38, 1  ;;  %v3636_v38 = vmov 0.0  }
0x378e   :  { %v2542_v56 = vpack.c.bf16 %v2541_v42, %v2541_v42  ;;  %1335 = vst [vmem:[#allocation18] sm:$0xff] %v3636_v38 }
0x3790   :  { %2557 = vrot.lane.b32.xlu2 %v2542_v56, %s3634_s17 }
0x37ea   :  { %v2558_v43 = vpop.permute.xlu2 %2557 }
0x37eb   :  { %3060 = vmatmul.msk.bf16.vlgmr.msra.gmra.mxu2 %vm268_vm4, %v2558_v43  ;;  %3067 = vmatmul.msk.bf16.vlgmr.msra.gmra.mxu1 %vm268_vm4, %v2558_v43 }
0x37ec   :  { %2831 = vmatpush.bf16.msra.mxu2 %v4368_v34 }
0x37f0   :  { %2832 = vmatpush.bf16.msra.mxu2 %v4372_v59 }
0x3868   :  { %v4450_v47 = vpop.f32.mrf.mxu1 }
0x386e   :  { %v2571_v45 = vpop.f32.mrf.mxu2 }
0x386f   :  { %v2572_v6 = vadd.f32 %v2571_v45, %v4426_v37 }
0x3870   :  { %v2691_v22 = vpop.f32.mrf.mxu1 }
0x3871   :  { %v2575_v14 = vadd.f32 %v4381_v24, %v2572_v6 }
0x3873   :  { %3335 = vtanh.f32 %v2575_v14  ;;  %v3061_v29 = vmul.f32 -1.442695, %v2575_v14 }
0x3875   :  { %3337 = vpow2.f32 %v3061_v29 }
0x3876   :  { %v2573_v27 = vpop.f32.mrf.mxu2 }
0x3879   :  { %v3336_v46 = vpop.eup %3335 }
0x387a   :  { %2598 = vrot.lane.b32.xlu0 %v3336_v46, %s3623_s29 }
0x387b   :  { %v3338_v13 = vpop.eup %3337 }
0x387c   :  { %v2579_v30 = vadd.f32 1.0, %v3338_v13 }
0x387e   :  { %3339 = vrcp.f32 %v2579_v30  ;;  %v2591_v37 = vand.u32 2147483648, %v2579_v30  ;;  %vm2585_vm11 = vweird.f32 %v2579_v30  ;;  %v2589_v31 = vand.u32 2147483647, %v2579_v30 }
0x3880   :  { %v2592_v60 = vor.u32 1.1754944e-38, %v2591_v37  ;;  %vm2590_vm13 = vcmp.eq.f32.partialorder %v2589_v31, 8.507059e+37 }
0x3884   :  { %v3340_v34 = vpop.eup %3339 }
0x3885   :  { %v2581_v59 = vmul.f32 %v3340_v34, %v2579_v30  ;;  %vm2586_vm10 = vweird.f32 %v3340_v34 }
0x3886   :  { %vm2587_vm12 = vmor %vm2585_vm11, %vm2586_vm10 }
0x3887   :  { %v2582_v21 = vsub.f32 1.0, %v2581_v59 }
0x3889   :  { %v2583_v8 = vmul.f32 %v3340_v34, %v2582_v21 }
0x388b   :  { %v2584_v10 = vadd.f32 %v3340_v34, %v2583_v8 }
0x388d   :  { %v2588_v48 = vsel %vm2587_vm12, %v3340_v34, %v2584_v10 }
0x388e   :  { %v2593_v18 = vsel %vm2590_vm13, %v2592_v60, %v2588_v48 }
0x388f   :  { %v2596_v49 = vmul.f32 %v2593_v18, %v4387_v16 }
0x38ec   :  { %v2599_v5 = vpop.permute.xlu0 %2598 }
0x38ed   :  { %v2601_v35 = vmul.f32 %v2599_v5, %v2593_v18 }
0x38ef   :  { %2603 = vrot.lane.b32.xlu2 %v2601_v35, %s3634_s17 }
0x3949   :  { %v2604_v32 = vpop.permute.xlu2 %2603 }
0x394a   :  { %v4457_v36 = vadd.f32 %v2604_v32, %v2596_v49 }
0x394c   :  { %3341 = vtanh.f32 %v4457_v36 }
0x3952   :  { %v3342_v23 = vpop.eup %3341 }
0x3953   :  { %2609 = vrot.lane.b32.xlu0 %v3342_v23, %s3623_s29 }
0x39c5   :  { %v2610_v1 = vpop.permute.xlu0 %2609 }
0x39c6   :  { %v2612_v50 = vmul.f32 %v2610_v1, %v2593_v18 }
0x39c8   :  { %v2613_v51 = vpack.c.bf16 %v2612_v50, %v2612_v50 }
0x39ca   :  { %2615 = vrot.lane.b32.xlu1 %v2613_v51, %s3634_s17 }
0x3a3c   :  { %v2616_v33 = vpop.permute.xlu1 %2615 }
0x3a3d   :  { %3062 = vmatmul.msk.bf16.vlgmr.msra.gmra.mxu3 %vm268_vm4, %v2616_v33 }
0x3a4d   :  { %3070 = vmatmul.msk.bf16.vlgmr.msrb.gmra.mxu3 %vm268_vm4, %v2616_v33 }
0x3ac0   :  { %v2629_v52 = vpop.f32.mrf.mxu3 }
0x3ac1   :  { %v2630_v16 = vadd.f32 %v4421_v28, %v2629_v52 }
0x3ac3   :  { %2634 = vst [vmem:[#allocation18 + $0x30] sm:$0xff] %v2630_v16  ;;  %v2635_v2 = vsel %vm1561_vm14, %v2630_v16, -1e+30 }
0x3ac4   :  { %2636 = vmax.xlane.f32.xlu2 %v2635_v2 }
0x3ac8   :  { %v2631_v3 = vpop.f32.mrf.mxu3 }
0x3ad0   :  { %v4467_v63 = vpop.f32.mrf.mxu3 }
0x3ad8   :  { %v2759_v54 = vpop.f32.mrf.mxu3 }
0x3b37   :  { %v2637_v57 = vpop.xlane.xlu2 %2636 }
0x3b38   :  { %vm2638_vm15 = vcmp.eq.f32.partialorder %v2635_v2, %v2637_v57 }
0x3b39   :  { %v2639_v58 = vsel %vm2638_vm15, %v4103_v62, 128 }
0x3b3a   :  { %v2641_v61 = vshra.s32 %v2639_v58, 16  ;;  %v2640_v15 = vand.u32 65535, %v2639_v58 }
0x3b3c   :  { %v2643_v0 = vcvt.s32.f32 %v2641_v61  ;;  %v2642_v25 = vcvt.s32.f32 %v2640_v15 }
0x3b3e   :  { %2644 = vmin.xlane.f32.xlu0 %v2643_v0 }
0x3bb1   :  { %v2645_v7 = vpop.xlane.xlu0 %2644 }
0x3bb2   :  { %vm2646_vm1 = vcmp.eq.f32.partialorder %v2643_v0, %v2645_v7  ;;  %v2651_v53 = vcvt.f32.s32 %v2645_v7 }
0x3bb3   :  { %v2647_v26 = vsel %vm2646_vm1, %v2642_v25, inf }
0x3bb4   :  { %2648 = vmin.xlane.f32.xlu1 %v2647_v26  ;;  %v2652_v4 = vshll.u32 %v2651_v53, 16 }
0x3c27   :  { %v2649_v19 = vpop.xlane.xlu1 %2648 }
0x3c28   :  { %v2650_v11 = vcvt.f32.s32 %v2649_v19 }
0x3c2a   :  { %v2653_v12 = vadd.s32 %v2652_v4, %v2650_v11 }
0x3c2c   :  { %vm2654_vm14 = vcmp.eq.s32.totalorder %v4103_v62, %v2653_v12 }
0x3c2d   :  { %vm3064_vm2 = vmpackc.low %vm2654_vm14, %vm2654_vm14 }
0x3c2e   :  { %3065 = vmatmul.msk.bf16.vlgmr.msrb.gmra.mxu0 %vm3064_vm2, %v3635_v44 }
0x3cab   :  { %v2667_v39 = vpop.f32.mrf.mxu0 }
0x3cac   :  { %v2671_v40 = vpack.c.bf16 %v2667_v39, %v2667_v39 }
0x3cae   :  { %v2679_v41 = vsel %vm2678_vm3, %v2673_v55, %v2671_v40 }
0x3caf   :  { %3068 = vmatmul.msk.bf16.vlgmr.msrb.gmra.mxu2 %vm1370_vm0, %v2679_v41 }
0x3cb3   :  { %v2669_v17 = vpop.f32.mrf.mxu0 }
0x3d32   :  { %v2705_v42 = vpop.f32.mrf.mxu2 }
0x3d33   :  { %v2706_v56 = vadd.f32 %v2705_v42, %v4450_v47 }
0x3d35   :  { %v2709_v62 = vadd.f32 %v4292_v9, %v2706_v56 }
0x3d37   :  { %3343 = vtanh.f32 %v2709_v62  ;;  %v3069_v45 = vmul.f32 -1.442695, %v2709_v62 }
0x3d39   :  { %3345 = vpow2.f32 %v3069_v45 }
0x3d3a   :  { %v2707_v43 = vpop.f32.mrf.mxu2 }
0x3d3d   :  { %v3344_v44 = vpop.eup %3343 }
0x3d3e   :  { %2732 = vrot.lane.b32.xlu2 %v3344_v44, %s3623_s29 }
0x3d3f   :  { %v3346_v6 = vpop.eup %3345 }
0x3d40   :  { %v2713_v22 = vadd.f32 1.0, %v3346_v6 }
0x3d42   :  { %3347 = vrcp.f32 %v2713_v22  ;;  %v2725_v30 = vand.u32 2147483648, %v2713_v22  ;;  %vm2719_vm5 = vweird.f32 %v2713_v22  ;;  %v2723_v47 = vand.u32 2147483647, %v2713_v22 }
0x3d44   :  { %v2726_v34 = vor.u32 1.1754944e-38, %v2725_v30  ;;  %vm2724_vm7 = vcmp.eq.f32.partialorder %v2723_v47, 8.507059e+37 }
0x3d48   :  { %v3348_v14 = vpop.eup %3347 }
0x3d49   :  { %v2715_v27 = vmul.f32 %v3348_v14, %v2713_v22  ;;  %vm2720_vm0 = vweird.f32 %v3348_v14 }
0x3d4a   :  { %vm2721_vm6 = vmor %vm2719_vm5, %vm2720_vm0 }
0x3d4b   :  { %v2716_v46 = vsub.f32 1.0, %v2715_v27 }
0x3d4d   :  { %v2717_v29 = vmul.f32 %v3348_v14, %v2716_v46 }
0x3d4f   :  { %v2718_v13 = vadd.f32 %v3348_v14, %v2717_v29 }
0x3d51   :  { %v2722_v9 = vsel %vm2721_vm6, %v3348_v14, %v2718_v13 }
0x3d52   :  { %v2727_v21 = vsel %vm2724_vm7, %v2726_v34, %v2722_v9 }
0x3d53   :  { %v2730_v10 = vmul.f32 %v2727_v21, %v4441_v20 }
0x3d98   :  { %v2733_v59 = vpop.permute.xlu2 %2732 }
0x3d99   :  { %v2735_v8 = vmul.f32 %v2733_v59, %v2727_v21 }
0x3d9b   :  { %2737 = vrot.lane.b32.xlu0 %v2735_v8, %s3634_s17 }
0x3e0d   :  { %v2738_v37 = vpop.permute.xlu0 %2737 }
0x3e0e   :  { %v2740_v31 = vadd.f32 %v2738_v37, %v2730_v10 }
0x3e10   :  { %3349 = vtanh.f32 %v2740_v31 }
0x3e16   :  { %v3350_v48 = vpop.eup %3349 }
0x3e17   :  { %2743 = vrot.lane.b32.xlu1 %v3350_v48, %s3623_s29 }
0x3e89   :  { %v2744_v60 = vpop.permute.xlu1 %2743 }
0x3e8a   :  { %v2746_v5 = vmul.f32 %v2744_v60, %v2727_v21 }
0x3e8c   :  { %v2747_v18 = vpack.c.bf16 %v2746_v5, %v2746_v5 }
0x3e8e   :  { %2762 = vrot.lane.b32.xlu0 %v2747_v18, %s3634_s17 }
0x3f00   :  { %v2763_v35 = vpop.permute.xlu0 %2762 }
0x3f01   :  { %3071 = vmatmul.msk.bf16.vlgmr.msrb.gmra.mxu1 %vm268_vm4, %v2763_v35 }
0x3f7e   :  { %v2776_v49 = vpop.f32.mrf.mxu1 }
0x3f7f   :  { %v2777_v32 = vadd.f32 %v2776_v49, %v4467_v63 }
0x3f81   :  { %v2780_v23 = vadd.f32 %v4381_v24, %v2777_v32 }
0x3f83   :  { %3351 = vtanh.f32 %v2780_v23  ;;  %v3072_v50 = vmul.f32 -1.442695, %v2780_v23 }
0x3f85   :  { %3353 = vpow2.f32 %v3072_v50 }
0x3f86   :  { %v2778_v20 = vpop.f32.mrf.mxu1 }
0x3f89   :  { %v3352_v1 = vpop.eup %3351 }
0x3f8a   :  { %2803 = vrot.lane.b32.xlu2 %v3352_v1, %s3623_s29 }
0x3f8b   :  { %v3354_v51 = vpop.eup %3353 }
0x3f8c   :  { %v2784_v33 = vadd.f32 1.0, %v3354_v51 }
0x3f8e   :  { %3355 = vrcp.f32 %v2784_v33  ;;  %v2796_v57 = vand.u32 2147483648, %v2784_v33  ;;  %vm2790_vm9 = vweird.f32 %v2784_v33  ;;  %v2794_v63 = vand.u32 2147483647, %v2784_v33 }
0x3f90   :  { %v2797_v58 = vor.u32 1.1754944e-38, %v2796_v57  ;;  %vm2795_vm11 = vcmp.eq.f32.partialorder %v2794_v63, 8.507059e+37 }
0x3f94   :  { %v3356_v52 = vpop.eup %3355 }
0x3f95   :  { %v2786_v16 = vmul.f32 %v3356_v52, %v2784_v33  ;;  %vm2791_vm8 = vweird.f32 %v3356_v52 }
0x3f96   :  { %vm2792_vm10 = vmor %vm2790_vm9, %vm2791_vm8 }
0x3f97   :  { %v2787_v2 = vsub.f32 1.0, %v2786_v16 }
0x3f99   :  { %v2788_v3 = vmul.f32 %v3356_v52, %v2787_v2 }
0x3f9b   :  { %v2789_v54 = vadd.f32 %v3356_v52, %v2788_v3 }
0x3f9d   :  { %v2793_v24 = vsel %vm2792_vm10, %v3356_v52, %v2789_v54 }
0x3f9e   :  { %v2798_v0 = vsel %vm2795_vm11, %v2797_v58, %v2793_v24 }
0x3f9f   :  { %v2801_v7 = vmul.f32 %v2798_v0, %v4457_v36 }
0x3fe4   :  { %v2804_v61 = vpop.permute.xlu2 %2803 }
0x3fe5   :  { %v2806_v15 = vmul.f32 %v2804_v61, %v2798_v0 }
0x3fe7   :  { %2808 = vrot.lane.b32.xlu1 %v2806_v15, %s3634_s17 }
0x4059   :  { %v2809_v25 = vpop.permute.xlu1 %2808 }
0x405a   :  { %v2811_v26 = vadd.f32 %v2809_v25, %v2801_v7 }
0x405c   :  { %3357 = vtanh.f32 %v2811_v26 }
0x4062   :  { %v3358_v53 = vpop.eup %3357 }
0x4063   :  { %2814 = vrot.lane.b32.xlu0 %v3358_v53, %s3623_s29  ;;  %s3638_s29 = smov 128  }
0x40d5   :  { %v2815_v19 = vpop.permute.xlu0 %2814 }
0x40d6   :  { %v2817_v4 = vmul.f32 %v2815_v19, %v2798_v0 }
0x40d8   :  { %v2818_v11 = vpack.c.bf16 %v2817_v4, %v2817_v4 }
0x40da   :  { %2820 = vrot.lane.b32.xlu2 %v2818_v11, %s3634_s17 }
0x4134   :  { %v2821_v12 = vpop.permute.xlu2 %2820 }
0x4135   :  { %3073 = vmatmul.msk.bf16.vlgmr.msra.gmra.mxu2 %vm268_vm4, %v2821_v12 }
0x41b8   :  { %v2834_v36 = vpop.f32.mrf.mxu2 }
0x41b9   :  { %v2835_v39 = vadd.f32 %v4421_v28, %v2834_v36 }
0x41bb   :  { %2839 = vst [vmem:[#allocation18 + $0x38] sm:$0xff] %v2835_v39 }
0x41bc   :  { %2852 = dma.vmem_to_hbm [thread:$0]  %s2845_s20, 1024, %s2847_s22, [#allocation4], %s3638_s29, %s3638_s29, %s3639_s2  }
0x41c0   :  { %v2836_v55 = vpop.f32.mrf.mxu2 }
0x41c1   :  { %3620 = dma.done.wait [#allocation4], 1024  }
0x41c2   :  { %3621 = vsyncadd [#allocation4], 4294966272 }
0x41c3   :  { %2857 = vsyncpa [#allocation3], 1 }
0x41c4   :  { %2858 = vsyncpa [#allocation8], 1 }
0x41c5   :  { %2859 = vsyncpa [#allocation11], 1 }
0x41c6   :  { %2860 = vsyncpa [#allocation14], 1 }
0x41c7   :  { %2861 = vsyncpa [#allocation17], 1 }
0x41c8   :  { %2862 = vsyncpa [#allocation4], 1 }
0x41c9   :  { %2863 = vsyncpa [#allocation5], 1 }

</bundles_post_ra>
